<compile_context>
chip_gen: v7x
topology: tpu7x:2x2x1
jax: 0.10.0
libtpu: 0.0.40
codegen_flags: <defaults>
</compile_context>

<pallas_src>
import jax
import jax.numpy as jnp
from jax import lax
from jax.experimental import pallas as pl
from jax.experimental.pallas import tpu as pltpu

HIDDEN_SIZES = (25, 10, 5)
LATENT = 5
X_OFF = 8          # lane offset of x inside the packed input slab
NLAYERS = 9        # e1 e2 e3 means vars d1 d2 d3 out


def _round_up(v, m):
    return ((v + m - 1) // m) * m


def _feature_width(x_dim):
    # lanes: [eps 0..4][pad][x  X_OFF..X_OFF+x_dim-1] ... [ones lane at F-1]
    need = max(X_OFF + x_dim, max(HIDDEN_SIZES + (2 * LATENT, x_dim))) + 1
    return _round_up(need, 128)


def _layer_dims(x_dim):
    """(name, fan_in, fan_out, weight_row_offset, carry_ones_lane)."""
    h1, h2, h3 = HIDDEN_SIZES
    return (
        ("e1",  x_dim,  h1,     X_OFF, True),
        ("e2",  h1,     h2,     0,     True),
        ("e3",  h2,     h3,     0,     True),
        ("m",   h3,     LATENT, 0,     True),    # carries ones lane into z
        ("v",   h3,     LATENT, 0,     False),   # duplicated cols (see pack)
        ("d1",  LATENT, h3,     0,     True),
        ("d2",  h3,     h2,     0,     True),
        ("d3",  h2,     h1,     0,     True),
        ("out", h1,     x_dim,  0,     False),
    )


# -----------------------------------------------------------------------------
# Parameters
# -----------------------------------------------------------------------------
def init_params(key, x_dim):
    """Init mirroring the PyTorch module (weights stored (fan_in, fan_out))."""
    params = {}
    keys = jax.random.split(key, 2 * NLAYERS)
    for i, (name, fin, fout, _, _) in enumerate(_layer_dims(x_dim)):
        kw, kb = keys[2 * i], keys[2 * i + 1]
        if name == "v":
            # nn.init.uniform_(linear_vars.weight, -0.01, 0.01); bias = 0
            w = jax.random.uniform(kw, (fin, fout), jnp.float32, -0.01, 0.01)
            b = jnp.zeros((fout,), jnp.float32)
        else:
            bound = 1.0 / float(fin) ** 0.5   # torch default U(-1/sqrt(fin), +)
            w = jax.random.uniform(kw, (fin, fout), jnp.float32, -bound, bound)
            b = jax.random.uniform(kb, (fout,), jnp.float32, -bound, bound)
        params[name] = (w, b)
    return params


def pack_params(params, x_dim, dtype=jnp.bfloat16):
    """Pack every layer into a tile-aligned (NLAYERS, F, F) bf16 slab.

    Per layer: W at rows [row_off, row_off+fin) x cols [0, fout), bias folded
    into row F-1 (fed by the pinned ones-lane), and (F-1, F-1)=1 when the ones
    lane must be carried to the next layer.  The vars head is duplicated into
    cols [0,5) and [5,10) so both the re-parameterization and the packed
    [means | log_var] stats output need no lane shuffles.
    """
    F = _feature_width(x_dim)
    slab = jnp.zeros((NLAYERS, F, F), jnp.float32)
    for i, (name, fin, fout, roff, carry) in enumerate(_layer_dims(x_dim)):
        w, b = params[name]
        if name == "v":
            w = jnp.concatenate([w, w], axis=1)
            b = jnp.concatenate([b, b], axis=0)
            fout = 2 * LATENT
        slab = slab.at[i, roff:roff + fin, :fout].set(w)
        slab = slab.at[i, F - 1, :fout].set(b)
        if carry:
            slab = slab.at[i, F - 1, F - 1].set(1.0)
    return slab.astype(dtype)


# -----------------------------------------------------------------------------
# Kernel
# -----------------------------------------------------------------------------
def _vae_kernel(inp_ref, p_ref, xhat_ref, stats_ref):
    h0 = inp_ref[...]                                     # bf16 (tile_b, F)

    def matmul(h, idx):
        # bf16 x bf16 -> f32 accumulate: native single-pass MXU path
        return jnp.dot(h, p_ref[idx], preferred_element_type=jnp.float32)

    def relu_layer(h, idx):
        return jnp.maximum(matmul(h, idx), 0.0).astype(jnp.bfloat16)

    # ---- encoder MLP (Dropout = identity in eval mode) ----
    h = relu_layer(h0, 0)                                 # e1
    h = relu_layer(h, 1)                                  # e2
    h = relu_layer(h, 2)                                  # e3

    # ---- encoder heads (bias folded, lane placement via weight packing) ----
    means = matmul(h, 3)       # lanes [0,5) = means, lane F-1 = 1.0, rest 0
    vraw = matmul(h, 4)        # lanes [0,5) and [5,10) = vars pre-activation
    # numerically stable softplus; off-lane garbage is masked out downstream
    log_var = jnp.maximum(vraw, 0.0) + jnp.log1p(jnp.exp(-jnp.abs(vraw)))

    lane = lax.broadcasted_iota(jnp.int32, means.shape, 1)
    eps = jnp.where(lane < LATENT, h0.astype(jnp.float32), 0.0)
    # z: lanes [0,5)=z, lane F-1 = 1.0 (ones carry), everything else 0
    z = means + eps * jnp.exp(0.5 * log_var)

    # ---- decoder MLP ----
    d = relu_layer(z.astype(jnp.bfloat16), 5)             # d1
    d = relu_layer(d, 6)                                  # d2
    d = relu_layer(d, 7)                                  # d3
    logits = matmul(d, 8)                                 # lanes [0, x_dim)

    # sigmoid with a single EUP transcendental (tanh)
    xhat_ref[...] = 0.5 * (jnp.tanh(0.5 * logits) + 1.0)
    # packed stats: [means | log_var] at lanes [0, 10), zeros elsewhere
    stats_ref[...] = jnp.where(lane < LATENT, means,
                               jnp.where(lane < 2 * LATENT, log_var, 0.0))


# -----------------------------------------------------------------------------
# Wrapper
# -----------------------------------------------------------------------------
def vae_forward(x, eps, param_slab, *, max_tile_b=1024):
    """x: (batch, x_dim), eps: (batch, LATENT), param_slab: pack_params()."""
    batch, x_dim = x.shape
    F = _feature_width(x_dim)
    assert param_slab.shape == (NLAYERS, F, F), param_slab.shape

    # >= 4 grid steps when the batch allows (v7x: 2 TCs need >= 2 parallel
    # steps; 4 keeps the in/out pipeline busy); multiple of 16 sublanes (bf16).
    tile_b = min(max_tile_b, _round_up(max(-(-batch // 4), 16), 16))
    padded_b = _round_up(batch, tile_b)

    # Single lane-dense bf16 input slab: [eps | 0 | x | 0 ... | 1.0]
    inp = jnp.zeros((padded_b, F), jnp.bfloat16)
    inp = inp.at[:batch, :LATENT].set(eps.astype(jnp.bfloat16))
    inp = inp.at[:batch, X_OFF:X_OFF + x_dim].set(x.astype(jnp.bfloat16))
    inp = inp.at[:, F - 1].set(1.0)   # ones lane -> folded biases

    xhat_pad, stats_pad = pl.pallas_call(
        _vae_kernel,
        out_shape=(jax.ShapeDtypeStruct((padded_b, F), jnp.float32),
                   jax.ShapeDtypeStruct((padded_b, F), jnp.float32)),
        grid=(padded_b // tile_b,),
        in_specs=[
            pl.BlockSpec((tile_b, F), lambda i: (i, 0)),
            # constant index_map -> parameter slab stays VMEM-resident
            pl.BlockSpec((NLAYERS, F, F), lambda i: (0, 0, 0)),
        ],
        out_specs=[
            pl.BlockSpec((tile_b, F), lambda i: (i, 0)),
            pl.BlockSpec((tile_b, F), lambda i: (i, 0)),
        ],
        compiler_params=pltpu.CompilerParams(
            dimension_semantics=("parallel",),
            vmem_limit_bytes=32 * 1024 * 1024),
    )(inp, param_slab)

    x_hat = xhat_pad[:batch, :x_dim]
    means = stats_pad[:batch, :LATENT]
    log_var = stats_pad[:batch, LATENT:2 * LATENT]
    return x_hat, means, log_var


# -----------------------------------------------------------------------------
# Pure-JAX reference (for the demo correctness check)
# -----------------------------------------------------------------------------
def vae_reference(x, eps, params):
    relu = lambda v: jnp.maximum(v, 0.0)
    h = x
    for n in ("e1", "e2", "e3"):
        w, b = params[n]
        h = relu(h @ w + b)
    wm, bm = params["m"]
    wv, bv = params["v"]
    means = h @ wm + bm
    log_var = jax.nn.softplus(h @ wv + bv)
    z = means + eps * jnp.exp(0.5 * log_var)
    d = z
    for n in ("d1", "d2", "d3"):
        w, b = params[n]
        d = relu(d @ w + b)
    wo, bo = params["out"]
    return jax.nn.sigmoid(d @ wo + bo), means, log_var


if __name__ == "__main__":
    key = jax.random.PRNGKey(0)
    k_p, k_x, k_e = jax.random.split(key, 3)

    batch, x_dim = 1024, 32

    params = init_params(k_p, x_dim)
    slab = pack_params(params, x_dim)

    x = jax.random.uniform(k_x, (batch, x_dim), jnp.float32)
    eps = jax.random.normal(k_e, (batch, LATENT), jnp.float32)

    x_hat, means, log_var = jax.block_until_ready(vae_forward(x, eps, slab))

    assert x_hat.shape == (batch, x_dim)
    assert means.shape == (batch, LATENT)
    assert log_var.shape == (batch, LATENT)

    # reference through the same bf16 quantization of params / x / eps
    # (kernel accumulates in f32 with bf16 activations between layers)
    q = lambda a: a.astype(jnp.bfloat16).astype(jnp.float32)
    params_q = {k: (q(w), q(b)) for k, (w, b) in params.items()}
    ref_xhat, ref_means, ref_logvar = vae_reference(q(x), q(eps), params_q)

    tol = dict(atol=5e-2, rtol=5e-2)
    assert bool(jnp.allclose(x_hat, ref_xhat, **tol)), "x_hat mismatch"
    assert bool(jnp.allclose(means, ref_means, **tol)), "means mismatch"
    assert bool(jnp.allclose(log_var, ref_logvar, **tol)), "log_var mismatch"

    print("KERNEL_OK")
</pallas_src>

<mosaic_0001>
module attributes {stable_mosaic.version = 11 : i64} {
  func.func @_vae_kernel(%arg0: i32, %arg1: memref<256x128xbf16, #tpu.memory_space<vmem>>, %arg2: memref<9x128x128xbf16, #tpu.memory_space<vmem>>, %arg3: memref<256x128xf32, #tpu.memory_space<vmem>>, %arg4: memref<256x128xf32, #tpu.memory_space<vmem>>) attributes {dimension_semantics = [#tpu.dimension_semantics<parallel>], iteration_bounds = array<i64: 4>, scalar_prefetch = 0 : i64, scratch_operands = 0 : i64, tpu.core_type = #tpu.core_type<tc>, window_params = [{transform_indices = @transform_0, window_bounds = array<i64: 256, 128>}, {pipeline_mode = #tpu.pipeline_mode<synchronous>, transform_indices = @transform_1, window_bounds = array<i64: 9, 128, 128>}, {transform_indices = @transform_2, window_bounds = array<i64: 256, 128>}, {transform_indices = @transform_3, window_bounds = array<i64: 256, 128>}]} {
    %c0 = arith.constant 0 : index
    %c0_0 = arith.constant 0 : index
    %0 = vector.load %arg1[%c0, %c0_0] : memref<256x128xbf16, #tpu.memory_space<vmem>>, vector<256x128xbf16>
    %c0_1 = arith.constant 0 : index
    %c0_2 = arith.constant 0 : index
    %c0_3 = arith.constant 0 : index
    %1 = vector.load %arg2[%c0_1, %c0_2, %c0_3] : memref<9x128x128xbf16, #tpu.memory_space<vmem>>, vector<1x128x128xbf16>
    %2 = vector.shape_cast %1 : vector<1x128x128xbf16> to vector<128x128xbf16>
    %cst = arith.constant dense<0.000000e+00> : vector<256x128xf32>
    %3 = tpu.matmul %0, %2, %cst {dimension_numbers = #tpu.dot_dimension_numbers<[1], [0], [0], [1], [0, 0, 1, 1], [], []>} : vector<256x128xbf16>, vector<128x128xbf16>, vector<256x128xf32> -> vector<256x128xf32>
    %cst_4 = arith.constant 0.000000e+00 : f32
    %4 = vector.broadcast %cst_4 : f32 to vector<256x128xf32>
    %5 = arith.maximumf %3, %4 : vector<256x128xf32>
    %6 = arith.truncf %5 : vector<256x128xf32> to vector<256x128xbf16>
    %c1 = arith.constant 1 : index
    %c0_5 = arith.constant 0 : index
    %c0_6 = arith.constant 0 : index
    %7 = vector.load %arg2[%c1, %c0_5, %c0_6] : memref<9x128x128xbf16, #tpu.memory_space<vmem>>, vector<1x128x128xbf16>
    %8 = vector.shape_cast %7 : vector<1x128x128xbf16> to vector<128x128xbf16>
    %cst_7 = arith.constant dense<0.000000e+00> : vector<256x128xf32>
    %9 = tpu.matmul %6, %8, %cst_7 {dimension_numbers = #tpu.dot_dimension_numbers<[1], [0], [0], [1], [0, 0, 1, 1], [], []>} : vector<256x128xbf16>, vector<128x128xbf16>, vector<256x128xf32> -> vector<256x128xf32>
    %cst_8 = arith.constant 0.000000e+00 : f32
    %10 = vector.broadcast %cst_8 : f32 to vector<256x128xf32>
    %11 = arith.maximumf %9, %10 : vector<256x128xf32>
    %12 = arith.truncf %11 : vector<256x128xf32> to vector<256x128xbf16>
    %c2 = arith.constant 2 : index
    %c0_9 = arith.constant 0 : index
    %c0_10 = arith.constant 0 : index
    %13 = vector.load %arg2[%c2, %c0_9, %c0_10] : memref<9x128x128xbf16, #tpu.memory_space<vmem>>, vector<1x128x128xbf16>
    %14 = vector.shape_cast %13 : vector<1x128x128xbf16> to vector<128x128xbf16>
    %cst_11 = arith.constant dense<0.000000e+00> : vector<256x128xf32>
    %15 = tpu.matmul %12, %14, %cst_11 {dimension_numbers = #tpu.dot_dimension_numbers<[1], [0], [0], [1], [0, 0, 1, 1], [], []>} : vector<256x128xbf16>, vector<128x128xbf16>, vector<256x128xf32> -> vector<256x128xf32>
    %cst_12 = arith.constant 0.000000e+00 : f32
    %16 = vector.broadcast %cst_12 : f32 to vector<256x128xf32>
    %17 = arith.maximumf %15, %16 : vector<256x128xf32>
    %18 = arith.truncf %17 : vector<256x128xf32> to vector<256x128xbf16>
    %c3 = arith.constant 3 : index
    %c0_13 = arith.constant 0 : index
    %c0_14 = arith.constant 0 : index
    %19 = vector.load %arg2[%c3, %c0_13, %c0_14] : memref<9x128x128xbf16, #tpu.memory_space<vmem>>, vector<1x128x128xbf16>
    %20 = vector.shape_cast %19 : vector<1x128x128xbf16> to vector<128x128xbf16>
    %cst_15 = arith.constant dense<0.000000e+00> : vector<256x128xf32>
    %21 = tpu.matmul %18, %20, %cst_15 {dimension_numbers = #tpu.dot_dimension_numbers<[1], [0], [0], [1], [0, 0, 1, 1], [], []>} : vector<256x128xbf16>, vector<128x128xbf16>, vector<256x128xf32> -> vector<256x128xf32>
    %c4 = arith.constant 4 : index
    %c0_16 = arith.constant 0 : index
    %c0_17 = arith.constant 0 : index
    %22 = vector.load %arg2[%c4, %c0_16, %c0_17] : memref<9x128x128xbf16, #tpu.memory_space<vmem>>, vector<1x128x128xbf16>
    %23 = vector.shape_cast %22 : vector<1x128x128xbf16> to vector<128x128xbf16>
    %cst_18 = arith.constant dense<0.000000e+00> : vector<256x128xf32>
    %24 = tpu.matmul %18, %23, %cst_18 {dimension_numbers = #tpu.dot_dimension_numbers<[1], [0], [0], [1], [0, 0, 1, 1], [], []>} : vector<256x128xbf16>, vector<128x128xbf16>, vector<256x128xf32> -> vector<256x128xf32>
    %cst_19 = arith.constant 0.000000e+00 : f32
    %25 = vector.broadcast %cst_19 : f32 to vector<256x128xf32>
    %26 = arith.maximumf %24, %25 : vector<256x128xf32>
    %27 = math.absf %24 : vector<256x128xf32>
    %cst_20 = arith.constant 0.000000e+00 : f32
    %28 = vector.broadcast %cst_20 : f32 to vector<256x128xf32>
    %29 = arith.subf %28, %27 : vector<256x128xf32>
    %30 = math.exp %29 : vector<256x128xf32>
    %31 = math.log1p %30 : vector<256x128xf32>
    %32 = arith.addf %26, %31 : vector<256x128xf32>
    %33 = tpu.iota {dimensions = array<i32: 1>} : vector<256x128xi32>
    %c5_i32 = arith.constant 5 : i32
    %34 = vector.broadcast %c5_i32 : i32 to vector<256x128xi32>
    %35 = arith.cmpi slt, %33, %34 : vector<256x128xi32>
    %36 = arith.extf %0 : vector<256x128xbf16> to vector<256x128xf32>
    %cst_21 = arith.constant 0.000000e+00 : f32
    %37 = vector.broadcast %cst_21 : f32 to vector<256x128xf32>
    %38 = arith.select %35, %36, %37 : vector<256x128xi1>, vector<256x128xf32>
    %cst_22 = arith.constant 5.000000e-01 : f32
    %39 = vector.broadcast %cst_22 : f32 to vector<256x128xf32>
    %40 = arith.mulf %39, %32 : vector<256x128xf32>
    %41 = math.exp %40 : vector<256x128xf32>
    %42 = arith.mulf %38, %41 : vector<256x128xf32>
    %43 = arith.addf %21, %42 : vector<256x128xf32>
    %44 = arith.truncf %43 : vector<256x128xf32> to vector<256x128xbf16>
    %c5 = arith.constant 5 : index
    %c0_23 = arith.constant 0 : index
    %c0_24 = arith.constant 0 : index
    %45 = vector.load %arg2[%c5, %c0_23, %c0_24] : memref<9x128x128xbf16, #tpu.memory_space<vmem>>, vector<1x128x128xbf16>
    %46 = vector.shape_cast %45 : vector<1x128x128xbf16> to vector<128x128xbf16>
    %cst_25 = arith.constant dense<0.000000e+00> : vector<256x128xf32>
    %47 = tpu.matmul %44, %46, %cst_25 {dimension_numbers = #tpu.dot_dimension_numbers<[1], [0], [0], [1], [0, 0, 1, 1], [], []>} : vector<256x128xbf16>, vector<128x128xbf16>, vector<256x128xf32> -> vector<256x128xf32>
    %cst_26 = arith.constant 0.000000e+00 : f32
    %48 = vector.broadcast %cst_26 : f32 to vector<256x128xf32>
    %49 = arith.maximumf %47, %48 : vector<256x128xf32>
    %50 = arith.truncf %49 : vector<256x128xf32> to vector<256x128xbf16>
    %c6 = arith.constant 6 : index
    %c0_27 = arith.constant 0 : index
    %c0_28 = arith.constant 0 : index
    %51 = vector.load %arg2[%c6, %c0_27, %c0_28] : memref<9x128x128xbf16, #tpu.memory_space<vmem>>, vector<1x128x128xbf16>
    %52 = vector.shape_cast %51 : vector<1x128x128xbf16> to vector<128x128xbf16>
    %cst_29 = arith.constant dense<0.000000e+00> : vector<256x128xf32>
    %53 = tpu.matmul %50, %52, %cst_29 {dimension_numbers = #tpu.dot_dimension_numbers<[1], [0], [0], [1], [0, 0, 1, 1], [], []>} : vector<256x128xbf16>, vector<128x128xbf16>, vector<256x128xf32> -> vector<256x128xf32>
    %cst_30 = arith.constant 0.000000e+00 : f32
    %54 = vector.broadcast %cst_30 : f32 to vector<256x128xf32>
    %55 = arith.maximumf %53, %54 : vector<256x128xf32>
    %56 = arith.truncf %55 : vector<256x128xf32> to vector<256x128xbf16>
    %c7 = arith.constant 7 : index
    %c0_31 = arith.constant 0 : index
    %c0_32 = arith.constant 0 : index
    %57 = vector.load %arg2[%c7, %c0_31, %c0_32] : memref<9x128x128xbf16, #tpu.memory_space<vmem>>, vector<1x128x128xbf16>
    %58 = vector.shape_cast %57 : vector<1x128x128xbf16> to vector<128x128xbf16>
    %cst_33 = arith.constant dense<0.000000e+00> : vector<256x128xf32>
    %59 = tpu.matmul %56, %58, %cst_33 {dimension_numbers = #tpu.dot_dimension_numbers<[1], [0], [0], [1], [0, 0, 1, 1], [], []>} : vector<256x128xbf16>, vector<128x128xbf16>, vector<256x128xf32> -> vector<256x128xf32>
    %cst_34 = arith.constant 0.000000e+00 : f32
    %60 = vector.broadcast %cst_34 : f32 to vector<256x128xf32>
    %61 = arith.maximumf %59, %60 : vector<256x128xf32>
    %62 = arith.truncf %61 : vector<256x128xf32> to vector<256x128xbf16>
    %c8 = arith.constant 8 : index
    %c0_35 = arith.constant 0 : index
    %c0_36 = arith.constant 0 : index
    %63 = vector.load %arg2[%c8, %c0_35, %c0_36] : memref<9x128x128xbf16, #tpu.memory_space<vmem>>, vector<1x128x128xbf16>
    %64 = vector.shape_cast %63 : vector<1x128x128xbf16> to vector<128x128xbf16>
    %cst_37 = arith.constant dense<0.000000e+00> : vector<256x128xf32>
    %65 = tpu.matmul %62, %64, %cst_37 {dimension_numbers = #tpu.dot_dimension_numbers<[1], [0], [0], [1], [0, 0, 1, 1], [], []>} : vector<256x128xbf16>, vector<128x128xbf16>, vector<256x128xf32> -> vector<256x128xf32>
    %cst_38 = arith.constant 5.000000e-01 : f32
    %66 = vector.broadcast %cst_38 : f32 to vector<256x128xf32>
    %67 = arith.mulf %66, %65 : vector<256x128xf32>
    %68 = math.tanh %67 : vector<256x128xf32>
    %cst_39 = arith.constant 1.000000e+00 : f32
    %69 = vector.broadcast %cst_39 : f32 to vector<256x128xf32>
    %70 = arith.addf %68, %69 : vector<256x128xf32>
    %cst_40 = arith.constant 5.000000e-01 : f32
    %71 = vector.broadcast %cst_40 : f32 to vector<256x128xf32>
    %72 = arith.mulf %71, %70 : vector<256x128xf32>
    %c0_41 = arith.constant 0 : index
    %c0_42 = arith.constant 0 : index
    %73 = vector.load %arg3[%c0_41, %c0_42] : memref<256x128xf32, #tpu.memory_space<vmem>>, vector<256x128xf32>
    tpu.vector_store %arg3[%c0_41, %c0_42], %72 {strides = array<i32>} : memref<256x128xf32, #tpu.memory_space<vmem>>, vector<256x128xf32>,
    %c5_i32_43 = arith.constant 5 : i32
    %74 = vector.broadcast %c5_i32_43 : i32 to vector<256x128xi32>
    %75 = arith.cmpi slt, %33, %74 : vector<256x128xi32>
    %c10_i32 = arith.constant 10 : i32
    %76 = vector.broadcast %c10_i32 : i32 to vector<256x128xi32>
    %77 = arith.cmpi slt, %33, %76 : vector<256x128xi32>
    %cst_44 = arith.constant 0.000000e+00 : f32
    %78 = vector.broadcast %cst_44 : f32 to vector<256x128xf32>
    %79 = arith.select %77, %32, %78 : vector<256x128xi1>, vector<256x128xf32>
    %80 = arith.select %75, %21, %79 : vector<256x128xi1>, vector<256x128xf32>
    %c0_45 = arith.constant 0 : index
    %c0_46 = arith.constant 0 : index
    %81 = vector.load %arg4[%c0_45, %c0_46] : memref<256x128xf32, #tpu.memory_space<vmem>>, vector<256x128xf32>
    tpu.vector_store %arg4[%c0_45, %c0_46], %80 {strides = array<i32>} : memref<256x128xf32, #tpu.memory_space<vmem>>, vector<256x128xf32>,
    return
  }
  func.func @transform_0(%arg0: i32) -> (i32, i32) {
    %c0_i32 = arith.constant 0 : i32
    %c0_i32_0 = arith.constant 0 : i32
    return %arg0, %c0_i32 : i32, i32
  }
  func.func @transform_1(%arg0: i32) -> (i32, i32, i32) {
    %c0_i32 = arith.constant 0 : i32
    %c0_i32_0 = arith.constant 0 : i32
    %c0_i32_1 = arith.constant 0 : i32
    %c0_i32_2 = arith.constant 0 : i32
    return %c0_i32, %c0_i32_0, %c0_i32_1 : i32, i32, i32
  }
  func.func @transform_2(%arg0: i32) -> (i32, i32) {
    %c0_i32 = arith.constant 0 : i32
    %c0_i32_0 = arith.constant 0 : i32
    return %arg0, %c0_i32 : i32, i32
  }
  func.func @transform_3(%arg0: i32) -> (i32, i32) {
    %c0_i32 = arith.constant 0 : i32
    %c0_i32_0 = arith.constant 0 : i32
    return %arg0, %c0_i32 : i32, i32
  }
}

</mosaic_0001>

<bundles_post_ra>
// kernel: tpu_custom_call.1
= control target key start
LH: loop header
LB: loop body
LE: loop exit
PB: predicated region body
PF: predicated region fallthrough
CT: control target
= control target key end

     0   :  { %9 = vsyncpa [#allocation3], 0  ;;  %s6494_s0 = inlined_call_operand.hbm [shape: bf16[1024,128], index: 0, kind: input, shape index: {}]   ;;  %s6495_s1 = inlined_call_operand.hbm [shape: bf16[9,128,128], index: 1, kind: input, shape index: {}]   ;;  %s6496_s2 = inlined_call_operand.hbm [shape: f32[1024,128], index: 2, kind: output, shape index: {0}]   ;;  %s6497_s3 = inlined_call_operand.hbm [shape: f32[1024,128], index: 3, kind: output, shape index: {1}]  }
   0x1   :  { %11 = vsyncpa [#allocation3 + $0x1], 0 }
   0x2   :  { %12 = vsyncpa [#allocation6], 0 }
   0x3   :  { %13 = vsyncpa [#allocation4], 0 }
   0x4   :  { %15 = vsyncpa [#allocation4 + $0x1], 0 }
   0x5   :  { %16 = vsyncpa [#allocation9], 0 }
   0x6   :  { %18 = vsyncpa [#allocation9 + $0x1], 0  ;;  %s5205_s12 = smov 0   ;;  %s5207_s13 = smov 0  }
   0x7   :  { %s5209_s14 = smov 0   ;;  %s5211_s15 = smov 0  }
   0x8 LB: > { %s5226_s16 = sadd.s32 4294967295, %s5175_s15   ;;  %s3798_s17 = sadd.s32 4294967294, %s5175_s15   ;;  %s5175_s15 = sphi %s5211_s15, %s6771_s15   ;;  %s5171_s14 = sphi %s5209_s14, %s6770_s14   ;;  %s5167_s13 = sphi %s5207_s13, %s6769_s13   ;;  %s5163_s12 = sphi %s5205_s12, %s6768_s12  }
   0x9   : > { %p44_p0 = scmp.ne.s32.totalorder %s5167_s13, %s5163_s12  ;;  %p6498_p1 = scmp.eq.s32.totalorder %s5226_s16, 0 }
   0xa   : > { %p95_p3 = scmp.eq.s32.totalorder %s3798_s17, 3  ;;  %p3799_p5 = scmp.ge.s32.totalorder %s5175_s15, 1 }
   0xb   : > { %p5235_p4 = por %p6498_p1, %p44_p0  ;;  %p128_p7 = scmp.lt.s32.totalorder %s5175_s15, 5 }
   0xc   : > { %p5240_p6 = por %p95_p3, %p44_p0  ;;  %s5177_s21 = smov [#allocation5]  }
   0xd   : > { %s6530_s18 = scalar_select %p5235_p4, 1, 0 }
   0xe   : > { %s6531_s19 = scalar_select %p5240_p6, 1, 0 }
   0xf   : > { %p5245_p8 = pnand %p3799_p5, %p128_p7  ;;  %s140_s22 = sshll.u32 %s5177_s21, 4  ;;  %s141_s22 = int_to_ptr.vmem [resolvable:$true] %s140_s22 }
  0x10   : > { %s5258_s24 = sadd.s32 1, %s5175_s15   ;;  %s31_s25 = sadd.s32 1, %s5171_s14 }
  0x11   : > { %s6532_s20 = scalar_select %p5245_p8, 1, 0 }
  0x12   : > { %p4583_p9 = pneg %p5245_p8  ;;  %s28_s26 = ssub.s32 %s5175_s15, %s5258_s24 }
  0x13   : > { %s5015_s29 = scalar_lea.hbm %s6495_s1, 9216 }
  0x14   : > { %p5253_p10 = pnand %p4583_p9, %p6498_p1  ;;  %p5016_p11 = scmp.ne.s32.totalorder %s6495_s1, %s5015_s29 }
  0x15   : > { %p5022_p3 = scmp.lt.u32.totalorder %s5015_s29, %s6495_s1 }
  0x16   : > { %p5017_p12 = pneg %p5253_p10 }
  0x18   : > { %p5018_p13 = pnand %p5017_p12, %p5016_p11 }
  0x1a   : > { %p5019_p0 = pneg %p5018_p13 }
  0x1c   : > { %p5024_p5 = pnand %p5022_p3, %p5019_p0 }
  0x1e   : > { %5027 = shalt.err (!%p5024_p5)
}
  0x1f   : > { %s5028_s7 = scalar_lea.vmem %s141_s22, 9216  ;;  %p5036_p2 = scmp.lt.s32.totalorder %s141_s22, %s141_s22 }
  0x20   : > { %p5029_p7 = scmp.ne.s32.totalorder %s141_s22, %s5028_s7  ;;  %p5037_p6 = scmp.lt.s32.totalorder %s5028_s7, %s5028_s7 }
  0x22   : > { %p5031_p9 = pnand %p5029_p7, %p5017_p12  ;;  %p5038_p4 = por %p5037_p6, %p5036_p2 }
  0x24   : > { %p5032_p1 = pneg %p5031_p9 }
  0x26   : > { %p5039_p8 = pnand %p5038_p4, %p5032_p1 }
  0x28   : > { %5042 = shalt.err (!%p5039_p8)
}
  0x29   : > { %s5178_s8 = smov 64   ;;  %s5179_s9 = smov 4  }
  0x2a   : > { %4586 = dma.hbm_to_vmem [thread:$0]  (!%p5253_p10), %s6495_s1, 9216, %s141_s22, [#allocation6], %s5178_s8, %s5178_s8, %s5179_s9  }
  0x2b   : > { %p29_p1 = scmp.eq.s32.totalorder %s28_s26, 0  ;;  %p38_p2 = scmp.ne.s32.totalorder %s5171_s14, %s5167_s13 }
  0x2c   : > { %p39_p4 = scmp.eq.s32.totalorder %s5175_s15, 0  ;;  %p4599_p6 = scmp.lt.s32.totalorder %s5175_s15, 4 }
  0x2d   : > { %s5287_s17 = scalar_select %p29_p1, %s5171_s14, %s31_s25  }
  0x2e   : > { %p40_p8 = por %p39_p4, %p38_p2  ;;  %p6534_p11 = scmp.eq.s32.totalorder %s5226_s16, 3 }
  0x2f   : > { %s154_s23 = sand.u32 1, %s5171_s14   ;;  %s3906_s27 = sshll.u32 %s5175_s15, 11 }
  0x30   : > { %p5291_p12 = por %p6534_p11, %p38_p2  ;;  %s3802_s28 = sshll.u32 %s154_s23, 7 }
  0x31   : > { %s5300_s4 = scalar_lea.hbm %s6494_s0, %s3906_s27  ;;  %s158_s22 = scalar_lea.vmem [#allocation2], %s3802_s28 }
  0x32   : > { %s165_s25 = sshll.u32 %s158_s22, 4  ;;  %p5302_p10 = pnand %p4599_p6, %p40_p8  ;;  %s5306_s25 = int_to_ptr.vmem [resolvable:$true] %s165_s25 }
  0x33   : > { %s5308_s5 = scalar_lea.sflag [#allocation3], %s154_s23  ;;  %s5043_s6 = scalar_lea.hbm %s5300_s4, 2048 }
  0x34   : > { %p5044_p13 = scmp.ne.s32.totalorder %s5300_s4, %s5043_s6  ;;  %p5045_p0 = pneg %p5302_p10 }
  0x35   : > { %s5048_s11 = scalar_lea.hbm %s6494_s0, 8192  ;;  %p5049_p7 = scmp.lt.u32.totalorder %s5300_s4, %s6494_s0 }
  0x36   : > { %p5046_p3 = pnand %p5045_p0, %p5044_p13  ;;  %p5050_p9 = scmp.lt.u32.totalorder %s5048_s11, %s5043_s6 }
  0x37   : > { %p5052_p2 = scmp.lt.u32.totalorder %s5043_s6, %s5300_s4 }
  0x38   : > { %p5047_p5 = pneg %p5046_p3  ;;  %p5051_p1 = por %p5050_p9, %p5049_p7 }
  0x3a   : > { %p5053_p4 = por %p5052_p2, %p5051_p1 }
  0x3c   : > { %p5054_p6 = pnand %p5053_p4, %p5047_p5 }
  0x3e   : > { %5057 = shalt.err (!%p5054_p6)
}
  0x3f   : > { %s5058_s23 = scalar_lea.vmem %s5306_s25, 2048  ;;  %s5180_s29 = smov [#allocation2]  }
  0x40   : > { %p5059_p8 = scmp.ne.s32.totalorder %s5306_s25, %s5058_s23  ;;  %s5063_s30 = sshll.u32 %s5180_s29, 4  ;;  %s5064_s30 = int_to_ptr.vmem [resolvable:$false] %s5063_s30 }
  0x41   : > { %s5065_s22 = scalar_lea.vmem %s5064_s30, 4096  ;;  %p5066_p3 = scmp.lt.s32.totalorder %s5306_s25, %s5064_s30 }
  0x42   : > { %p5061_p11 = pnand %p5059_p8, %p5045_p0  ;;  %p5067_p7 = scmp.lt.s32.totalorder %s5065_s22, %s5058_s23 }
  0x44   : > { %p5062_p13 = pneg %p5061_p11  ;;  %p5068_p9 = por %p5067_p7, %p5066_p3 }
  0x46   : > { %p5069_p1 = pnand %p5068_p9, %p5062_p13 }
  0x48   : > { %5072 = shalt.err (!%p5069_p1)
}
  0x49   : > { %4590 = dma.hbm_to_vmem [thread:$0]  (!%p5302_p10), %s5300_s4, 2048, %s5306_s25, %s5308_s5, %s5178_s8, %s5178_s8, %s5179_s9  }
  0x4a   : > { %p6537_p0 = scmp.ne.s32.totalorder %s6532_s20, 0 }
  0x4c   : > { %177 = sbr.rel (%p6537_p0) target bundleno = 2118 (0x846), region = 28 }
  0x53   : > { %s5342_s6 = sand.u32 1, %s5167_s13   ;;  %p6538_p5 = scmp.ne.s32.totalorder %s6530_s18, 0 }
  0x54   : > { %s3806_s7 = sshll.u32 %s5342_s6, 7  ;;  %s180_s10 = scalar_lea.sflag [#allocation3], %s5342_s6 }
  0x55   : > { %s5346_s11 = scalar_lea.vmem [#allocation2], %s3806_s7 }
  0x56   : > { %5146 = dma.done.wait (%p6538_p5), %s180_s10, 2048  }
  0x57   : > { %5148 = vsyncadd (%p6538_p5), %s180_s10, 4294965248  ;;  %p6539_p10 = scmp.eq.s32.totalorder %s5226_s16, 0 }
  0x59   : > { %5150 = dma.done.wait (%p6539_p10), [#allocation6], 9216   ;;  %p6540_p2 = pmov %p6539_p10 }
  0x5a   : > { %v4639_v0 = vld [vmem:[#allocation5] sm:$0xff]   ;;  %v4640_v1 = vld [vmem:[#allocation5 + $0x8] sm:$0xff]   ;;  %v4641_v2 = vld [vmem:[#allocation5 + $0x10] sm:$0xff]   ;;  %s3808_s18 = sshll.u32 %s5342_s6, 8  ;;  %s3907_s8 = sshll.u32 %s5226_s16, 12 }
  0x5b   : > { %5152 = vsyncadd (%p6540_p2), [#allocation6], 4294958080  ;;  %4125 = vmatprep.subr.bf16.mxu0 %v4639_v0  ;;  %4557 = vmatprep.subr.bf16.mxu1 %v4639_v0  ;;  %v4642_v3 = vld [vmem:[#allocation5 + $0x18] sm:$0xff]   ;;  %v219_v4 = vld [vmem:[%s5346_s11] sm:$0xff]   ;;  %s5673_s20 = scalar_lea.vmem [#allocation8], %s3808_s18  ;;  %s6372_s25 = scalar_lea.hbm %s6497_s3, %s3907_s8 }
  0x5c   : > { %4126 = vmatpush3.bf16.msra.mxu0 %v4639_v0  ;;  %4565 = vmatpush3.bf16.msra.mxu1 %v4639_v0  ;;  %v4643_v5 = vld [vmem:[#allocation5 + $0x20] sm:$0xff]   ;;  %v4644_v7 = vld [vmem:[#allocation5 + $0x28] sm:$0xff]   ;;  %v4645_v8 = vld [vmem:[#allocation5 + $0x30] sm:$0xff]   ;;  %s3683_s26 = sshll.u32 %s5673_s20, 4  ;;  %s3654_s5 = scalar_lea.sflag [#allocation9], %s5342_s6  ;;  %s6375_s26 = int_to_ptr.vmem [resolvable:$true] %s3683_s26 }
  0x5d   : > { %4127 = vmatprep.subr.bf16.mxu0 %v4640_v1  ;;  %4558 = vmatprep.subr.bf16.mxu1 %v4640_v1  ;;  %v235_v6 = vld [vmem:[%s5346_s11 + $0x40] sm:$0xff]   ;;  %v4646_v9 = vld [vmem:[#allocation5 + $0x38] sm:$0xff]   ;;  %v221_v10 = vld [vmem:[%s5346_s11 + $0x8] sm:$0xff]   ;;  %s5073_s27 = scalar_lea.vmem %s6375_s26, 4096  ;;  %s5181_s28 = smov [#allocation8]  }
  0x5e   : > { %4141 = vmatprep.mubr.bf16.mxu0 %v219_v4  ;;  %4157 = vmatprep.mubr.bf16.mxu1 %v235_v6  ;;  %v223_v11 = vld [vmem:[%s5346_s11 + $0x10] sm:$0xff]   ;;  %v237_v12 = vld [vmem:[%s5346_s11 + $0x48] sm:$0xff]   ;;  %v4663_v14 = vld [vmem:[#allocation5 + $0x40] sm:$0xff]   ;;  %p5074_p4 = scmp.ne.s32.totalorder %s6375_s26, %s5073_s27  ;;  %s5077_s23 = sshll.u32 %s5181_s28, 4  ;;  %s5078_s23 = int_to_ptr.vmem [resolvable:$false] %s5077_s23 }
  0x5f   : > { %v239_v13 = vld [vmem:[%s5346_s11 + $0x50] sm:$0xff]   ;;  %v4664_v15 = vld [vmem:[#allocation5 + $0x48] sm:$0xff]   ;;  %v225_v16 = vld [vmem:[%s5346_s11 + $0x18] sm:$0xff]   ;;  %s5079_s29 = scalar_lea.vmem %s5078_s23, 8192  ;;  %p5080_p11 = scmp.lt.s32.totalorder %s6375_s26, %s5078_s23 }
  0x60   : > { %4128 = vmatpush3.bf16.msra.mxu0 %v4640_v1  ;;  %4566 = vmatpush3.bf16.msra.mxu1 %v4640_v1  ;;  %v227_v17 = vld [vmem:[%s5346_s11 + $0x20] sm:$0xff]   ;;  %v241_v18 = vld [vmem:[%s5346_s11 + $0x58] sm:$0xff]   ;;  %v4665_v20 = vld [vmem:[#allocation5 + $0x50] sm:$0xff]   ;;  %p5075_p6 = pnand %p5074_p4, %p5291_p12  ;;  %p5081_p13 = scmp.lt.s32.totalorder %s5079_s29, %s5073_s27 }
  0x61   : > { %4129 = vmatprep.subr.bf16.mxu0 %v4641_v2  ;;  %4559 = vmatprep.subr.bf16.mxu1 %v4641_v2  ;;  %v243_v19 = vld [vmem:[%s5346_s11 + $0x60] sm:$0xff]   ;;  %v4666_v21 = vld [vmem:[#allocation5 + $0x58] sm:$0xff]   ;;  %v229_v22 = vld [vmem:[%s5346_s11 + $0x28] sm:$0xff]  }
  0x62   : > { %v231_v23 = vld [vmem:[%s5346_s11 + $0x30] sm:$0xff]   ;;  %v245_v24 = vld [vmem:[%s5346_s11 + $0x68] sm:$0xff]   ;;  %v4667_v26 = vld [vmem:[#allocation5 + $0x60] sm:$0xff]   ;;  %p5076_p8 = pneg %p5075_p6  ;;  %p5082_p3 = por %p5081_p13, %p5080_p11 }
  0x63   : > { %v247_v25 = vld [vmem:[%s5346_s11 + $0x70] sm:$0xff]   ;;  %v4668_v27 = vld [vmem:[#allocation5 + $0x68] sm:$0xff]   ;;  %v5371_v28 = vld [vmem:[%s5346_s11 + $0x38] sm:$0xff]  }
  0x64   : > { %4130 = vmatpush3.bf16.msra.mxu0 %v4641_v2  ;;  %4567 = vmatpush3.bf16.msra.mxu1 %v4641_v2  ;;  %v249_v29 = vld [vmem:[%s5346_s11 + $0x78] sm:$0xff]   ;;  %v4669_v30 = vld [vmem:[#allocation5 + $0x70] sm:$0xff]   ;;  %v4671_v32 = vld [vmem:[#allocation5 + $0x80] sm:$0xff]   ;;  %p5083_p7 = pnand %p5082_p3, %p5076_p8 }
  0x65   : > { %4131 = vmatprep.subr.bf16.mxu0 %v4642_v3  ;;  %4560 = vmatprep.subr.bf16.mxu1 %v4642_v3  ;;  %v4670_v31 = vld [vmem:[#allocation5 + $0x78] sm:$0xff]   ;;  %v4672_v33 = vld [vmem:[#allocation5 + $0x88] sm:$0xff]   ;;  %v4673_v34 = vld [vmem:[#allocation5 + $0x90] sm:$0xff]  }
  0x66   : > { %v4674_v35 = vld [vmem:[#allocation5 + $0x98] sm:$0xff]   ;;  %v4675_v36 = vld [vmem:[#allocation5 + $0xa0] sm:$0xff]   ;;  %v4676_v37 = vld [vmem:[#allocation5 + $0xa8] sm:$0xff]  }
  0x68   : > { %4132 = vmatpush3.bf16.msra.mxu0 %v4642_v3  ;;  %4568 = vmatpush3.bf16.msra.mxu1 %v4642_v3 }
  0x69   : > { %4133 = vmatprep.subr.bf16.mxu0 %v4643_v5  ;;  %4561 = vmatprep.subr.bf16.mxu1 %v4643_v5 }
  0x6c   : > { %4134 = vmatpush3.bf16.msra.mxu0 %v4643_v5  ;;  %4569 = vmatpush3.bf16.msra.mxu1 %v4643_v5 }
  0x6d   : > { %4135 = vmatprep.subr.bf16.mxu0 %v4644_v7  ;;  %4562 = vmatprep.subr.bf16.mxu1 %v4644_v7 }
  0x70   : > { %4136 = vmatpush3.bf16.msra.mxu0 %v4644_v7  ;;  %4570 = vmatpush3.bf16.msra.mxu1 %v4644_v7 }
  0x71   : > { %4137 = vmatprep.subr.bf16.mxu0 %v4645_v8  ;;  %4563 = vmatprep.subr.bf16.mxu1 %v4645_v8 }
  0x74   : > { %4138 = vmatpush3.bf16.msra.mxu0 %v4645_v8  ;;  %4571 = vmatpush3.bf16.msra.mxu1 %v4645_v8 }
  0x75   : > { %4139 = vmatprep.subr.bf16.mxu0 %v4646_v9  ;;  %4564 = vmatprep.subr.bf16.mxu1 %v4646_v9 }
  0x78   : > { %4140 = vmatpush3.bf16.msra.mxu0 %v4646_v9  ;;  %4572 = vmatpush3.bf16.msra.mxu1 %v4646_v9 }
  0x79   : > { %4173 = vmatprep.subr.bf16.mxu1 %v4663_v14  ;;  %4221 = vmatprep.subr.bf16.mxu0 %v4671_v32 }
  0x7b   : > { %4142 = vmatmul.mubr.bf16.vlgmr.msra.gmra.mrb[0].mxu0 %v221_v10  ;;  %4158 = vmatmul.mubr.bf16.vlgmr.msra.gmra.mrb[0].mxu1 %v237_v12 }
  0x7c   : > { %4145 = vmatprep.mubr.bf16.mxu0 %v223_v11  ;;  %4161 = vmatprep.mubr.bf16.mxu1 %v239_v13 }
  0x7d   : > { %4174 = vmatpush3.bf16.msra.mxu1 %v4663_v14  ;;  %4222 = vmatpush3.bf16.msra.mxu0 %v4671_v32 }
  0x7e   : > { %4175 = vmatprep.subr.bf16.mxu1 %v4664_v15  ;;  %4223 = vmatprep.subr.bf16.mxu0 %v4672_v33 }
  0x81   : > { %4176 = vmatpush3.bf16.msra.mxu1 %v4664_v15  ;;  %4224 = vmatpush3.bf16.msra.mxu0 %v4672_v33 }
  0x82   : > { %4177 = vmatprep.subr.bf16.mxu1 %v4665_v20  ;;  %4225 = vmatprep.subr.bf16.mxu0 %v4673_v34 }
  0x83   : > { %4146 = vmatmul.mubr.bf16.gmra.mrb[4].mxu0 %v225_v16  ;;  %4162 = vmatmul.mubr.bf16.gmra.mrb[4].mxu1 %v241_v18 }
  0x84   : > { %4149 = vmatprep.mubr.bf16.mxu0 %v227_v17  ;;  %4165 = vmatprep.mubr.bf16.mxu1 %v243_v19 }
  0x85   : > { %4178 = vmatpush3.bf16.msra.mxu1 %v4665_v20  ;;  %4226 = vmatpush3.bf16.msra.mxu0 %v4673_v34 }
  0x86   : > { %4179 = vmatprep.subr.bf16.mxu1 %v4666_v21  ;;  %4227 = vmatprep.subr.bf16.mxu0 %v4674_v35 }
  0x89   : > { %4180 = vmatpush3.bf16.msra.mxu1 %v4666_v21  ;;  %4228 = vmatpush3.bf16.msra.mxu0 %v4674_v35 }
  0x8a   : > { %4181 = vmatprep.subr.bf16.mxu1 %v4667_v26  ;;  %4229 = vmatprep.subr.bf16.mxu0 %v4675_v36 }
  0x8b   : > { %4150 = vmatmul.mubr.bf16.gmra.mrb[8].mxu0 %v229_v22  ;;  %4166 = vmatmul.mubr.bf16.gmra.mrb[8].mxu1 %v245_v24 }
  0x8c   : > { %4153 = vmatprep.mubr.bf16.mxu0 %v231_v23  ;;  %4169 = vmatprep.mubr.bf16.mxu1 %v247_v25 }
  0x8d   : > { %4182 = vmatpush3.bf16.msra.mxu1 %v4667_v26  ;;  %4230 = vmatpush3.bf16.msra.mxu0 %v4675_v36 }
  0x8e   : > { %4183 = vmatprep.subr.bf16.mxu1 %v4668_v27  ;;  %4231 = vmatprep.subr.bf16.mxu0 %v4676_v37 }
  0x91   : > { %4184 = vmatpush3.bf16.msra.mxu1 %v4668_v27  ;;  %4232 = vmatpush3.bf16.msra.mxu0 %v4676_v37 }
  0x92   : > { %4185 = vmatprep.subr.bf16.mxu1 %v4669_v30 }
  0x93   : > { %4154 = vmatmul.mubr.bf16.gmra.mrb[12].mxu0 %v5371_v28  ;;  %4170 = vmatmul.mubr.bf16.gmra.mrb[12].mxu1 %v249_v29 }
  0x95   : > { %4186 = vmatpush3.bf16.msra.mxu1 %v4669_v30 }
  0x96   : > { %4187 = vmatprep.subr.bf16.mxu1 %v4670_v31 }
  0x99   : > { %4188 = vmatpush3.bf16.msra.mxu1 %v4670_v31 }
 0x14e   : > { %v4143_v38 = vpop.f32.mrb[0].mxu0  ;;  %v4159_v40 = vpop.f32.mrb[0].mxu1 }
 0x14f   : > { %v445_v39 = vpop.f32.mrb[1].mxu0  ;;  %v590_v42 = vmax.f32 %v4159_v40, 0.0  ;;  %v509_v43 = vpop.f32.mrb[1].mxu1  ;;  %v574_v44 = vmax.f32 %v4143_v38, 0.0 }
 0x150   : > { %v4144_v41 = vpop.f32.mrb[2].mxu0  ;;  %v588_v47 = vmax.f32 %v509_v43, 0.0  ;;  %v4160_v48 = vpop.f32.mrb[2].mxu1  ;;  %v572_v49 = vmax.f32 %v445_v39, 0.0 }
 0x151   : > { %v575_v45 = vmax.f32 %v4144_v41, 0.0  ;;  %v448_v46 = vpop.f32.mrb[3].mxu0  ;;  %v591_v51 = vmax.f32 %v4160_v48, 0.0  ;;  %v512_v52 = vpop.f32.mrb[3].mxu1 }
 0x152   : > { %v573_v50 = vmax.f32 %v448_v46, 0.0  ;;  %v589_v54 = vmax.f32 %v512_v52, 0.0 }
 0x153   : > { %v605_v53 = vpack.c.bf16 %v575_v45, %v574_v44  ;;  %v5375_v56 = vpack.c.bf16 %v591_v51, %v590_v42 }
 0x154   : > { %v604_v55 = vpack.c.bf16 %v573_v50, %v572_v49  ;;  %v5377_v57 = vpack.c.bf16 %v589_v54, %v588_v47 }
 0x156   : > { %v4147_v58 = vpop.f32.mrb[4].mxu0  ;;  %4189 = vmatprep.mubr.bf16.mxu1 %v604_v55  ;;  %v4163_v60 = vpop.f32.mrb[4].mxu1  ;;  %v4677_v55 = vld [vmem:[#allocation5 + $0xb0] sm:$0xff]  }
 0x157   : > { %v461_v59 = vpop.f32.mrb[5].mxu0  ;;  %4190 = vmatmul.mubr.bf16.vlgmr.msra.gmra.mrb[16].mxu1 %v605_v53  ;;  %v594_v62 = vmax.f32 %v4163_v60, 0.0  ;;  %v525_v63 = vpop.f32.mrb[5].mxu1  ;;  %v578_v0 = vmax.f32 %v4147_v58, 0.0  ;;  %4233 = vmatprep.subr.bf16.mxu0 %v4677_v55  ;;  %v4678_v58 = vld [vmem:[#allocation5 + $0xb8] sm:$0xff]   ;;  %v4684_v60 = vld [vmem:[#allocation5 + $0xc0] sm:$0xff]  }
 0x158   : > { %v4148_v61 = vpop.f32.mrb[6].mxu0  ;;  %v592_v3 = vmax.f32 %v525_v63, 0.0  ;;  %v4164_v4 = vpop.f32.mrb[6].mxu1  ;;  %v576_v5 = vmax.f32 %v461_v59, 0.0  ;;  %4234 = vmatpush3.bf16.msra.mxu0 %v4677_v55  ;;  %v4679_v59 = vld [vmem:[#allocation5 + $0x100] sm:$0xff]   ;;  %4269 = vmatprep.subr.bf16.mxu1 %v4684_v60  ;;  %v4691_v63 = vld [vmem:[#allocation5 + $0xe8] sm:$0xff]  }
 0x159   : > { %v579_v1 = vmax.f32 %v4148_v61, 0.0  ;;  %v464_v2 = vpop.f32.mrb[7].mxu0  ;;  %v595_v7 = vmax.f32 %v4164_v4, 0.0  ;;  %v528_v8 = vpop.f32.mrb[7].mxu1  ;;  %4235 = vmatprep.subr.bf16.mxu0 %v4678_v58  ;;  %v4685_v61 = vld [vmem:[#allocation5 + $0xc8] sm:$0xff]   ;;  %4270 = vmatpush3.bf16.msra.mxu1 %v4684_v60 }
 0x15a   : > { %v577_v6 = vmax.f32 %v464_v2, 0.0  ;;  %v593_v10 = vmax.f32 %v528_v8, 0.0  ;;  %4271 = vmatprep.subr.bf16.mxu1 %v4685_v61 }
 0x15b   : > { %v607_v9 = vpack.c.bf16 %v579_v1, %v578_v0  ;;  %v615_v12 = vpack.c.bf16 %v595_v7, %v594_v62  ;;  %v4690_v62 = vld [vmem:[#allocation5 + $0xe0] sm:$0xff]  }
 0x15c   : > { %v606_v11 = vpack.c.bf16 %v577_v6, %v576_v5  ;;  %v614_v13 = vpack.c.bf16 %v593_v10, %v592_v3  ;;  %4236 = vmatpush3.bf16.msra.mxu0 %v4678_v58  ;;  %v4680_v10 = vld [vmem:[#allocation5 + $0x108] sm:$0xff]  }
 0x15d   : > { %4317 = vmatprep.subr.bf16.mxu0 %v4679_v59  ;;  %4272 = vmatpush3.bf16.msra.mxu1 %v4685_v61 }
 0x15e   : > { %v4151_v14 = vpop.f32.mrb[8].mxu0  ;;  %4193 = vmatprep.mubr.bf16.mxu1 %v606_v11  ;;  %v4167_v16 = vpop.f32.mrb[8].mxu1 }
 0x15f   : > { %v477_v15 = vpop.f32.mrb[9].mxu0  ;;  %4194 = vmatmul.mubr.bf16.gmra.mrb[20].mxu1 %v607_v9  ;;  %v598_v18 = vmax.f32 %v4167_v16, 0.0  ;;  %v541_v19 = vpop.f32.mrb[9].mxu1  ;;  %v582_v20 = vmax.f32 %v4151_v14, 0.0 }
 0x160   : > { %v4152_v17 = vpop.f32.mrb[10].mxu0  ;;  %v596_v23 = vmax.f32 %v541_v19, 0.0  ;;  %v4168_v24 = vpop.f32.mrb[10].mxu1  ;;  %v580_v25 = vmax.f32 %v477_v15, 0.0 }
 0x161   : > { %v583_v21 = vmax.f32 %v4152_v17, 0.0  ;;  %v480_v22 = vpop.f32.mrb[11].mxu0  ;;  %v599_v27 = vmax.f32 %v4168_v24, 0.0  ;;  %v544_v29 = vpop.f32.mrb[11].mxu1  ;;  %v4681_v17 = vld [vmem:[#allocation5 + $0x110] sm:$0xff]  }
 0x162   : > { %v581_v26 = vmax.f32 %v480_v22, 0.0  ;;  %v597_v31 = vmax.f32 %v544_v29, 0.0  ;;  %v4682_v22 = vld [vmem:[#allocation5 + $0x118] sm:$0xff]  }
 0x163   : > { %v609_v30 = vpack.c.bf16 %v583_v21, %v582_v20  ;;  %v617_v33 = vpack.c.bf16 %v599_v27, %v598_v18 }
 0x164   : > { %v608_v32 = vpack.c.bf16 %v581_v26, %v580_v25  ;;  %v616_v34 = vpack.c.bf16 %v597_v31, %v596_v23 }
 0x166   : > { %v4155_v35 = vpop.f32.mrb[12].mxu0  ;;  %4197 = vmatprep.mubr.bf16.mxu1 %v608_v32  ;;  %v4171_v37 = vpop.f32.mrb[12].mxu1 }
 0x167   : > { %v493_v36 = vpop.f32.mrb[13].mxu0  ;;  %4198 = vmatmul.mubr.bf16.gmra.mrb[24].mxu1 %v609_v30  ;;  %v602_v39 = vmax.f32 %v4171_v37, 0.0  ;;  %v557_v40 = vpop.f32.mrb[13].mxu1  ;;  %v586_v41 = vmax.f32 %v4155_v35, 0.0  ;;  %v4683_v30 = vld [vmem:[#allocation5 + $0x120] sm:$0xff]   ;;  %v4686_v35 = vld [vmem:[#allocation5 + $0x128] sm:$0xff]  }
 0x168   : > { %v4156_v38 = vpop.f32.mrb[14].mxu0  ;;  %v600_v44 = vmax.f32 %v557_v40, 0.0  ;;  %v4172_v45 = vpop.f32.mrb[14].mxu1  ;;  %v584_v46 = vmax.f32 %v493_v36, 0.0 }
 0x169   : > { %v587_v42 = vmax.f32 %v4156_v38, 0.0  ;;  %v496_v43 = vpop.f32.mrb[15].mxu0  ;;  %v603_v48 = vmax.f32 %v4172_v45, 0.0  ;;  %v560_v49 = vpop.f32.mrb[15].mxu1 }
 0x16a   : > { %v585_v47 = vmax.f32 %v496_v43, 0.0  ;;  %v601_v51 = vmax.f32 %v560_v49, 0.0 }
 0x16b   : > { %v611_v50 = vpack.c.bf16 %v587_v42, %v586_v41  ;;  %v619_v53 = vpack.c.bf16 %v603_v48, %v602_v39  ;;  %v4689_v42 = vld [vmem:[#allocation5 + $0x130] sm:$0xff]  }
 0x16c   : > { %v610_v52 = vpack.c.bf16 %v585_v47, %v584_v46  ;;  %v618_v54 = vpack.c.bf16 %v601_v51, %v600_v44 }
 0x16e   : > { %4201 = vmatprep.mubr.bf16.mxu1 %v610_v52 }
 0x16f   : > { %4202 = vmatmul.mubr.bf16.gmra.mrb[28].mxu1 %v611_v50 }
 0x170   : > { %4205 = vmatprep.mubr.bf16.mxu1 %v5377_v57  ;;  %v4688_v57 = vld [vmem:[#allocation5 + $0xd8] sm:$0xff]  }
 0x177   : > { %4206 = vmatmul.mubr.bf16.gmra.mrb[32].mxu1 %v5375_v56  ;;  %v4687_v56 = vld [vmem:[#allocation5 + $0xd0] sm:$0xff]  }
 0x178   : > { %4209 = vmatprep.mubr.bf16.mxu1 %v614_v13  ;;  %4273 = vmatprep.subr.bf16.mxu1 %v4687_v56 }
 0x179   : > { %4274 = vmatpush3.bf16.msra.mxu1 %v4687_v56 }
 0x17a   : > { %4275 = vmatprep.subr.bf16.mxu1 %v4688_v57 }
 0x17d   : > { %4276 = vmatpush3.bf16.msra.mxu1 %v4688_v57 }
 0x17e   : > { %4277 = vmatprep.subr.bf16.mxu1 %v4690_v62 }
 0x17f   : > { %4210 = vmatmul.mubr.bf16.gmra.mrb[36].mxu1 %v615_v12 }
 0x180   : > { %4213 = vmatprep.mubr.bf16.mxu1 %v616_v34 }
 0x181   : > { %4278 = vmatpush3.bf16.msra.mxu1 %v4690_v62 }
 0x182   : > { %4279 = vmatprep.subr.bf16.mxu1 %v4691_v63 }
 0x185   : > { %4280 = vmatpush3.bf16.msra.mxu1 %v4691_v63 }
 0x187   : > { %4214 = vmatmul.mubr.bf16.gmra.mrb[40].mxu1 %v617_v33 }
 0x188   : > { %4217 = vmatprep.mubr.bf16.mxu1 %v618_v54 }
 0x18f   : > { %4218 = vmatmul.mubr.bf16.gmra.mrb[44].mxu1 %v619_v53 }
 0x22a   : > { %v4191_v0 = vpop.f32.mrb[16].mxu1 }
 0x22b   : > { %v719_v1 = vpop.f32.mrb[17].mxu1  ;;  %v848_v3 = vmax.f32 %v4191_v0, 0.0 }
 0x22c   : > { %v4192_v2 = vpop.f32.mrb[18].mxu1  ;;  %v846_v6 = vmax.f32 %v719_v1, 0.0 }
 0x22d   : > { %v849_v4 = vmax.f32 %v4192_v2, 0.0  ;;  %v722_v5 = vpop.f32.mrb[19].mxu1 }
 0x22e   : > { %v847_v7 = vmax.f32 %v722_v5, 0.0 }
 0x22f   : > { %v879_v8 = vpack.c.bf16 %v849_v4, %v848_v3 }
 0x230   : > { %v878_v9 = vpack.c.bf16 %v847_v7, %v846_v6 }
 0x232   : > { %v4195_v11 = vpop.f32.mrb[20].mxu1  ;;  %4237 = vmatprep.mubr.bf16.mxu0 %v878_v9 }
 0x233   : > { %v735_v12 = vpop.f32.mrb[21].mxu1  ;;  %4238 = vmatmul.mubr.bf16.vlgmr.msra.gmra.mrb[16].mxu0 %v879_v8  ;;  %v852_v14 = vmax.f32 %v4195_v11, 0.0 }
 0x234   : > { %v4196_v13 = vpop.f32.mrb[22].mxu1  ;;  %4318 = vmatpush3.bf16.msra.mxu0 %v4679_v59  ;;  %v850_v18 = vmax.f32 %v735_v12, 0.0 }
 0x235   : > { %v853_v15 = vmax.f32 %v4196_v13, 0.0  ;;  %v738_v16 = vpop.f32.mrb[23].mxu1  ;;  %4319 = vmatprep.subr.bf16.mxu0 %v4680_v10 }
 0x236   : > { %v851_v19 = vmax.f32 %v738_v16, 0.0 }
 0x237   : > { %v881_v20 = vpack.c.bf16 %v853_v15, %v852_v14 }
 0x238   : > { %v880_v21 = vpack.c.bf16 %v851_v19, %v850_v18  ;;  %4320 = vmatpush3.bf16.msra.mxu0 %v4680_v10 }
 0x239   : > { %4321 = vmatprep.subr.bf16.mxu0 %v4681_v17 }
 0x23a   : > { %v4199_v23 = vpop.f32.mrb[24].mxu1  ;;  %4241 = vmatprep.mubr.bf16.mxu0 %v880_v21 }
 0x23b   : > { %v751_v24 = vpop.f32.mrb[25].mxu1  ;;  %4242 = vmatmul.mubr.bf16.gmra.mrb[20].mxu0 %v881_v20  ;;  %v856_v26 = vmax.f32 %v4199_v23, 0.0  ;;  %v4693_v23 = vld [vmem:[#allocation5 + $0xf0] sm:$0xff]  }
 0x23c   : > { %v4200_v25 = vpop.f32.mrb[26].mxu1  ;;  %4322 = vmatpush3.bf16.msra.mxu0 %v4681_v17  ;;  %v854_v31 = vmax.f32 %v751_v24, 0.0  ;;  %v4692_v24 = vld [vmem:[#allocation5 + $0x138] sm:$0xff]   ;;  %4281 = vmatprep.subr.bf16.mxu1 %v4693_v23 }
 0x23d   : > { %v857_v27 = vmax.f32 %v4200_v25, 0.0  ;;  %v754_v29 = vpop.f32.mrb[27].mxu1  ;;  %4323 = vmatprep.subr.bf16.mxu0 %v4682_v22  ;;  %4282 = vmatpush3.bf16.msra.mxu1 %v4693_v23  ;;  %v4694_v25 = vld [vmem:[#allocation5 + $0xf8] sm:$0xff]  }
 0x23e   : > { %v855_v32 = vmax.f32 %v754_v29, 0.0  ;;  %4283 = vmatprep.subr.bf16.mxu1 %v4694_v25 }
 0x23f   : > { %v883_v33 = vpack.c.bf16 %v857_v27, %v856_v26  ;;  %v4695_v26 = vld [vmem:[#allocation5 + $0x140] sm:$0xff]  }
 0x240   : > { %v882_v34 = vpack.c.bf16 %v855_v32, %v854_v31  ;;  %4324 = vmatpush3.bf16.msra.mxu0 %v4682_v22 }
 0x241   : > { %4325 = vmatprep.subr.bf16.mxu0 %v4683_v30  ;;  %4284 = vmatpush3.bf16.msra.mxu1 %v4694_v25 }
 0x242   : > { %v4203_v36 = vpop.f32.mrb[28].mxu1  ;;  %4245 = vmatprep.mubr.bf16.mxu0 %v882_v34  ;;  %4365 = vmatprep.subr.bf16.mxu1 %v4695_v26 }
 0x243   : > { %v767_v37 = vpop.f32.mrb[29].mxu1  ;;  %4246 = vmatmul.mubr.bf16.gmra.mrb[24].mxu0 %v883_v33  ;;  %v860_v39 = vmax.f32 %v4203_v36, 0.0 }
 0x244   : > { %v4204_v38 = vpop.f32.mrb[30].mxu1  ;;  %4326 = vmatpush3.bf16.msra.mxu0 %v4683_v30  ;;  %v858_v43 = vmax.f32 %v767_v37, 0.0 }
 0x245   : > { %v861_v40 = vmax.f32 %v4204_v38, 0.0  ;;  %v770_v41 = vpop.f32.mrb[31].mxu1  ;;  %4327 = vmatprep.subr.bf16.mxu0 %v4686_v35 }
 0x246   : > { %v859_v44 = vmax.f32 %v770_v41, 0.0 }
 0x247   : > { %v885_v45 = vpack.c.bf16 %v861_v40, %v860_v39 }
 0x248   : > { %v884_v46 = vpack.c.bf16 %v859_v44, %v858_v43  ;;  %4328 = vmatpush3.bf16.msra.mxu0 %v4686_v35 }
 0x249   : > { %4329 = vmatprep.subr.bf16.mxu0 %v4689_v42 }
 0x24a   : > { %v4207_v47 = vpop.f32.mrb[32].mxu1  ;;  %4249 = vmatprep.mubr.bf16.mxu0 %v884_v46 }
 0x24b   : > { %v783_v48 = vpop.f32.mrb[33].mxu1  ;;  %4250 = vmatmul.mubr.bf16.gmra.mrb[28].mxu0 %v885_v45  ;;  %v864_v50 = vmax.f32 %v4207_v47, 0.0 }
 0x24c   : > { %v4208_v49 = vpop.f32.mrb[34].mxu1  ;;  %4330 = vmatpush3.bf16.msra.mxu0 %v4689_v42  ;;  %v862_v53 = vmax.f32 %v783_v48, 0.0 }
 0x24d   : > { %v865_v51 = vmax.f32 %v4208_v49, 0.0  ;;  %v786_v52 = vpop.f32.mrb[35].mxu1  ;;  %4331 = vmatprep.subr.bf16.mxu0 %v4692_v24 }
 0x24e   : > { %v863_v54 = vmax.f32 %v786_v52, 0.0 }
 0x24f   : > { %v887_v55 = vpack.c.bf16 %v865_v51, %v864_v50 }
 0x250   : > { %v886_v58 = vpack.c.bf16 %v863_v54, %v862_v53  ;;  %4332 = vmatpush3.bf16.msra.mxu0 %v4692_v24 }
 0x252   : > { %v4211_v59 = vpop.f32.mrb[36].mxu1  ;;  %4253 = vmatprep.mubr.bf16.mxu0 %v886_v58 }
 0x253   : > { %v799_v60 = vpop.f32.mrb[37].mxu1  ;;  %4254 = vmatmul.mubr.bf16.gmra.mrb[32].mxu0 %v887_v55  ;;  %v868_v56 = vmax.f32 %v4211_v59, 0.0 }
 0x254   : > { %v4212_v61 = vpop.f32.mrb[38].mxu1  ;;  %v866_v63 = vmax.f32 %v799_v60, 0.0 }
 0x255   : > { %v869_v57 = vmax.f32 %v4212_v61, 0.0  ;;  %v802_v62 = vpop.f32.mrb[39].mxu1 }
 0x256   : > { %v867_v0 = vmax.f32 %v802_v62, 0.0 }
 0x257   : > { %v889_v1 = vpack.c.bf16 %v869_v57, %v868_v56 }
 0x258   : > { %v888_v2 = vpack.c.bf16 %v867_v0, %v866_v63 }
 0x25a   : > { %v4215_v3 = vpop.f32.mrb[40].mxu1  ;;  %4257 = vmatprep.mubr.bf16.mxu0 %v888_v2 }
 0x25b   : > { %v815_v4 = vpop.f32.mrb[41].mxu1  ;;  %4258 = vmatmul.mubr.bf16.gmra.mrb[36].mxu0 %v889_v1  ;;  %v872_v6 = vmax.f32 %v4215_v3, 0.0 }
 0x25c   : > { %v4216_v5 = vpop.f32.mrb[42].mxu1  ;;  %v870_v9 = vmax.f32 %v815_v4, 0.0 }
 0x25d   : > { %v873_v7 = vmax.f32 %v4216_v5, 0.0  ;;  %v818_v8 = vpop.f32.mrb[43].mxu1 }
 0x25e   : > { %v871_v10 = vmax.f32 %v818_v8, 0.0 }
 0x25f   : > { %v891_v11 = vpack.c.bf16 %v873_v7, %v872_v6 }
 0x260   : > { %v890_v12 = vpack.c.bf16 %v871_v10, %v870_v9 }
 0x262   : > { %v4219_v13 = vpop.f32.mrb[44].mxu1  ;;  %4261 = vmatprep.mubr.bf16.mxu0 %v890_v12 }
 0x263   : > { %v831_v14 = vpop.f32.mrb[45].mxu1  ;;  %4262 = vmatmul.mubr.bf16.gmra.mrb[40].mxu0 %v891_v11  ;;  %v876_v16 = vmax.f32 %v4219_v13, 0.0 }
 0x264   : > { %v4220_v15 = vpop.f32.mrb[46].mxu1  ;;  %v874_v19 = vmax.f32 %v831_v14, 0.0 }
 0x265   : > { %v877_v17 = vmax.f32 %v4220_v15, 0.0  ;;  %v834_v18 = vpop.f32.mrb[47].mxu1 }
 0x266   : > { %v875_v20 = vmax.f32 %v834_v18, 0.0 }
 0x267   : > { %v893_v21 = vpack.c.bf16 %v877_v17, %v876_v16 }
 0x268   : > { %v892_v22 = vpack.c.bf16 %v875_v20, %v874_v19 }
 0x26a   : > { %4265 = vmatprep.mubr.bf16.mxu0 %v892_v22 }
 0x26b   : > { %4266 = vmatmul.mubr.bf16.gmra.mrb[44].mxu0 %v893_v21 }
 0x306   : > { %v4239_v27 = vpop.f32.mrb[16].mxu0 }
 0x307   : > { %v993_v29 = vpop.f32.mrb[17].mxu0  ;;  %v1122_v31 = vmax.f32 %v4239_v27, 0.0 }
 0x308   : > { %v4240_v30 = vpop.f32.mrb[18].mxu0  ;;  %v1120_v34 = vmax.f32 %v993_v29, 0.0 }
 0x309   : > { %v1123_v32 = vmax.f32 %v4240_v30, 0.0  ;;  %v996_v33 = vpop.f32.mrb[19].mxu0 }
 0x30a   : > { %v1121_v35 = vmax.f32 %v996_v33, 0.0 }
 0x30b   : > { %v1153_v36 = vpack.c.bf16 %v1123_v32, %v1122_v31 }
 0x30c   : > { %v1152_v37 = vpack.c.bf16 %v1121_v35, %v1120_v34 }
 0x30e   : > { %v4243_v38 = vpop.f32.mrb[20].mxu0  ;;  %4285 = vmatprep.mubr.bf16.mxu1 %v1152_v37  ;;  %4333 = vmatprep.mubr.bf16.mxu0 %v1152_v37 }
 0x30f   : > { %v1009_v39 = vpop.f32.mrb[21].mxu0  ;;  %4286 = vmatmul.mubr.bf16.vlgmr.msra.gmra.mrb[48].mxu1 %v1153_v36  ;;  %4334 = vmatmul.mubr.bf16.vlgmr.msra.gmra.mrb[48].mxu0 %v1153_v36  ;;  %v1126_v41 = vmax.f32 %v4243_v38, 0.0 }
 0x310   : > { %v4244_v40 = vpop.f32.mrb[22].mxu0  ;;  %4366 = vmatpush3.bf16.msra.mxu1 %v4695_v26  ;;  %v1124_v44 = vmax.f32 %v1009_v39, 0.0 }
 0x311   : > { %v1127_v42 = vmax.f32 %v4244_v40, 0.0  ;;  %v1012_v43 = vpop.f32.mrb[23].mxu0 }
 0x312   : > { %v1125_v45 = vmax.f32 %v1012_v43, 0.0 }
 0x313   : > { %v1155_v46 = vpack.c.bf16 %v1127_v42, %v1126_v41 }
 0x314   : > { %v1154_v47 = vpack.c.bf16 %v1125_v45, %v1124_v44  ;;  %v4696_v45 = vld [vmem:[#allocation5 + $0x148] sm:$0xff]  }
 0x315   : > { %4367 = vmatprep.subr.bf16.mxu1 %v4696_v45 }
 0x316   : > { %v4247_v48 = vpop.f32.mrb[24].mxu0  ;;  %4289 = vmatprep.mubr.bf16.mxu1 %v1154_v47  ;;  %4337 = vmatprep.mubr.bf16.mxu0 %v1154_v47  ;;  %v4698_v47 = vld [vmem:[#allocation5 + $0x158] sm:$0xff]  }
 0x317   : > { %v1025_v49 = vpop.f32.mrb[25].mxu0  ;;  %4290 = vmatmul.mubr.bf16.gmra.mrb[52].mxu1 %v1155_v46  ;;  %4338 = vmatmul.mubr.bf16.gmra.mrb[52].mxu0 %v1155_v46  ;;  %v1130_v51 = vmax.f32 %v4247_v48, 0.0  ;;  %v4697_v46 = vld [vmem:[#allocation5 + $0x150] sm:$0xff]   ;;  %v4699_v48 = vld [vmem:[#allocation5 + $0x160] sm:$0xff]  }
 0x318   : > { %v4248_v50 = vpop.f32.mrb[26].mxu0  ;;  %v1128_v54 = vmax.f32 %v1025_v49, 0.0  ;;  %4368 = vmatpush3.bf16.msra.mxu1 %v4696_v45  ;;  %v4700_v49 = vld [vmem:[#allocation5 + $0x168] sm:$0xff]  }
 0x319   : > { %v1131_v52 = vmax.f32 %v4248_v50, 0.0  ;;  %v1028_v53 = vpop.f32.mrb[27].mxu0  ;;  %4369 = vmatprep.subr.bf16.mxu1 %v4697_v46  ;;  %v4701_v50 = vld [vmem:[#allocation5 + $0x170] sm:$0xff]  }
 0x31a   : > { %v1129_v55 = vmax.f32 %v1028_v53, 0.0  ;;  %v4999_v53 = vld [vmem:[%s5346_s11] sm:$0xff]  }
 0x31b   : > { %v1157_v58 = vpack.c.bf16 %v1131_v52, %v1130_v51  ;;  %v2100_v51 = vlaneseq }
 0x31c   : > { %v1156_v59 = vpack.c.bf16 %v1129_v55, %v1128_v54  ;;  %4370 = vmatpush3.bf16.msra.mxu1 %v4697_v46  ;;  %v2103_v54 = vunpack.c.l.bf16 %v4999_v53  ;;  %v2104_v55 = vunpack.c.h.bf16 %v4999_v53  ;;  %v5007_v53 = vld [vmem:[%s5346_s11 + $0x48] sm:$0xff]  }
 0x31d   : > { %4371 = vmatprep.subr.bf16.mxu1 %v4698_v47  ;;  %v5381_v52 = vand.u32 127, %v2100_v51 }
 0x31e   : > { %v4251_v60 = vpop.f32.mrb[28].mxu0  ;;  %4293 = vmatprep.mubr.bf16.mxu1 %v1156_v59  ;;  %4341 = vmatprep.mubr.bf16.mxu0 %v1156_v59 }
 0x31f   : > { %v1041_v61 = vpop.f32.mrb[29].mxu0  ;;  %4294 = vmatmul.mubr.bf16.gmra.mrb[56].mxu1 %v1157_v58  ;;  %4342 = vmatmul.mubr.bf16.gmra.mrb[56].mxu0 %v1157_v58  ;;  %v1134_v57 = vmax.f32 %v4251_v60, 0.0  ;;  %v5000_v58 = vld [vmem:[%s5346_s11 + $0x8] sm:$0xff]   ;;  %vm2102_vm0 = vcmp.lt.s32.totalorder %v5381_v52, 5  ;;  %vm3551_vm2 = vcmp.lt.s32.totalorder %v5381_v52, 10  ;;  %v4713_v52 = vld [vmem:[#allocation5 + $0x1d0] sm:$0xff]  }
 0x320   : > { %v4252_v56 = vpop.f32.mrb[30].mxu0  ;;  %v1132_v0 = vmax.f32 %v1041_v61, 0.0  ;;  %4372 = vmatpush3.bf16.msra.mxu1 %v4698_v47  ;;  %v2105_v59 = vunpack.c.l.bf16 %v5000_v58  ;;  %v2106_v60 = vunpack.c.h.bf16 %v5000_v58  ;;  %v5001_v61 = vld [vmem:[%s5346_s11 + $0x10] sm:$0xff]  }
 0x321   : > { %v1135_v62 = vmax.f32 %v4252_v56, 0.0  ;;  %v1044_v63 = vpop.f32.mrb[31].mxu0  ;;  %4373 = vmatprep.subr.bf16.mxu1 %v4699_v48  ;;  %v2107_v56 = vunpack.c.l.bf16 %v5001_v61 }
 0x322   : > { %v1133_v1 = vmax.f32 %v1044_v63, 0.0 }
 0x323   : > { %v1159_v2 = vpack.c.bf16 %v1135_v62, %v1134_v57  ;;  %v2108_v57 = vunpack.c.h.bf16 %v5001_v61  ;;  %v5002_v62 = vld [vmem:[%s5346_s11 + $0x18] sm:$0xff]  }
 0x324   : > { %v1158_v3 = vpack.c.bf16 %v1133_v1, %v1132_v0  ;;  %4374 = vmatpush3.bf16.msra.mxu1 %v4699_v48  ;;  %v2109_v63 = vunpack.c.l.bf16 %v5002_v62  ;;  %v2110_v0 = vunpack.c.h.bf16 %v5002_v62  ;;  %v5003_v1 = vld [vmem:[%s5346_s11 + $0x20] sm:$0xff]  }
 0x325   : > { %4375 = vmatprep.subr.bf16.mxu1 %v4700_v49 }
 0x326   : > { %v4255_v4 = vpop.f32.mrb[32].mxu0  ;;  %4297 = vmatprep.mubr.bf16.mxu1 %v1158_v3  ;;  %4345 = vmatprep.mubr.bf16.mxu0 %v1158_v3  ;;  %v5391_v3 = vsel %vm2102_vm0, %v2103_v54, 0.0  ;;  %v2121_v54 = vunpack.c.l.bf16 %v5007_v53 }
 0x327   : > { %v1057_v5 = vpop.f32.mrb[33].mxu0  ;;  %4298 = vmatmul.mubr.bf16.gmra.mrb[60].mxu1 %v1159_v2  ;;  %4346 = vmatmul.mubr.bf16.gmra.mrb[60].mxu0 %v1159_v2  ;;  %v1138_v7 = vmax.f32 %v4255_v4, 0.0  ;;  %v2111_v2 = vunpack.c.l.bf16 %v5003_v1  ;;  %6541 = vst [vmem:[#allocation14_spill] sm:$0xff] %v5391_v3  ;;  %v5395_v4 = vsel %vm2102_vm0, %v2104_v55, 0.0  ;;  %v2122_v55 = vunpack.c.h.bf16 %v5007_v53 }
 0x328   : > { %v4256_v6 = vpop.f32.mrb[34].mxu0  ;;  %v1136_v10 = vmax.f32 %v1057_v5, 0.0  ;;  %4376 = vmatpush3.bf16.msra.mxu1 %v4700_v49  ;;  %6542 = vst [vmem:[#allocation15_spill] sm:$0xff] %v5395_v4  ;;  %v2112_v5 = vunpack.c.h.bf16 %v5003_v1 }
 0x329   : > { %v1139_v8 = vmax.f32 %v4256_v6, 0.0  ;;  %v1060_v9 = vpop.f32.mrb[35].mxu0  ;;  %4377 = vmatprep.subr.bf16.mxu1 %v4701_v50  ;;  %v5399_v6 = vsel %vm2102_vm0, %v2105_v59, 0.0 }
 0x32a   : > { %v1137_v11 = vmax.f32 %v1060_v9, 0.0  ;;  %6543 = vst [vmem:[#allocation16_spill] sm:$0xff] %v5399_v6  ;;  %v5411_v9 = vsel %vm2102_vm0, %v2108_v57, 0.0 }
 0x32b   : > { %v1161_v12 = vpack.c.bf16 %v1139_v8, %v1138_v7  ;;  %v5403_v7 = vsel %vm2102_vm0, %v2106_v60, 0.0  ;;  %v5407_v8 = vsel %vm2102_vm0, %v2107_v56, 0.0  ;;  %6546 = vst [vmem:[#allocation19_spill] sm:$0xff] %v5411_v9  ;;  %v5008_v56 = vld [vmem:[%s5346_s11 + $0x50] sm:$0xff]  }
 0x32c   : > { %v1160_v13 = vpack.c.bf16 %v1137_v11, %v1136_v10  ;;  %4378 = vmatpush3.bf16.msra.mxu1 %v4701_v50  ;;  %6544 = vst [vmem:[#allocation17_spill] sm:$0xff] %v5403_v7  ;;  %6545 = vst [vmem:[#allocation18_spill] sm:$0xff] %v5407_v8  ;;  %v5415_v10 = vsel %vm2102_vm0, %v2109_v63, 0.0  ;;  %v5419_v11 = vsel %vm2102_vm0, %v2110_v0, 0.0  ;;  %v2123_v57 = vunpack.c.l.bf16 %v5008_v56 }
 0x32d   : > { %6547 = vst [vmem:[#allocation20_spill] sm:$0xff] %v5415_v10  ;;  %6548 = vst [vmem:[#allocation21_spill] sm:$0xff] %v5419_v11  ;;  %v2124_v1 = vunpack.c.h.bf16 %v5008_v56 }
 0x32e   : > { %v4259_v14 = vpop.f32.mrb[36].mxu0  ;;  %4301 = vmatprep.mubr.bf16.mxu1 %v1160_v13  ;;  %4349 = vmatprep.mubr.bf16.mxu0 %v1160_v13 }
 0x32f   : > { %v1073_v15 = vpop.f32.mrb[37].mxu0  ;;  %4302 = vmatmul.mubr.bf16.gmra.mrb[64].mxu1 %v1161_v12  ;;  %4350 = vmatmul.mubr.bf16.gmra.mrb[64].mxu0 %v1161_v12  ;;  %v1142_v17 = vmax.f32 %v4259_v14, 0.0  ;;  %v5004_v12 = vld [vmem:[%s5346_s11 + $0x28] sm:$0xff]  }
 0x330   : > { %v4260_v16 = vpop.f32.mrb[38].mxu0  ;;  %v1140_v20 = vmax.f32 %v1073_v15, 0.0  ;;  %v2113_v13 = vunpack.c.l.bf16 %v5004_v12  ;;  %v2114_v14 = vunpack.c.h.bf16 %v5004_v12 }
 0x331   : > { %v1143_v18 = vmax.f32 %v4260_v16, 0.0  ;;  %v1076_v19 = vpop.f32.mrb[39].mxu0 }
 0x332   : > { %v1141_v21 = vmax.f32 %v1076_v19, 0.0 }
 0x333   : > { %v1163_v22 = vpack.c.bf16 %v1143_v18, %v1142_v17  ;;  %v5428_v17 = vsel %vm2102_vm0, %v2111_v2, 0.0  ;;  %v5005_v18 = vld [vmem:[%s5346_s11 + $0x30] sm:$0xff]   ;;  %v5009_v2 = vld [vmem:[%s5346_s11 + $0x58] sm:$0xff]  }
 0x334   : > { %v1162_v23 = vpack.c.bf16 %v1141_v21, %v1140_v20  ;;  %6550 = vst [vmem:[#allocation23_spill] sm:$0xff] %v5428_v17  ;;  %v2115_v19 = vunpack.c.l.bf16 %v5005_v18 }
 0x336   : > { %v4263_v24 = vpop.f32.mrb[40].mxu0  ;;  %4305 = vmatprep.mubr.bf16.mxu1 %v1162_v23  ;;  %4353 = vmatprep.mubr.bf16.mxu0 %v1162_v23  ;;  %v4702_v23 = vld [vmem:[#allocation5 + $0x178] sm:$0xff]  }
 0x337   : > { %v1089_v25 = vpop.f32.mrb[41].mxu0  ;;  %4306 = vmatmul.mubr.bf16.gmra.mrb[68].mxu1 %v1163_v22  ;;  %4354 = vmatmul.mubr.bf16.gmra.mrb[68].mxu0 %v1163_v22  ;;  %v1146_v27 = vmax.f32 %v4263_v24, 0.0  ;;  %v5438_v24 = vsel %vm2102_vm0, %v2112_v5, 0.0  ;;  %v2125_v5 = vunpack.c.l.bf16 %v5009_v2 }
 0x338   : > { %v4264_v26 = vpop.f32.mrb[42].mxu0  ;;  %v1144_v31 = vmax.f32 %v1089_v25, 0.0  ;;  %6552 = vst [vmem:[#allocation25_spill] sm:$0xff] %v5438_v24  ;;  %v2116_v25 = vunpack.c.h.bf16 %v5005_v18  ;;  %4379 = vmatprep.subr.bf16.mxu1 %v4702_v23  ;;  %v2126_v18 = vunpack.c.h.bf16 %v5009_v2 }
 0x339   : > { %v1147_v29 = vmax.f32 %v4264_v26, 0.0  ;;  %v1092_v30 = vpop.f32.mrb[43].mxu0  ;;  %v2117_v26 = vunpack.c.l.bf16 %v5371_v28  ;;  %4380 = vmatpush3.bf16.msra.mxu1 %v4702_v23 }
 0x33a   : > { %v1145_v32 = vmax.f32 %v1092_v30, 0.0  ;;  %v5468_v45 = vsel %vm2102_vm0, %v2116_v25, 0.0 }
 0x33b   : > { %v1165_v33 = vpack.c.bf16 %v1147_v29, %v1146_v27  ;;  %6558 = vst [vmem:[#allocation31_spill] sm:$0xff] %v5468_v45  ;;  %v5472_v46 = vsel %vm2102_vm0, %v2117_v26, 0.0 }
 0x33c   : > { %v1164_v34 = vpack.c.bf16 %v1145_v32, %v1144_v31  ;;  %v2118_v31 = vunpack.c.h.bf16 %v5371_v28  ;;  %v5006_v32 = vld [vmem:[%s5346_s11 + $0x40] sm:$0xff]   ;;  %6559 = vst [vmem:[#allocation32_spill] sm:$0xff] %v5472_v46 }
 0x33e   : > { %v4267_v35 = vpop.f32.mrb[44].mxu0  ;;  %4309 = vmatprep.mubr.bf16.mxu1 %v1164_v34  ;;  %4357 = vmatprep.mubr.bf16.mxu0 %v1164_v34  ;;  %v5476_v49 = vsel %vm2102_vm0, %v2118_v31, 0.0  ;;  %v5511_v31 = vsel %vm2102_vm0, %v2121_v54, 0.0 }
 0x33f   : > { %v1105_v36 = vpop.f32.mrb[45].mxu0  ;;  %4310 = vmatmul.mubr.bf16.gmra.mrb[72].mxu1 %v1165_v33  ;;  %4358 = vmatmul.mubr.bf16.gmra.mrb[72].mxu0 %v1165_v33  ;;  %v1150_v38 = vmax.f32 %v4267_v35, 0.0  ;;  %v2119_v33 = vunpack.c.l.bf16 %v5006_v32  ;;  %6560 = vst [vmem:[#allocation33_spill] sm:$0xff] %v5476_v49  ;;  %6567 = vst [vmem:[#allocation40_spill] sm:$0xff] %v5511_v31 }
 0x340   : > { %v4268_v37 = vpop.f32.mrb[46].mxu0  ;;  %v1148_v41 = vmax.f32 %v1105_v36, 0.0 }
 0x341   : > { %v1151_v39 = vmax.f32 %v4268_v37, 0.0  ;;  %v1108_v40 = vpop.f32.mrb[47].mxu0  ;;  %v5480_v50 = vsel %vm2102_vm0, %v2119_v33, 0.0 }
 0x342   : > { %v1149_v42 = vmax.f32 %v1108_v40, 0.0  ;;  %6561 = vst [vmem:[#allocation34_spill] sm:$0xff] %v5480_v50 }
 0x343   : > { %v1167_v43 = vpack.c.bf16 %v1151_v39, %v1150_v38  ;;  %v5455_v38 = vsel %vm2102_vm0, %v2113_v13, 0.0  ;;  %v5459_v39 = vsel %vm2102_vm0, %v2114_v14, 0.0 }
 0x344   : > { %v1166_v44 = vpack.c.bf16 %v1149_v42, %v1148_v41  ;;  %6555 = vst [vmem:[#allocation28_spill] sm:$0xff] %v5455_v38  ;;  %6556 = vst [vmem:[#allocation29_spill] sm:$0xff] %v5459_v39  ;;  %v5464_v41 = vsel %vm2102_vm0, %v2115_v19, 0.0  ;;  %v2120_v42 = vunpack.c.h.bf16 %v5006_v32  ;;  %v5010_v19 = vld [vmem:[%s5346_s11 + $0x60] sm:$0xff]   ;;  %v5515_v32 = vsel %vm2102_vm0, %v2122_v55, 0.0  ;;  %v5539_v55 = vld [vmem:[%s5346_s11 + $0x68] sm:$0xff]  }
 0x345   : > { %6557 = vst [vmem:[#allocation30_spill] sm:$0xff] %v5464_v41  ;;  %6568 = vst [vmem:[#allocation41_spill] sm:$0xff] %v5515_v32 }
 0x346   : > { %4313 = vmatprep.mubr.bf16.mxu1 %v1166_v44  ;;  %4361 = vmatprep.mubr.bf16.mxu0 %v1166_v44  ;;  %v5489_v61 = vsel %vm2102_vm0, %v2120_v42, 0.0 }
 0x347   : > { %4314 = vmatmul.mubr.bf16.gmra.mrb[76].mxu1 %v1167_v43  ;;  %4362 = vmatmul.mubr.bf16.gmra.mrb[76].mxu0 %v1167_v43  ;;  %6563 = vst [vmem:[#allocation36_spill] sm:$0xff] %v5489_v61 }
 0x3e2   : > { %v5422_v15 = vpop.f32.mrb[48].mxu1  ;;  %v5424_v16 = vpop.f32.mrb[48].mxu0 }
 0x3e3   : > { %6549 = vst [vmem:[#allocation22_spill] sm:$0xff] %v5422_v15  ;;  %v1654_v20 = vand.u32 2147483647, %v5424_v16  ;;  %v5432_v21 = vpop.f32.mrb[49].mxu1  ;;  %v5434_v22 = vpop.f32.mrb[49].mxu0 }
 0x3e4   : > { %6551 = vst [vmem:[#allocation24_spill] sm:$0xff] %v5432_v21  ;;  %v1652_v27 = vand.u32 2147483647, %v5434_v22  ;;  %v5442_v29 = vpop.f32.mrb[50].mxu1  ;;  %v5444_v30 = vpop.f32.mrb[50].mxu0 }
 0x3e5   : > { %6553 = vst [vmem:[#allocation26_spill] sm:$0xff] %v5442_v29  ;;  %v1686_v34 = vsub.f32 0.0, %v1654_v20  ;;  %v1655_v35 = vand.u32 2147483647, %v5444_v30  ;;  %v5449_v36 = vpop.f32.mrb[51].mxu1  ;;  %v5451_v37 = vpop.f32.mrb[51].mxu0  ;;  %v2127_v20 = vunpack.c.l.bf16 %v5010_v19 }
 0x3e6   : > { %6554 = vst [vmem:[#allocation27_spill] sm:$0xff] %v5449_v36  ;;  %v1684_v28 = vsub.f32 0.0, %v1652_v27  ;;  %v1653_v40 = vand.u32 2147483647, %v5451_v37 }
 0x3e7   : > { %v1720_v43 = vmul.f32 1.442695, %v1686_v34  ;;  %v1687_v44 = vsub.f32 0.0, %v1655_v35  ;;  %v5520_v35 = vsel %vm2102_vm0, %v2123_v57, 0.0  ;;  %v5536_v53 = vsel %vm2102_vm0, %v2127_v20, 0.0 }
 0x3e8   : > { %v1716_v47 = vmul.f32 1.442695, %v1684_v28  ;;  %v1685_v48 = vsub.f32 0.0, %v1653_v40  ;;  %6569 = vst [vmem:[#allocation42_spill] sm:$0xff] %v5520_v35  ;;  %v2128_v28 = vunpack.c.h.bf16 %v5010_v19  ;;  %6573 = vst [vmem:[#allocation46_spill] sm:$0xff] %v5536_v53 }
 0x3e9   : > { %4743 = vpow2.f32 %v1720_v43  ;;  %v1722_v51 = vmul.f32 1.442695, %v1687_v44  ;;  %v5524_v43 = vsel %vm2102_vm0, %v2124_v1, 0.0  ;;  %v5528_v44 = vsel %vm2102_vm0, %v2125_v5, 0.0 }
 0x3ea   : > { %4745 = vpow2.f32 %v1716_v47  ;;  %v1718_v58 = vmul.f32 1.442695, %v1685_v48  ;;  %v5483_v59 = vpop.f32.mrb[52].mxu1  ;;  %v5485_v60 = vpop.f32.mrb[52].mxu0  ;;  %6570 = vst [vmem:[#allocation43_spill] sm:$0xff] %v5524_v43  ;;  %6571 = vst [vmem:[#allocation44_spill] sm:$0xff] %v5528_v44 }
 0x3eb   : > { %6562 = vst [vmem:[#allocation35_spill] sm:$0xff] %v5483_v59  ;;  %4747 = vpow2.f32 %v1722_v51  ;;  %v1658_v62 = vand.u32 2147483647, %v5485_v60  ;;  %v5493_v63 = vpop.f32.mrb[53].mxu1  ;;  %v5495_v0 = vpop.f32.mrb[53].mxu0  ;;  %v5532_v51 = vsel %vm2102_vm0, %v2126_v18, 0.0 }
 0x3ec   : > { %6564 = vst [vmem:[#allocation37_spill] sm:$0xff] %v5493_v63  ;;  %4749 = vpow2.f32 %v1718_v58  ;;  %v1656_v12 = vand.u32 2147483647, %v5495_v0  ;;  %v5499_v13 = vpop.f32.mrb[54].mxu1  ;;  %v5501_v14 = vpop.f32.mrb[54].mxu0  ;;  %6572 = vst [vmem:[#allocation45_spill] sm:$0xff] %v5532_v51 }
 0x3ed   : > { %6565 = vst [vmem:[#allocation38_spill] sm:$0xff] %v5499_v13  ;;  %v1690_v23 = vsub.f32 0.0, %v1658_v62  ;;  %v1659_v25 = vand.u32 2147483647, %v5501_v14  ;;  %v5505_v26 = vpop.f32.mrb[55].mxu1  ;;  %v5507_v27 = vpop.f32.mrb[55].mxu0 }
 0x3ee   : > { %6566 = vst [vmem:[#allocation39_spill] sm:$0xff] %v5505_v26  ;;  %v1688_v33 = vsub.f32 0.0, %v1656_v12  ;;  %v1657_v34 = vand.u32 2147483647, %v5507_v27  ;;  %v5549_v5 = vsel %vm2102_vm0, %v2128_v28, 0.0 }
 0x3ef   : > { %v1728_v40 = vmul.f32 1.442695, %v1690_v23  ;;  %v1691_v42 = vsub.f32 0.0, %v1659_v25  ;;  %6575 = vst [vmem:[#allocation48_spill] sm:$0xff] %v5549_v5 }
 0x3f0   : > { %v1724_v47 = vmul.f32 1.442695, %v1688_v33  ;;  %v1689_v48 = vsub.f32 0.0, %v1657_v34 }
 0x3f1   : > { %4751 = vpow2.f32 %v1728_v40  ;;  %v1730_v54 = vmul.f32 1.442695, %v1691_v42 }
 0x3f2   : > { %4753 = vpow2.f32 %v1724_v47  ;;  %v1726_v57 = vmul.f32 1.442695, %v1689_v48  ;;  %v5543_v62 = vpop.f32.mrb[56].mxu1  ;;  %v5545_v1 = vpop.f32.mrb[56].mxu0 }
 0x3f3   : > { %6574 = vst [vmem:[#allocation47_spill] sm:$0xff] %v5543_v62  ;;  %v4744_v2 = vpop.eup %4743  ;;  %4755 = vpow2.f32 %v1730_v54  ;;  %v1662_v18 = vand.u32 2147483647, %v5545_v1  ;;  %v5553_v19 = vpop.f32.mrb[57].mxu1 }
 0x3f4   : > { %v5555_v20 = vpop.f32.mrb[57].mxu0  ;;  %v4746_v23 = vpop.eup %4745  ;;  %v1798_v25 = vadd.f32 1.0, %v4744_v2  ;;  %v1801_v33 = vmul.f32 -0.5, %v4744_v2  ;;  %4757 = vpow2.f32 %v1726_v57  ;;  %v1804_v5 = vand.u32 2147483647, %v4744_v2 }
 0x3f5   : > { %v5558_v40 = vpop.f32.mrb[58].mxu1  ;;  %v5560_v42 = vpop.f32.mrb[58].mxu0  ;;  %v1780_v47 = vadd.f32 1.0, %v4746_v23  ;;  %v1783_v48 = vmul.f32 -0.5, %v4746_v23  ;;  %v1694_v51 = vsub.f32 0.0, %v1662_v18 }
 0x3f6   : > { %v4748_v28 = vpop.eup %4747  ;;  %v5564_v58 = vpop.f32.mrb[59].mxu1  ;;  %4759 = vlog2.f32 %v1798_v25  ;;  %v1802_v57 = vadd.f32 1.0, %v1801_v33  ;;  %v1786_v44 = vand.u32 2147483647, %v4746_v23  ;;  %vm5571_vm1 = vcmp.lt.f32.partialorder %v1804_v5, 0.0004427343 }
 0x3f7   : > { %v4750_v12 = vpop.eup %4749  ;;  %v1807_v53 = vadd.f32 1.0, %v4748_v28  ;;  %v5566_v34 = vpop.f32.mrb[59].mxu0  ;;  %4761 = vlog2.f32 %v1780_v47  ;;  %v1810_v43 = vmul.f32 -0.5, %v4748_v28  ;;  %v1784_v35 = vadd.f32 1.0, %v1783_v48 }
 0x3f8   : > { %v1813_v32 = vand.u32 2147483647, %v4748_v28  ;;  %v1789_v31 = vadd.f32 1.0, %v4750_v12  ;;  %v1792_v54 = vmul.f32 -0.5, %v4750_v12  ;;  %v1736_v33 = vmul.f32 1.442695, %v1694_v51 }
 0x3f9   : > { %4763 = vlog2.f32 %v1807_v53  ;;  %v1811_v18 = vadd.f32 1.0, %v1810_v43  ;;  %v1803_v53 = vmul.f32 %v4744_v2, %v1802_v57  ;;  %vm5578_vm3 = vcmp.lt.f32.partialorder %v1786_v44, 0.0004427343 }
 0x3fa   : > { %4765 = vlog2.f32 %v1789_v31  ;;  %v5575_v47 = vpop.f32.mrb[60].mxu1  ;;  %v1795_v61 = vand.u32 2147483647, %v4750_v12  ;;  %v5583_v5 = vpop.f32.mrb[60].mxu0  ;;  %v1785_v46 = vmul.f32 %v4746_v23, %v1784_v35  ;;  %vm5585_vm4 = vcmp.lt.f32.partialorder %v1813_v32, 0.0004427343 }
 0x3fb   : > { %v4752_v48 = vpop.eup %4751  ;;  %v5589_v2 = vpop.f32.mrb[61].mxu1  ;;  %v1793_v45 = vadd.f32 1.0, %v1792_v54  ;;  %4767 = vpow2.f32 %v1736_v33  ;;  %v1812_v35 = vmul.f32 %v4748_v28, %v1811_v18  ;;  %v1660_v3 = vand.u32 2147483647, %v5555_v20 }
 0x3fc   : > { %v4754_v56 = vpop.eup %4753  ;;  %v1834_v43 = vadd.f32 1.0, %v4752_v48  ;;  %v1837_v51 = vmul.f32 -0.5, %v4752_v48  ;;  %6582 = vst [vmem:[#allocation49_spill] sm:$0xff] %v5589_v2  ;;  %v5591_v57 = vpop.f32.mrb[61].mxu0  ;;  %v1840_v23 = vand.u32 2147483647, %v4752_v48 }
 0x3fd   : > { %v5593_v44 = vpop.eup %4755  ;;  %v1816_v41 = vadd.f32 1.0, %v4754_v56  ;;  %v1819_v39 = vmul.f32 -0.5, %v4754_v56  ;;  %v5595_v25 = vpop.f32.mrb[62].mxu1  ;;  %v1822_v10 = vand.u32 2147483647, %v4754_v56  ;;  %v1794_v6 = vmul.f32 %v4750_v12, %v1793_v45 }
 0x3fe   : > { %6583 = vst [vmem:[#allocation50_spill] sm:$0xff] %v5595_v25  ;;  %v5597_v38 = vpop.f32.mrb[62].mxu0  ;;  %v5599_v32 = vpop.eup %4757  ;;  %4769 = vlog2.f32 %v1834_v43  ;;  %v1843_v24 = vadd.f32 1.0, %v5593_v44  ;;  %v1838_v54 = vadd.f32 1.0, %v1837_v51  ;;  %v1846_v33 = vmul.f32 -0.5, %v5593_v44 }
 0x3ff   : > { %v5602_v17 = vpop.f32.mrb[63].mxu1  ;;  %v5604_v11 = vpop.f32.mrb[63].mxu0  ;;  %4771 = vlog2.f32 %v1816_v41  ;;  %vm5607_vm5 = vcmp.lt.f32.partialorder %v1795_v61, 0.0004427343  ;;  %v1820_v28 = vadd.f32 1.0, %v1819_v39  ;;  %v1825_v18 = vadd.f32 1.0, %v5599_v32 }
 0x400   : > { %6584 = vst [vmem:[#allocation51_spill] sm:$0xff] %v5602_v17  ;;  %v4760_v9 = vpop.eup %4759  ;;  %4773 = vlog2.f32 %v1843_v24  ;;  %v1847_v4 = vadd.f32 1.0, %v1846_v33  ;;  %vm5614_vm6 = vcmp.lt.f32.partialorder %v1840_v23, 0.0004427343  ;;  %v1828_v61 = vmul.f32 -0.5, %v5599_v32 }
 0x401   : > { %v4762_v43 = vpop.eup %4761  ;;  %v1800_v7 = vmul.f32 0.6931472, %v4760_v9  ;;  %4775 = vlog2.f32 %v1825_v18  ;;  %v1839_v25 = vmul.f32 %v4752_v48, %v1838_v54  ;;  %vm5621_vm7 = vcmp.lt.f32.partialorder %v1822_v10, 0.0004427343 }
 0x402   : > { %v1782_v41 = vmul.f32 0.6931472, %v4762_v43  ;;  %v1849_v45 = vand.u32 2147483647, %v5593_v44  ;;  %v5626_v12 = vpop.f32.mrb[64].mxu1  ;;  %v5628_v23 = vpop.f32.mrb[64].mxu0 }
 0x403   : > { %v4764_v51 = vpop.eup %4763  ;;  %v1806_v24 = vsel %vm5571_vm1, %v1803_v53, %v1800_v7  ;;  %6591 = vst [vmem:[#allocation52_spill] sm:$0xff] %v5626_v12  ;;  %v6592_v18 = vmax.f32 %v5424_v16, 0.0  ;;  %v1821_v7 = vmul.f32 %v4754_v56, %v1820_v28  ;;  %v1831_v48 = vand.u32 2147483647, %v5599_v32  ;;  %v5635_v10 = vpop.f32.mrb[65].mxu1 }
 0x404   : > { %v1809_v39 = vmul.f32 0.6931472, %v4764_v51  ;;  %v4766_v33 = vpop.eup %4765  ;;  %v1788_v50 = vsel %vm5578_vm3, %v1785_v46, %v1782_v41  ;;  %v5637_v53 = vpop.f32.mrb[65].mxu0  ;;  %v6593_v54 = vmax.f32 %v5434_v22, 0.0  ;;  %v5644_v16 = vmul.f32 %v5593_v44, %v1847_v4 }
 0x405   : > { %v2070_v43 = vadd.f32 %v1806_v24, %v6592_v18  ;;  %v1791_v2 = vmul.f32 0.6931472, %v4766_v33  ;;  %v5646_v49 = vpop.f32.mrb[66].mxu1  ;;  %v5648_v46 = vpop.f32.mrb[66].mxu0  ;;  %v6595_v41 = vmax.f32 %v5444_v30, 0.0  ;;  %v1829_v24 = vadd.f32 1.0, %v1828_v61 }
 0x406   : > { %v2068_v51 = vadd.f32 %v1788_v50, %v6593_v54  ;;  %v1815_v12 = vsel %vm5585_vm4, %v1812_v35, %v1809_v39  ;;  %6594 = vst [vmem:[#allocation53_spill] sm:$0xff] %v5646_v49  ;;  %v5654_v18 = vpop.f32.mrb[67].mxu1  ;;  %v5656_v31 = vpop.f32.mrb[67].mxu0  ;;  %vm5667_vm8 = vcmp.lt.f32.partialorder %v1849_v45, 0.0004427343  ;;  %v1692_v61 = vsub.f32 0.0, %v1660_v3 }
 0x407   : > { %v2169_v56 = vmul.f32 0.5, %v2070_v43  ;;  %v3554_v28 = vsel %vm3551_vm2, %v2070_v43, 0.0  ;;  %v2071_v22 = vadd.f32 %v1815_v12, %v6595_v41  ;;  %6596 = vst [vmem:[#allocation54_spill] sm:$0xff] %v5654_v18  ;;  %v5658_v35 = vpop.eup %4767  ;;  %v1797_v39 = vsel %vm5607_vm5, %v1794_v6, %v1791_v2  ;;  %v4703_v18 = vld [vmem:[#allocation5 + $0x180] sm:$0xff]   ;;  %v4704_v49 = vld [vmem:[#allocation5 + $0x188] sm:$0xff]  }
 0x408   : > { %v3586_v4 = vsel %vm2102_vm0, %v5422_v15, %v3554_v28  ;;  %v3552_v44 = vsel %vm3551_vm2, %v2068_v51, 0.0  ;;  %v4770_v12 = vpop.eup %4769  ;;  %v2167_v33 = vmul.f32 0.5, %v2068_v51  ;;  %vm5681_vm9 = vcmp.lt.f32.partialorder %v1831_v48, 0.0004427343  ;;  %4413 = vmatprep.subr.bf16.mxu0 %v4703_v18 }
 0x409   : > { %3618 = vst [vmem:[%s5673_s20 + $0x10] sm:$0xff] %v3586_v4  ;;  %v3584_v43 = vsel %vm2102_vm0, %v5432_v21, %v3552_v44  ;;  %v3555_v6 = vsel %vm3551_vm2, %v2071_v22, 0.0  ;;  %v4772_v3 = vpop.eup %4771  ;;  %v2203_v2 = vmul.f32 1.442695, %v2169_v56  ;;  %v6601_v50 = vmax.f32 %v5451_v37, 0.0  ;;  %4414 = vmatpush3.bf16.msra.mxu0 %v4703_v18 }
 0x40a   : > { %3616 = vst [vmem:[%s5673_s20] sm:$0xff] %v3584_v43  ;;  %v3587_v45 = vsel %vm2102_vm0, %v5442_v29, %v3555_v6  ;;  %v1836_v51 = vmul.f32 0.6931472, %v4770_v12  ;;  %v4774_v28 = vpop.eup %4773  ;;  %v2170_v41 = vmul.f32 0.5, %v2071_v22  ;;  %v1818_v4 = vmul.f32 0.6931472, %v4772_v3  ;;  %v5694_v15 = vpop.f32.mrb[68].mxu1  ;;  %4415 = vmatprep.subr.bf16.mxu0 %v4704_v49 }
 0x40b   : > { %v2069_v54 = vadd.f32 %v1797_v39, %v6601_v50  ;;  %3619 = vst [vmem:[%s5673_s20 + $0x18] sm:$0xff] %v3587_v45  ;;  %v1830_v48 = vmul.f32 %v5599_v32, %v1829_v24  ;;  %v1870_v44 = vadd.f32 1.0, %v5658_v35  ;;  %6602 = vst [vmem:[#allocation55_spill] sm:$0xff] %v5694_v15  ;;  %v1732_v39 = vmul.f32 1.442695, %v1692_v61  ;;  %v5700_v12 = vpop.f32.mrb[68].mxu0  ;;  %v4776_v6 = vpop.eup %4775 }
 0x40c   : > { %v1842_v37 = vsel %vm5614_vm6, %v1839_v25, %v1836_v51  ;;  %v5702_v22 = vpop.f32.mrb[69].mxu1  ;;  %v2199_v3 = vmul.f32 1.442695, %v2167_v33  ;;  %v6604_v24 = vmax.f32 %v5485_v60, 0.0  ;;  %v1824_v50 = vsel %vm5621_vm7, %v1821_v7, %v1818_v4 }
 0x40d   : > { %v2168_v56 = vmul.f32 0.5, %v2069_v54  ;;  %v3553_v43 = vsel %vm3551_vm2, %v2069_v54, 0.0  ;;  %6603 = vst [vmem:[#allocation56_spill] sm:$0xff] %v5702_v22  ;;  %v5711_v54 = vpop.f32.mrb[69].mxu0  ;;  %v5713_v17 = vpop.f32.mrb[70].mxu1  ;;  %4777 = vpow2.f32 %v2203_v2  ;;  %v6606_v25 = vmax.f32 %v5495_v0, 0.0  ;;  %4416 = vmatpush3.bf16.msra.mxu0 %v4704_v49 }
 0x40e   : > { %v3585_v32 = vsel %vm2102_vm0, %v5449_v36, %v3553_v43  ;;  %v2074_v45 = vadd.f32 %v1842_v37, %v6604_v24  ;;  %6605 = vst [vmem:[#allocation57_spill] sm:$0xff] %v5713_v17  ;;  %v1845_v33 = vmul.f32 0.6931472, %v4774_v28  ;;  %v1827_v51 = vmul.f32 0.6931472, %v4776_v6  ;;  %v5720_v9 = vpop.f32.mrb[70].mxu0 }
 0x40f   : > { %3617 = vst [vmem:[%s5673_s20 + $0x8] sm:$0xff] %v3585_v32  ;;  %v2072_v61 = vadd.f32 %v1824_v50, %v6606_v25  ;;  %v2205_v29 = vmul.f32 1.442695, %v2170_v41  ;;  %4779 = vlog2.f32 %v1870_v44  ;;  %v5722_v7 = vpop.f32.mrb[71].mxu1  ;;  %v2201_v4 = vmul.f32 1.442695, %v2168_v56 }
 0x410   : > { %v2173_v43 = vmul.f32 0.5, %v2074_v45  ;;  %v3558_v60 = vsel %vm3551_vm2, %v2074_v45, 0.0  ;;  %6607 = vst [vmem:[#allocation58_spill] sm:$0xff] %v5722_v7  ;;  %v5729_v41 = vpop.f32.mrb[71].mxu0  ;;  %v1851_v37 = vsel %vm5667_vm8, %v5644_v16, %v1845_v33  ;;  %v1833_v56 = vsel %vm5681_vm9, %v1830_v48, %v1827_v51 }
 0x411   : > { %v3590_v2 = vsel %vm2102_vm0, %v5483_v59, %v3558_v60  ;;  %v2171_v0 = vmul.f32 0.5, %v2072_v61  ;;  %v3556_v28 = vsel %vm3551_vm2, %v2072_v61, 0.0  ;;  %v1873_v6 = vmul.f32 -0.5, %v5658_v35 }
 0x412   : > { %3622 = vst [vmem:[%s5673_s20 + $0x30] sm:$0xff] %v3590_v2  ;;  %v3588_v44 = vsel %vm2102_vm0, %v5493_v63, %v3556_v28  ;;  %4781 = vpow2.f32 %v2199_v3  ;;  %v2211_v32 = vmul.f32 1.442695, %v2173_v43  ;;  %v6608_v24 = vmax.f32 %v5501_v14, 0.0  ;;  %v5753_v48 = vpop.f32.mrb[72].mxu1  ;;  %v5778_v28 = vld [vmem:[%s5346_s11 + $0x78] sm:$0xff]  }
 0x413   : > { %3620 = vst [vmem:[%s5673_s20 + $0x20] sm:$0xff] %v3588_v44  ;;  %v6609_v50 = vmax.f32 %v5507_v27, 0.0  ;;  %v6610_v61 = vunpack.c.l.bf16 %v5539_v55  ;;  %4783 = vpow2.f32 %v2205_v29  ;;  %v2207_v16 = vmul.f32 1.442695, %v2171_v0  ;;  %6612 = vst [vmem:[#allocation60_spill] sm:$0xff] %v5753_v48  ;;  %v5764_v29 = vpop.f32.mrb[72].mxu0 }
 0x414   : > { %v2075_v45 = vadd.f32 %v1851_v37, %v6608_v24  ;;  %v1663_v8 = vand.u32 2147483647, %v5560_v42  ;;  %v6613_v14 = vunpack.c.h.bf16 %v5539_v55  ;;  %4785 = vpow2.f32 %v2201_v4  ;;  %v5766_v51 = vpop.f32.mrb[73].mxu1  ;;  %v5773_v4 = vpop.f32.mrb[73].mxu0  ;;  %6617 = vst [vmem:[#allocation64_spill] sm:$0xff] %v5778_v28 }
 0x415   : > { %v2073_v25 = vadd.f32 %v1833_v56, %v6609_v50  ;;  %v5750_v30 = vsel %vm2102_vm0, %v6610_v61, 0.0  ;;  %v1876_v33 = vand.u32 2147483647, %v5658_v35  ;;  %6615 = vst [vmem:[#allocation62_spill] sm:$0xff] %v5766_v51  ;;  %v1874_v2 = vadd.f32 1.0, %v1873_v6  ;;  %v5775_v0 = vpop.f32.mrb[74].mxu1 }
 0x416   : > { %6611 = vst [vmem:[#allocation59_spill] sm:$0xff] %v5750_v30  ;;  %v5759_v27 = vsel %vm2102_vm0, %v6613_v14, 0.0  ;;  %v3559_v3 = vsel %vm3551_vm2, %v2075_v45, 0.0  ;;  %v2174_v43 = vmul.f32 0.5, %v2075_v45  ;;  %6616 = vst [vmem:[#allocation63_spill] sm:$0xff] %v5775_v0  ;;  %v1630_v56 = vmax.f32 %v5545_v1, 0.0 }
 0x417   : > { %6614 = vst [vmem:[#allocation61_spill] sm:$0xff] %v5759_v27  ;;  %v3591_v55 = vsel %vm2102_vm0, %v5499_v13, %v3559_v3  ;;  %v3557_v60 = vsel %vm3551_vm2, %v2073_v25, 0.0  ;;  %4787 = vpow2.f32 %v1732_v39  ;;  %v5786_v24 = vpop.f32.mrb[74].mxu0  ;;  %v5788_v45 = vpop.f32.mrb[75].mxu1  ;;  %v2172_v6 = vmul.f32 0.5, %v2073_v25 }
 0x418   : > { %3623 = vst [vmem:[%s5673_s20 + $0x38] sm:$0xff] %v3591_v55  ;;  %v3589_v37 = vsel %vm2102_vm0, %v5505_v26, %v3557_v60  ;;  %6618 = vst [vmem:[#allocation65_spill] sm:$0xff] %v5788_v45  ;;  %4789 = vpow2.f32 %v2211_v32  ;;  %v1695_v50 = vsub.f32 0.0, %v1663_v8  ;;  %v1661_v61 = vand.u32 2147483647, %v5566_v34  ;;  %v5792_v14 = vpop.f32.mrb[75].mxu0  ;;  %v5794_v3 = vpop.eup %4777 }
 0x419   : > { %3621 = vst [vmem:[%s5673_s20 + $0x28] sm:$0xff] %v3589_v37  ;;  %6619 = vst [vmem:[#allocation66_spill] sm:$0xff] %v5794_v3  ;;  %4791 = vpow2.f32 %v2207_v16  ;;  %vm5796_vm10 = vcmp.lt.f32.partialorder %v1876_v33, 0.0004427343  ;;  %v1666_v1 = vand.u32 2147483647, %v5583_v5  ;;  %v4780_v60 = vpop.eup %4779  ;;  %v1875_v25 = vmul.f32 %v5658_v35, %v1874_v2 }
 0x41a   : > { %v1664_v39 = vand.u32 2147483647, %v5591_v57  ;;  %v2213_v32 = vmul.f32 1.442695, %v2174_v43  ;;  %v1738_v8 = vmul.f32 1.442695, %v1695_v50 }
 0x41b   : > { %v1693_v37 = vsub.f32 0.0, %v1661_v61  ;;  %v1872_v44 = vmul.f32 0.6931472, %v4780_v60  ;;  %v1698_v28 = vsub.f32 0.0, %v1666_v1  ;;  %v1667_v30 = vand.u32 2147483647, %v5597_v38 }
 0x41c   : > { %v1696_v27 = vsub.f32 0.0, %v1664_v39  ;;  %4793 = vpow2.f32 %v1738_v8  ;;  %v1665_v45 = vand.u32 2147483647, %v5604_v11  ;;  %v5806_v13 = vpop.f32.mrb[76].mxu1  ;;  %v5808_v59 = vpop.eup %4781  ;;  %v2209_v39 = vmul.f32 1.442695, %v2172_v6 }
 0x41d   : > { %v1734_v33 = vmul.f32 1.442695, %v1693_v37  ;;  %6622 = vst [vmem:[#allocation67_spill] sm:$0xff] %v5806_v13  ;;  %6623 = vst [vmem:[#allocation68_spill] sm:$0xff] %v5808_v59  ;;  %v1878_v35 = vsel %vm5796_vm10, %v1875_v25, %v1872_v44  ;;  %v1744_v43 = vmul.f32 1.442695, %v1698_v28  ;;  %v5814_v1 = vpop.eup %4783 }
 0x41e   : > { %v1740_v2 = vmul.f32 1.442695, %v1696_v27  ;;  %v1699_v50 = vsub.f32 0.0, %v1667_v30  ;;  %v5812_v61 = vpop.f32.mrb[76].mxu0  ;;  %6624 = vst [vmem:[#allocation69_spill] sm:$0xff] %v5814_v1  ;;  %v2078_v60 = vadd.f32 %v1878_v35, %v1630_v56  ;;  %v1697_v8 = vsub.f32 0.0, %v1665_v45  ;;  %v5820_v13 = vpop.eup %4785 }
 0x41f   : > { %4795 = vpow2.f32 %v1734_v33  ;;  %v5816_v37 = vpop.f32.mrb[77].mxu1  ;;  %v5818_v16 = vpop.f32.mrb[77].mxu0  ;;  %6626 = vst [vmem:[#allocation71_spill] sm:$0xff] %v5820_v13  ;;  %v1670_v30 = vand.u32 2147483647, %v5628_v23 }
 0x420   : > { %6625 = vst [vmem:[#allocation70_spill] sm:$0xff] %v5816_v37  ;;  %4797 = vpow2.f32 %v1744_v43  ;;  %v1746_v28 = vmul.f32 1.442695, %v1699_v50  ;;  %v5824_v27 = vpop.f32.mrb[78].mxu1  ;;  %v2177_v44 = vmul.f32 0.5, %v2078_v60  ;;  %v3562_v56 = vsel %vm3551_vm2, %v2078_v60, 0.0 }
 0x421   : > { %6627 = vst [vmem:[#allocation72_spill] sm:$0xff] %v5824_v27  ;;  %4799 = vpow2.f32 %v1740_v2  ;;  %v1742_v45 = vmul.f32 1.442695, %v1697_v8  ;;  %v5828_v6 = vpop.f32.mrb[78].mxu0  ;;  %v5830_v25 = vpop.f32.mrb[79].mxu1  ;;  %v3594_v35 = vsel %vm2102_vm0, %v5543_v62, %v3562_v56  ;;  %v1702_v43 = vsub.f32 0.0, %v1670_v30 }
 0x422   : > { %6628 = vst [vmem:[#allocation73_spill] sm:$0xff] %v5830_v25  ;;  %v4788_v33 = vpop.eup %4787  ;;  %4801 = vpow2.f32 %v1746_v28  ;;  %v1668_v50 = vand.u32 2147483647, %v5637_v53  ;;  %v5836_v55 = vpop.f32.mrb[79].mxu0  ;;  %3626 = vst [vmem:[%s5673_s20 + $0x50] sm:$0xff] %v3594_v35 }
 0x423   : > { %6629 = vst [vmem:[#allocation74_spill] sm:$0xff] %v5836_v55  ;;  %v5838_v27 = vpop.eup %4789  ;;  %4803 = vpow2.f32 %v2213_v32  ;;  %v1852_v2 = vadd.f32 1.0, %v4788_v33  ;;  %v1855_v60 = vmul.f32 -0.5, %v4788_v33  ;;  %v1752_v56 = vmul.f32 1.442695, %v1702_v43 }
 0x424   : > { %6630 = vst [vmem:[#allocation75_spill] sm:$0xff] %v5838_v27  ;;  %v5842_v25 = vpop.eup %4791  ;;  %4805 = vpow2.f32 %v1742_v45  ;;  %v1700_v28 = vsub.f32 0.0, %v1668_v50  ;;  %v2219_v30 = vmul.f32 1.442695, %v2177_v44  ;;  %v1671_v26 = vand.u32 2147483647, %v5648_v46 }
 0x425   : > { %6631 = vst [vmem:[#allocation76_spill] sm:$0xff] %v5842_v25  ;;  %4807 = vpow2.f32 %v2209_v39  ;;  %v1856_v32 = vadd.f32 1.0, %v1855_v60  ;;  %v1858_v35 = vand.u32 2147483647, %v4788_v33  ;;  %v1669_v60 = vand.u32 2147483647, %v5656_v31 }
 0x426   : > { %4809 = vlog2.f32 %v1852_v2  ;;  %v1748_v63 = vmul.f32 1.442695, %v1700_v28  ;;  %v4794_v27 = vpop.eup %4793  ;;  %v1703_v39 = vsub.f32 0.0, %v1671_v26 }
 0x427   : > { %4811 = vpow2.f32 %v1752_v56  ;;  %v1879_v45 = vadd.f32 1.0, %v4794_v27  ;;  %v1882_v43 = vmul.f32 -0.5, %v4794_v27  ;;  %v1857_v62 = vmul.f32 %v4788_v33, %v1856_v32 }
 0x428   : > { %4813 = vpow2.f32 %v1748_v63  ;;  %vm5853_vm11 = vcmp.lt.f32.partialorder %v1858_v35, 0.0004427343  ;;  %v1885_v25 = vand.u32 2147483647, %v4794_v27  ;;  %v5859_v36 = vmul.f32 1.442695, %v1703_v39 }
 0x429   : > { %v4796_v44 = vpop.eup %4795  ;;  %4815 = vpow2.f32 %v2219_v30  ;;  %v1883_v50 = vadd.f32 1.0, %v1882_v43  ;;  %v5863_v35 = vsub.f32 0.0, %v1669_v60 }
 0x42a   : > { %v4798_v28 = vpop.eup %4797  ;;  %4817 = vlog2.f32 %v1879_v45  ;;  %v1861_v56 = vadd.f32 1.0, %v4796_v44  ;;  %v1864_v63 = vmul.f32 -0.5, %v4796_v44  ;;  %v1867_v33 = vand.u32 2147483647, %v4796_v44 }
 0x42b   : > { %v4800_v37 = vpop.eup %4799  ;;  %v1906_v26 = vadd.f32 1.0, %v4798_v28  ;;  %v1909_v0 = vmul.f32 -0.5, %v4798_v28  ;;  %v1912_v32 = vand.u32 2147483647, %v4798_v28  ;;  %v1884_v51 = vmul.f32 %v4794_v27, %v1883_v50  ;;  %v4705_v27 = vld [vmem:[#allocation5 + $0x190] sm:$0xff]  }
 0x42c   : > { %v5857_v30 = vpop.eup %4801  ;;  %4819 = vlog2.f32 %v1861_v56  ;;  %v1888_v2 = vadd.f32 1.0, %v4800_v37  ;;  %v1865_v3 = vadd.f32 1.0, %v1864_v63  ;;  %v1891_v13 = vmul.f32 -0.5, %v4800_v37  ;;  %4417 = vmatprep.subr.bf16.mxu0 %v4705_v27 }
 0x42d   : > { %v5861_v1 = vpop.eup %4803  ;;  %4821 = vlog2.f32 %v1906_v26  ;;  %v1910_v21 = vadd.f32 1.0, %v1909_v0  ;;  %v1894_v55 = vand.u32 2147483647, %v4800_v37  ;;  %v1915_v43 = vadd.f32 1.0, %v5857_v30  ;;  %4418 = vmatpush3.bf16.msra.mxu0 %v4705_v27 }
 0x42e   : > { %6634 = vst [vmem:[#allocation77_spill] sm:$0xff] %v5861_v1  ;;  %v4806_v45 = vpop.eup %4805  ;;  %4823 = vlog2.f32 %v1888_v2  ;;  %v1918_v39 = vmul.f32 -0.5, %v5857_v30  ;;  %vm5870_vm12 = vcmp.lt.f32.partialorder %v1885_v25, 0.0004427343  ;;  %v1892_v60 = vadd.f32 1.0, %v1891_v13 }
 0x42f   : > { %v5865_v59 = vpop.eup %4807  ;;  %v1897_v63 = vadd.f32 1.0, %v4806_v45  ;;  %vm5874_vm13 = vcmp.lt.f32.partialorder %v1867_v33, 0.0004427343  ;;  %4825 = vlog2.f32 %v1915_v43  ;;  %v1866_v17 = vmul.f32 %v4796_v44, %v1865_v3 }
 0x430   : > { %6635 = vst [vmem:[#allocation78_spill] sm:$0xff] %v5865_v59  ;;  %v4810_v1 = vpop.eup %4809  ;;  %v1900_v59 = vmul.f32 -0.5, %v4806_v45  ;;  %v1911_v56 = vmul.f32 %v4798_v28, %v1910_v21  ;;  %vm5880_vm14 = vcmp.lt.f32.partialorder %v1912_v32, 0.0004427343  ;;  %v1921_v25 = vand.u32 2147483647, %v5857_v30 }
 0x431   : > { %v4812_v0 = vpop.eup %4811  ;;  %v1854_v2 = vmul.f32 0.6931472, %v4810_v1  ;;  %4827 = vlog2.f32 %v1897_v63  ;;  %vm5889_vm15 = vcmp.lt.f32.partialorder %v1894_v55, 0.0004427343  ;;  %v1919_v33 = vadd.f32 1.0, %v1918_v39 }
 0x432   : > { %v5878_v7 = vpop.eup %4813  ;;  %v1942_v43 = vadd.f32 1.0, %v4812_v0  ;;  %v6645_v21 = vmax.f32 %v5555_v20, 0.0  ;;  %v1893_v28 = vmul.f32 %v4800_v37, %v1892_v60  ;;  %v1903_v32 = vand.u32 2147483647, %v4806_v45 }
 0x433   : > { %v5885_v13 = vpop.eup %4815  ;;  %v1860_v1 = vsel %vm5853_vm11, %v1857_v62, %v1854_v2  ;;  %v1945_v22 = vmul.f32 -0.5, %v4812_v0  ;;  %v1901_v63 = vadd.f32 1.0, %v1900_v59  ;;  %v1924_v8 = vadd.f32 1.0, %v5878_v7 }
 0x434   : > { %6642 = vst [vmem:[#allocation79_spill] sm:$0xff] %v5885_v13  ;;  %v4818_v3 = vpop.eup %4817  ;;  %v2076_v44 = vadd.f32 %v1860_v1, %v6645_v21  ;;  %4829 = vlog2.f32 %v1942_v43  ;;  %vm5898_vm1 = vcmp.lt.f32.partialorder %v1921_v25, 0.0004427343  ;;  %v1948_v1 = vand.u32 2147483647, %v4812_v0 }
 0x435   : > { %v1881_v15 = vmul.f32 0.6931472, %v4818_v3  ;;  %v1946_v20 = vadd.f32 1.0, %v1945_v22  ;;  %4831 = vlog2.f32 %v1924_v8  ;;  %v6648_v21 = vmax.f32 %v5560_v42, 0.0 }
 0x436   : > { %v4820_v62 = vpop.eup %4819  ;;  %v2175_v55 = vmul.f32 0.5, %v2076_v44  ;;  %v3560_v2 = vsel %vm3551_vm2, %v2076_v44, 0.0  ;;  %v1920_v13 = vmul.f32 %v5857_v30, %v1919_v33  ;;  %vm5911_vm3 = vcmp.lt.f32.partialorder %v1903_v32, 0.0004427343 }
 0x437   : > { %v4822_v37 = vpop.eup %4821  ;;  %v3592_v60 = vsel %vm2102_vm0, %v5553_v19, %v3560_v2  ;;  %v1887_v59 = vsel %vm5870_vm12, %v1884_v51, %v1881_v15  ;;  %v1863_v43 = vmul.f32 0.6931472, %v4820_v62  ;;  %v1902_v26 = vmul.f32 %v4806_v45, %v1901_v63 }
 0x438   : > { %v4824_v3 = vpop.eup %4823  ;;  %3624 = vst [vmem:[%s5673_s20 + $0x40] sm:$0xff] %v3592_v60  ;;  %v2079_v25 = vadd.f32 %v1887_v59, %v6648_v21  ;;  %v1908_v44 = vmul.f32 0.6931472, %v4822_v37  ;;  %v2215_v2 = vmul.f32 1.442695, %v2175_v55  ;;  %v6651_v62 = vmax.f32 %v5566_v34, 0.0 }
 0x439   : > { %v1869_v15 = vsel %vm5874_vm13, %v1866_v17, %v1863_v43  ;;  %v1890_v51 = vmul.f32 0.6931472, %v4824_v3  ;;  %v1947_v33 = vmul.f32 %v4812_v0, %v1946_v20  ;;  %vm5921_vm4 = vcmp.lt.f32.partialorder %v1948_v1, 0.0004427343  ;;  %v4826_v55 = vpop.eup %4825 }
 0x43a   : > { %v2178_v8 = vmul.f32 0.5, %v2079_v25  ;;  %v3563_v42 = vsel %vm3551_vm2, %v2079_v25, 0.0  ;;  %v2077_v30 = vadd.f32 %v1869_v15, %v6651_v62  ;;  %v1914_v48 = vsel %vm5880_vm14, %v1911_v56, %v1908_v44 }
 0x43b   : > { %v3595_v17 = vsel %vm2102_vm0, %v5558_v40, %v3563_v42  ;;  %v1896_v45 = vsel %vm5889_vm15, %v1893_v28, %v1890_v51  ;;  %v1927_v34 = vmul.f32 -0.5, %v5878_v7  ;;  %v4828_v0 = vpop.eup %4827  ;;  %v6654_v37 = vmax.f32 %v5583_v5, 0.0 }
 0x43c   : > { %v2221_v63 = vmul.f32 1.442695, %v2178_v8  ;;  %3627 = vst [vmem:[%s5673_s20 + $0x58] sm:$0xff] %v3595_v17  ;;  %v2176_v20 = vmul.f32 0.5, %v2077_v30  ;;  %v3561_v1 = vsel %vm3551_vm2, %v2077_v30, 0.0  ;;  %v6655_v50 = vmax.f32 %v5591_v57, 0.0 }
 0x43d   : > { %v2082_v60 = vadd.f32 %v1914_v48, %v6654_v37  ;;  %v3593_v56 = vsel %vm2102_vm0, %v5564_v58, %v3561_v1  ;;  %v1917_v28 = vmul.f32 0.6931472, %v4826_v55  ;;  %v1899_v59 = vmul.f32 0.6931472, %v4828_v0  ;;  %v4706_v30 = vld [vmem:[#allocation5 + $0x198] sm:$0xff]  }
 0x43e   : > { %v2080_v18 = vadd.f32 %v1896_v45, %v6655_v50  ;;  %4833 = vpow2.f32 %v2215_v2  ;;  %v2217_v43 = vmul.f32 1.442695, %v2176_v20  ;;  %3625 = vst [vmem:[%s5673_s20 + $0x48] sm:$0xff] %v3593_v56  ;;  %v4830_v21 = vpop.eup %4829  ;;  %v6656_v2 = vld [vmem:[#allocation49_spill] sm:$0xff]  ;;  %v6657_v8 = vmax.f32 %v5597_v38, 0.0  ;;  %4419 = vmatprep.subr.bf16.mxu0 %v4706_v30  ;;  %v4707_v50 = vld [vmem:[#allocation5 + $0x1a0] sm:$0xff]  }
 0x43f   : > { %v2181_v3 = vmul.f32 0.5, %v2082_v60  ;;  %v3566_v5 = vsel %vm3551_vm2, %v2082_v60, 0.0  ;;  %v1923_v15 = vsel %vm5898_vm1, %v1920_v13, %v1917_v28  ;;  %4835 = vpow2.f32 %v2221_v63  ;;  %v4832_v55 = vpop.eup %4831  ;;  %v6659_v63 = vld [vmem:[#allocation50_spill] sm:$0xff]  ;;  %v6661_v28 = vld [vmem:[#allocation51_spill] sm:$0xff]  ;;  %4420 = vmatpush3.bf16.msra.mxu0 %v4706_v30 }
 0x440   : > { %v3598_v25 = vsel %vm2102_vm0, %v5575_v47, %v3566_v5  ;;  %v2179_v44 = vmul.f32 0.5, %v2080_v18  ;;  %v3564_v57 = vsel %vm3551_vm2, %v2080_v18, 0.0  ;;  %v2083_v42 = vadd.f32 %v1923_v15, %v6657_v8  ;;  %4421 = vmatprep.subr.bf16.mxu0 %v4707_v50 }
 0x441   : > { %3630 = vst [vmem:[%s5673_s20 + $0x70] sm:$0xff] %v3598_v25  ;;  %v3596_v51 = vsel %vm2102_vm0, %v6656_v2, %v3564_v57  ;;  %v1928_v62 = vadd.f32 1.0, %v1927_v34  ;;  %4837 = vpow2.f32 %v2217_v43  ;;  %v1905_v13 = vsel %vm5911_vm3, %v1902_v26, %v1899_v59  ;;  %v4708_v57 = vld [vmem:[#allocation5 + $0x1a8] sm:$0xff]  }
 0x442   : > { %3628 = vst [vmem:[%s5673_s20 + $0x60] sm:$0xff] %v3596_v51  ;;  %v1944_v49 = vmul.f32 0.6931472, %v4830_v21  ;;  %v1930_v39 = vand.u32 2147483647, %v5878_v7  ;;  %v2182_v48 = vmul.f32 0.5, %v2083_v42  ;;  %4839 = vpow2.f32 %v5859_v36 }
 0x443   : > { %v2227_v17 = vmul.f32 1.442695, %v2181_v3  ;;  %v3567_v45 = vsel %vm3551_vm2, %v2083_v42, 0.0  ;;  %v6658_v38 = vmax.f32 %v5604_v11, 0.0  ;;  %v2223_v0 = vmul.f32 1.442695, %v2179_v44  ;;  %4422 = vmatpush3.bf16.msra.mxu0 %v4707_v50 }
 0x444   : > { %v3599_v20 = vsel %vm2102_vm0, %v6659_v63, %v3567_v45  ;;  %v1950_v22 = vsel %vm5921_vm4, %v1947_v33, %v1944_v49  ;;  %v1926_v26 = vmul.f32 0.6931472, %v4832_v55  ;;  %v6660_v60 = vmax.f32 %v5628_v23, 0.0  ;;  %4423 = vmatprep.subr.bf16.mxu0 %v4708_v57 }
 0x445   : > { %v2081_v34 = vadd.f32 %v1905_v13, %v6658_v38  ;;  %3631 = vst [vmem:[%s5673_s20 + $0x78] sm:$0xff] %v3599_v20  ;;  %v1929_v56 = vmul.f32 %v5878_v7, %v1928_v62  ;;  %v2229_v18 = vmul.f32 1.442695, %v2182_v48  ;;  %v1750_v33 = vmul.f32 1.442695, %v5863_v35  ;;  %v6662_v7 = vld [vmem:[#allocation52_spill] sm:$0xff] }
 0x446   : > { %v2086_v11 = vadd.f32 %v1950_v22, %v6660_v60  ;;  %4841 = vpow2.f32 %v2227_v17  ;;  %vm1931_vm5 = vcmp.lt.f32.partialorder %v1930_v39, 0.0004427343  ;;  %v6663_v3 = vand.u32 2147483647, %v5700_v12 }
 0x447   : > { %v2180_v1 = vmul.f32 0.5, %v2081_v34  ;;  %v3565_v37 = vsel %vm3551_vm2, %v2081_v34, 0.0  ;;  %v1932_v43 = vsel %vm1931_vm5, %v1929_v56, %v1926_v26  ;;  %4843 = vpow2.f32 %v1750_v33  ;;  %v4709_v34 = vld [vmem:[#allocation5 + $0x1b0] sm:$0xff]   ;;  %4424 = vmatpush3.bf16.msra.mxu0 %v4708_v57 }
 0x448   : > { %v3597_v32 = vsel %vm2102_vm0, %v6661_v28, %v3565_v37  ;;  %v2185_v27 = vmul.f32 0.5, %v2086_v11  ;;  %v3570_v23 = vsel %vm3551_vm2, %v2086_v11, 0.0  ;;  %v1706_v5 = vsub.f32 0.0, %v6663_v3  ;;  %v5991_v36 = vpop.eup %4833  ;;  %4425 = vmatprep.subr.bf16.mxu0 %v4709_v34 }
 0x449   : > { %3629 = vst [vmem:[%s5673_s20 + $0x68] sm:$0xff] %v3597_v32  ;;  %v3602_v59 = vsel %vm2102_vm0, %v6662_v7, %v3570_v23  ;;  %4845 = vpow2.f32 %v2223_v0  ;;  %v2225_v35 = vmul.f32 1.442695, %v2180_v1  ;;  %v6664_v21 = vmax.f32 %v5637_v53, 0.0  ;;  %v5999_v42 = vpop.eup %4835 }
 0x44a   : > { %3634 = vst [vmem:[%s5673_s20 + $0x90] sm:$0xff] %v3602_v59  ;;  %v1672_v44 = vand.u32 2147483647, %v5711_v54  ;;  %4847 = vpow2.f32 %v2229_v18  ;;  %v1637_v15 = vmax.f32 %v5656_v31, 0.0  ;;  %v1760_v51 = vmul.f32 1.442695, %v1706_v5 }
 0x44b   : > { %v2084_v25 = vadd.f32 %v1932_v43, %v6664_v21  ;;  %v1675_v8 = vand.u32 2147483647, %v5720_v9  ;;  %v2235_v62 = vmul.f32 1.442695, %v2185_v27  ;;  %v6003_v13 = vpop.eup %4837  ;;  %v1673_v17 = vand.u32 2147483647, %v5729_v41  ;;  %4426 = vmatpush3.bf16.msra.mxu0 %v4709_v34 }
 0x44c   : > { %v1704_v53 = vsub.f32 0.0, %v1672_v44  ;;  %4849 = vpow2.f32 %v1760_v51  ;;  %v1642_v48 = vmax.f32 %v5700_v12, 0.0  ;;  %v1678_v26 = vand.u32 2147483647, %v5764_v29  ;;  %v4840_v11 = vpop.eup %4839 }
 0x44d   : > { %v2183_v30 = vmul.f32 0.5, %v2084_v25  ;;  %v3568_v55 = vsel %vm3551_vm2, %v2084_v25, 0.0  ;;  %v1707_v39 = vsub.f32 0.0, %v1675_v8  ;;  %4851 = vpow2.f32 %v2225_v35 }
 0x44e   : > { %v3600_v49 = vsel %vm2102_vm0, %v5635_v10, %v3568_v55  ;;  %v1756_v38 = vmul.f32 1.442695, %v1704_v53  ;;  %v1705_v22 = vsub.f32 0.0, %v1673_v17  ;;  %4853 = vpow2.f32 %v2235_v62 }
 0x44f   : > { %3632 = vst [vmem:[%s5673_s20 + $0x80] sm:$0xff] %v3600_v49  ;;  %v1762_v20 = vmul.f32 1.442695, %v1707_v39  ;;  %v1676_v37 = vand.u32 2147483647, %v5773_v4  ;;  %v1710_v18 = vsub.f32 0.0, %v1678_v26 }
 0x450   : > { %v1679_v60 = vand.u32 2147483647, %v5786_v24  ;;  %v2231_v56 = vmul.f32 1.442695, %v2183_v30  ;;  %4855 = vpow2.f32 %v1756_v38  ;;  %v1758_v50 = vmul.f32 1.442695, %v1705_v22  ;;  %v6017_v32 = vpop.eup %4841 }
 0x451   : > { %v1951_v33 = vadd.f32 1.0, %v4840_v11  ;;  %v1954_v27 = vmul.f32 -0.5, %v4840_v11  ;;  %4857 = vpow2.f32 %v1762_v20  ;;  %v1677_v23 = vand.u32 2147483647, %v5792_v14  ;;  %v4844_v59 = vpop.eup %4843 }
 0x452   : > { %4859 = vpow2.f32 %v1758_v50  ;;  %v1768_v43 = vmul.f32 1.442695, %v1710_v18  ;;  %v1708_v3 = vsub.f32 0.0, %v1676_v37  ;;  %v1711_v5 = vsub.f32 0.0, %v1679_v60 }
 0x453   : > { %v6020_v35 = vpop.eup %4845  ;;  %4861 = vlog2.f32 %v1951_v33  ;;  %v1957_v21 = vand.u32 2147483647, %v4840_v11  ;;  %v1933_v25 = vadd.f32 1.0, %v4844_v59  ;;  %v1955_v51 = vadd.f32 1.0, %v1954_v27 }
 0x454   : > { %v6023_v57 = vpop.eup %4847  ;;  %v1936_v8 = vmul.f32 -0.5, %v4844_v59  ;;  %4863 = vpow2.f32 %v1768_v43  ;;  %v1764_v62 = vmul.f32 1.442695, %v1708_v3  ;;  %v1939_v30 = vand.u32 2147483647, %v4844_v59 }
 0x455   : > { %4865 = vlog2.f32 %v1933_v25  ;;  %v1709_v53 = vsub.f32 0.0, %v1677_v23  ;;  %v1770_v38 = vmul.f32 1.442695, %v1711_v5  ;;  %v1956_v60 = vmul.f32 %v4840_v11, %v1955_v51 }
 0x456   : > { %v4850_v49 = vpop.eup %4849  ;;  %v1937_v39 = vadd.f32 1.0, %v1936_v8  ;;  %4867 = vpow2.f32 %v1764_v62  ;;  %vm6030_vm6 = vcmp.lt.f32.partialorder %v1957_v21, 0.0004427343  ;;  %v1682_v18 = vand.u32 2147483647, %v5812_v61 }
 0x457   : > { %v6027_v20 = vpop.eup %4851  ;;  %4869 = vpow2.f32 %v2231_v56  ;;  %v1978_v22 = vadd.f32 1.0, %v4850_v49  ;;  %v1981_v26 = vmul.f32 -0.5, %v4850_v49  ;;  %v1766_v50 = vmul.f32 1.442695, %v1709_v53 }
 0x458   : > { %v6035_v33 = vpop.eup %4853  ;;  %vm6037_vm7 = vcmp.lt.f32.partialorder %v1939_v30, 0.0004427343  ;;  %v1984_v56 = vand.u32 2147483647, %v4850_v49  ;;  %v1938_v3 = vmul.f32 %v4844_v59, %v1937_v39  ;;  %v1714_v8 = vsub.f32 0.0, %v1682_v18 }
 0x459   : > { %4871 = vlog2.f32 %v1978_v22  ;;  %v1982_v11 = vadd.f32 1.0, %v1981_v26 }
 0x45a   : > { %v4856_v43 = vpop.eup %4855  ;;  %4873 = vpow2.f32 %v1770_v38  ;;  %vm6045_vm8 = vcmp.lt.f32.partialorder %v1984_v56, 0.0004427343  ;;  %v6049_v1 = vmul.f32 1.442695, %v1714_v8 }
 0x45b   : > { %v4858_v21 = vpop.eup %4857  ;;  %v1960_v25 = vadd.f32 1.0, %v4856_v43  ;;  %v1963_v51 = vmul.f32 -0.5, %v4856_v43  ;;  %4875 = vpow2.f32 %v1766_v50  ;;  %v1966_v39 = vand.u32 2147483647, %v4856_v43 }
 0x45c   : > { %v4860_v30 = vpop.eup %4859  ;;  %v1987_v53 = vadd.f32 1.0, %v4858_v21  ;;  %v1990_v37 = vmul.f32 -0.5, %v4858_v21  ;;  %v1993_v62 = vand.u32 2147483647, %v4858_v21  ;;  %v1983_v44 = vmul.f32 %v4850_v49, %v1982_v11 }
 0x45d   : > { %v4862_v17 = vpop.eup %4861  ;;  %4877 = vlog2.f32 %v1960_v25  ;;  %v1964_v59 = vadd.f32 1.0, %v1963_v51  ;;  %v1969_v38 = vadd.f32 1.0, %v4860_v30  ;;  %v1972_v50 = vmul.f32 -0.5, %v4860_v30 }
 0x45e   : > { %v4864_v26 = vpop.eup %4863  ;;  %v1953_v5 = vmul.f32 0.6931472, %v4862_v17  ;;  %4879 = vlog2.f32 %v1987_v53  ;;  %v1991_v18 = vadd.f32 1.0, %v1990_v37  ;;  %v1975_v51 = vand.u32 2147483647, %v4860_v30 }
 0x45f   : > { %v4866_v55 = vpop.eup %4865  ;;  %4881 = vlog2.f32 %v1969_v38  ;;  %v2014_v0 = vadd.f32 1.0, %v4864_v26  ;;  %v6671_v17 = vmax.f32 %v5648_v46, 0.0  ;;  %v1965_v53 = vmul.f32 %v4856_v43, %v1964_v59 }
 0x460   : > { %v6051_v22 = vpop.eup %4867  ;;  %v1959_v56 = vsel %vm6030_vm6, %v1956_v60, %v1953_v5  ;;  %v1935_v25 = vmul.f32 0.6931472, %v4866_v55  ;;  %vm6059_vm9 = vcmp.lt.f32.partialorder %v1966_v39, 0.0004427343  ;;  %v1992_v11 = vmul.f32 %v4858_v21, %v1991_v18 }
 0x461   : > { %v6055_v45 = vpop.eup %4869  ;;  %v2087_v37 = vadd.f32 %v1959_v56, %v6671_v17  ;;  %v2017_v8 = vmul.f32 -0.5, %v4864_v26  ;;  %vm6065_vm10 = vcmp.lt.f32.partialorder %v1993_v62, 0.0004427343  ;;  %v1973_v60 = vadd.f32 1.0, %v1972_v50 }
 0x462   : > { %v1941_v38 = vsel %vm6037_vm7, %v1938_v3, %v1935_v25  ;;  %4883 = vlog2.f32 %v2014_v0  ;;  %v1996_v46 = vadd.f32 1.0, %v6051_v22  ;;  %v2020_v59 = vand.u32 2147483647, %v4864_v26  ;;  %v6676_v3 = vld [vmem:[#allocation53_spill] sm:$0xff]  ;;  %v6679_v25 = vld [vmem:[#allocation54_spill] sm:$0xff] }
 0x463   : > { %v4872_v34 = vpop.eup %4871  ;;  %v2186_v43 = vmul.f32 0.5, %v2087_v37  ;;  %v3571_v5 = vsel %vm3551_vm2, %v2087_v37, 0.0  ;;  %v2085_v21 = vadd.f32 %v1941_v38, %v1637_v15  ;;  %vm6079_vm11 = vcmp.lt.f32.partialorder %v1975_v51, 0.0004427343 }
 0x464   : > { %v6074_v27 = vpop.eup %4873  ;;  %v3603_v62 = vsel %vm2102_vm0, %v6676_v3, %v3571_v5  ;;  %v1980_v39 = vmul.f32 0.6931472, %v4872_v34  ;;  %v2018_v18 = vadd.f32 1.0, %v2017_v8  ;;  %4885 = vlog2.f32 %v1996_v46 }
 0x465   : > { %v2237_v50 = vmul.f32 1.442695, %v2186_v43  ;;  %3635 = vst [vmem:[%s5673_s20 + $0x98] sm:$0xff] %v3603_v62  ;;  %v2184_v56 = vmul.f32 0.5, %v2085_v21  ;;  %v3569_v31 = vsel %vm3551_vm2, %v2085_v21, 0.0  ;;  %v6086_v15 = vpop.eup %4875  ;;  %v1974_v37 = vmul.f32 %v4860_v30, %v1973_v60 }
 0x466   : > { %v3601_v17 = vsel %vm2102_vm0, %v6679_v25, %v3569_v31  ;;  %v1986_v51 = vsel %vm6045_vm8, %v1983_v44, %v1980_v39  ;;  %v1999_v38 = vmul.f32 -0.5, %v6051_v22  ;;  %v2019_v5 = vmul.f32 %v4864_v26, %v2018_v18 }
 0x467   : > { %v4878_v8 = vpop.eup %4877  ;;  %v2233_v34 = vmul.f32 1.442695, %v2184_v56  ;;  %3633 = vst [vmem:[%s5673_s20 + $0x88] sm:$0xff] %v3601_v17  ;;  %v2090_v43 = vadd.f32 %v1986_v51, %v1642_v48  ;;  %vm6097_vm12 = vcmp.lt.f32.partialorder %v2020_v59, 0.0004427343  ;;  %4887 = vpow2.f32 %v2237_v50  ;;  %v6682_v48 = vld [vmem:[#allocation55_spill] sm:$0xff] }
 0x468   : > { %v4880_v21 = vpop.eup %4879  ;;  %v1962_v62 = vmul.f32 0.6931472, %v4878_v8  ;;  %v2000_v23 = vadd.f32 1.0, %v1999_v38  ;;  %v2023_v44 = vadd.f32 1.0, %v6074_v27  ;;  %v2002_v12 = vand.u32 2147483647, %v6051_v22 }
 0x469   : > { %v4882_v30 = vpop.eup %4881  ;;  %v2189_v60 = vmul.f32 0.5, %v2090_v43  ;;  %v3574_v39 = vsel %vm3551_vm2, %v2090_v43, 0.0  ;;  %v1989_v56 = vmul.f32 0.6931472, %v4880_v21  ;;  %v2026_v50 = vmul.f32 -0.5, %v6074_v27 }
 0x46a   : > { %v3606_v26 = vsel %vm2102_vm0, %v6682_v48, %v3574_v39  ;;  %v1968_v59 = vsel %vm6059_vm9, %v1965_v53, %v1962_v62  ;;  %v1971_v18 = vmul.f32 0.6931472, %v4882_v30  ;;  %4889 = vpow2.f32 %v2233_v34  ;;  %v6686_v62 = vld [vmem:[#allocation56_spill] sm:$0xff] }
 0x46b   : > { %v2243_v31 = vmul.f32 1.442695, %v2189_v60  ;;  %3638 = vst [vmem:[%s5673_s20 + $0xb0] sm:$0xff] %v3606_v26  ;;  %v6683_v17 = vmax.f32 %v5711_v54, 0.0  ;;  %v1995_v38 = vsel %vm6065_vm10, %v1992_v11, %v1989_v56  ;;  %v6684_v43 = vmax.f32 %v5720_v9, 0.0  ;;  %v6688_v26 = vld [vmem:[#allocation58_spill] sm:$0xff] }
 0x46c   : > { %v4884_v8 = vpop.eup %4883  ;;  %v1977_v53 = vsel %vm6079_vm11, %v1974_v37, %v1971_v18  ;;  %v2001_v49 = vmul.f32 %v6051_v22, %v2000_v23  ;;  %4891 = vlog2.f32 %v2023_v44  ;;  %v6685_v55 = vmax.f32 %v5729_v41, 0.0  ;;  %v6687_v44 = vld [vmem:[#allocation57_spill] sm:$0xff] }
 0x46d   : > { %v2088_v51 = vadd.f32 %v1968_v59, %v6683_v17  ;;  %v2091_v21 = vadd.f32 %v1995_v38, %v6684_v43  ;;  %4893 = vpow2.f32 %v2243_v31  ;;  %v2016_v22 = vmul.f32 0.6931472, %v4884_v8 }
 0x46e   : > { %v2089_v11 = vadd.f32 %v1977_v53, %v6685_v55  ;;  %v4886_v37 = vpop.eup %4885  ;;  %v6689_v17 = vmax.f32 %v5764_v29, 0.0  ;;  %vm2003_vm13 = vcmp.lt.f32.partialorder %v2002_v12, 0.0004427343  ;;  %v2027_v38 = vadd.f32 1.0, %v2026_v50  ;;  %v6691_v55 = vld [vmem:[#allocation60_spill] sm:$0xff] }
 0x46f   : > { %v2187_v34 = vmul.f32 0.5, %v2088_v51  ;;  %v3572_v54 = vsel %vm3551_vm2, %v2088_v51, 0.0  ;;  %v2190_v30 = vmul.f32 0.5, %v2091_v21  ;;  %v3575_v0 = vsel %vm3551_vm2, %v2091_v21, 0.0 }
 0x470   : > { %v3604_v9 = vsel %vm2102_vm0, %v6686_v62, %v3572_v54  ;;  %v3607_v60 = vsel %vm2102_vm0, %v6687_v44, %v3575_v0  ;;  %v2188_v39 = vmul.f32 0.5, %v2089_v11  ;;  %v3573_v41 = vsel %vm3551_vm2, %v2089_v11, 0.0 }
 0x471   : > { %v2239_v23 = vmul.f32 1.442695, %v2187_v34  ;;  %3636 = vst [vmem:[%s5673_s20 + $0xa0] sm:$0xff] %v3604_v9  ;;  %v2245_v56 = vmul.f32 1.442695, %v2190_v30  ;;  %3639 = vst [vmem:[%s5673_s20 + $0xb8] sm:$0xff] %v3607_v60  ;;  %v3605_v59 = vsel %vm2102_vm0, %v6688_v26, %v3573_v41  ;;  %v2022_v18 = vsel %vm6097_vm12, %v2019_v5, %v2016_v22  ;;  %v6145_v8 = vpop.eup %4887 }
 0x472   : > { %v1998_v31 = vmul.f32 0.6931472, %v4886_v37  ;;  %3637 = vst [vmem:[%s5673_s20 + $0xa8] sm:$0xff] %v3605_v59  ;;  %v2094_v51 = vadd.f32 %v2022_v18, %v6689_v17  ;;  %v2241_v43 = vmul.f32 1.442695, %v2188_v39  ;;  %v2005_v53 = vadd.f32 1.0, %v6086_v15 }
 0x473   : > { %4895 = vpow2.f32 %v2239_v23  ;;  %v6690_v46 = vmax.f32 %v5773_v4, 0.0  ;;  %v2029_v29 = vand.u32 2147483647, %v6074_v27  ;;  %v2008_v50 = vmul.f32 -0.5, %v6086_v15  ;;  %v6692_v37 = vld [vmem:[#allocation62_spill] sm:$0xff] }
 0x474   : > { %4897 = vpow2.f32 %v2245_v56  ;;  %v2004_v21 = vsel %vm2003_vm13, %v2001_v49, %v1998_v31  ;;  %v2193_v34 = vmul.f32 0.5, %v2094_v51  ;;  %v3578_v5 = vsel %vm3551_vm2, %v2094_v51, 0.0  ;;  %v6158_v11 = vpop.eup %4889 }
 0x475   : > { %v2092_v54 = vadd.f32 %v2004_v21, %v6690_v46  ;;  %v3610_v12 = vsel %vm2102_vm0, %v6691_v55, %v3578_v5  ;;  %4899 = vlog2.f32 %v2005_v53  ;;  %v1683_v49 = vand.u32 2147483647, %v5828_v6  ;;  %v6714_v55 = vld [vmem:[#allocation78_spill] sm:$0xff] }
 0x476   : > { %v2251_v9 = vmul.f32 1.442695, %v2193_v34  ;;  %3642 = vst [vmem:[%s5673_s20 + $0xd0] sm:$0xff] %v3610_v12  ;;  %v2011_v0 = vand.u32 2147483647, %v6086_v15  ;;  %v4892_v22 = vpop.eup %4891  ;;  %v2028_v60 = vmul.f32 %v6074_v27, %v2027_v38  ;;  %4901 = vpow2.f32 %v6049_v1  ;;  %v6696_v1 = vld [vmem:[#allocation74_spill] sm:$0xff] }
 0x477   : > { %v2191_v30 = vmul.f32 0.5, %v2092_v54  ;;  %v3576_v4 = vsel %vm3551_vm2, %v2092_v54, 0.0  ;;  %v6693_v39 = vand.u32 2147483647, %v5818_v16  ;;  %v6171_v56 = vpop.eup %4893  ;;  %4903 = vpow2.f32 %v2241_v43  ;;  %v6697_v38 = vld [vmem:[#allocation14_spill] sm:$0xff]  ;;  %v6698_v34 = vld [vmem:[#allocation68_spill] sm:$0xff] }
 0x478   : > { %v3608_v23 = vsel %vm2102_vm0, %v6692_v37, %v3576_v4  ;;  %v2025_v59 = vmul.f32 0.6931472, %v4892_v22  ;;  %vm2030_vm14 = vcmp.lt.f32.partialorder %v2029_v29, 0.0004427343  ;;  %v2009_v18 = vadd.f32 1.0, %v2008_v50  ;;  %v6700_v29 = vld [vmem:[#allocation15_spill] sm:$0xff] }
 0x479   : > { %v1712_v41 = vsub.f32 0.0, %v6693_v39  ;;  %3640 = vst [vmem:[%s5673_s20 + $0xc0] sm:$0xff] %v3608_v23  ;;  %4905 = vpow2.f32 %v2251_v9  ;;  %v2247_v31 = vmul.f32 1.442695, %v2191_v30  ;;  %v1715_v51 = vsub.f32 0.0, %v1683_v49  ;;  %v6701_v12 = vld [vmem:[#allocation71_spill] sm:$0xff] }
 0x47a   : > { %v2031_v21 = vsel %vm2030_vm14, %v2028_v60, %v2025_v59  ;;  %vm6174_vm15 = vcmp.lt.f32.partialorder %v2011_v0, 0.0004427343  ;;  %v1681_v27 = vand.u32 2147483647, %v6696_v1  ;;  %v2263_v5 = vmul.f32 %v6698_v34, %v6697_v38  ;;  %v6702_v30 = vld [vmem:[#allocation24_spill] sm:$0xff]  ;;  %v6704_v22 = vld [vmem:[#allocation66_spill] sm:$0xff] }
 0x47b   : > { %v1772_v17 = vmul.f32 1.442695, %v1712_v41  ;;  %v6699_v43 = vmax.f32 %v5786_v24, 0.0  ;;  %v1778_v54 = vmul.f32 1.442695, %v1715_v51  ;;  %v2264_v50 = vmul.f32 %v6701_v12, %v6700_v29  ;;  %v6703_v0 = vld [vmem:[#allocation16_spill] sm:$0xff] }
 0x47c   : > { %v1713_v9 = vsub.f32 0.0, %v1681_v27  ;;  %v2295_v4 = vadd.f32 %v2263_v5, %v6702_v30  ;;  %v2265_v23 = vmul.f32 %v6704_v22, %v6703_v0  ;;  %v6705_v60 = vld [vmem:[#allocation17_spill] sm:$0xff]  ;;  %v6707_v51 = vld [vmem:[#allocation27_spill] sm:$0xff]  ;;  %v6709_v5 = vld [vmem:[#allocation22_spill] sm:$0xff]  ;;  %v2010_v0 = vmul.f32 %v6086_v15, %v2009_v18 }
 0x47d   : > { %v2095_v46 = vadd.f32 %v2031_v21, %v6699_v43  ;;  %4907 = vpow2.f32 %v1772_v17  ;;  %v6185_v49 = vpop.eup %4895  ;;  %v6706_v39 = vld [vmem:[#allocation69_spill] sm:$0xff]  ;;  %v2296_v21 = vadd.f32 %v2264_v50, %v6707_v51  ;;  %v6708_v38 = vld [vmem:[#allocation63_spill] sm:$0xff]  ;;  %v6710_v29 = vld [vmem:[#allocation26_spill] sm:$0xff] }
 0x47e   : > { %v2266_v41 = vmul.f32 %v6706_v39, %v6705_v60  ;;  %v6192_v59 = vpop.eup %4897  ;;  %4909 = vpow2.f32 %v1778_v54  ;;  %v1774_v34 = vmul.f32 1.442695, %v1713_v9  ;;  %v2297_v43 = vadd.f32 %v6709_v5, %v2265_v23  ;;  %v6711_v60 = vld [vmem:[#allocation18_spill] sm:$0xff]  ;;  %v6712_v39 = vld [vmem:[#allocation76_spill] sm:$0xff]  ;;  %v6713_v54 = vld [vmem:[#allocation19_spill] sm:$0xff] }
 0x47f   : > { %v2194_v24 = vmul.f32 0.5, %v2095_v46  ;;  %v3579_v17 = vsel %vm3551_vm2, %v2095_v46, 0.0  ;;  %v4900_v30 = vpop.eup %4899  ;;  %v2327_v22 = vpack.c.bf16 %v2296_v21, %v2295_v4  ;;  %v2267_v46 = vmul.f32 %v6712_v39, %v6711_v60  ;;  %v6716_v9 = vld [vmem:[#allocation75_spill] sm:$0xff]  ;;  %v6719_v4 = vld [vmem:[#allocation21_spill] sm:$0xff] }
 0x480   : > { %v3611_v27 = vsel %vm2102_vm0, %v6708_v38, %v3579_v17  ;;  %v2298_v12 = vadd.f32 %v6710_v29, %v2266_v41  ;;  %v2268_v50 = vmul.f32 %v6714_v55, %v6713_v54  ;;  %v2007_v51 = vmul.f32 0.6931472, %v4900_v30  ;;  %v6715_v17 = vld [vmem:[#allocation20_spill] sm:$0xff]  ;;  %v4902_v23 = vpop.eup %4901  ;;  %v6718_v15 = vld [vmem:[#allocation39_spill] sm:$0xff]  ;;  %v6720_v21 = vld [vmem:[#allocation77_spill] sm:$0xff] }
 0x481   : > { %3643 = vst [vmem:[%s5673_s20 + $0xd8] sm:$0xff] %v3611_v27  ;;  %4911 = vpow2.f32 %v1774_v34  ;;  %v2269_v38 = vmul.f32 %v6716_v9, %v6715_v17  ;;  %v1649_v41 = vmax.f32 %v6696_v1, 0.0  ;;  %4381 = vmatprep.mubr.bf16.mxu1 %v2327_v22  ;;  %v6717_v27 = vld [vmem:[#allocation37_spill] sm:$0xff]  ;;  %v2270_v29 = vmul.f32 %v6720_v21, %v6719_v4  ;;  %v6215_v60 = vpop.eup %4903  ;;  %v6722_v54 = vld [vmem:[#allocation35_spill] sm:$0xff]  ;;  %v6723_v17 = vld [vmem:[#allocation38_spill] sm:$0xff] }
 0x482   : > { %v2328_v37 = vpack.c.bf16 %v2298_v12, %v2297_v43  ;;  %v2299_v5 = vadd.f32 %v2267_v46, %v6717_v27  ;;  %v2300_v18 = vadd.f32 %v2268_v50, %v6718_v15  ;;  %v2253_v55 = vmul.f32 1.442695, %v2194_v24  ;;  %v6724_v15 = vld [vmem:[#allocation23_spill] sm:$0xff]  ;;  %v6725_v4 = vld [vmem:[#allocation25_spill] sm:$0xff] }
 0x483   : > { %v2013_v34 = vsel %vm6174_vm15, %v2010_v0, %v2007_v51  ;;  %v2050_v43 = vadd.f32 1.0, %v4902_v23  ;;  %v2053_v12 = vmul.f32 -0.5, %v4902_v23  ;;  %v6219_v30 = vpop.eup %4905  ;;  %v6721_v22 = vmax.f32 %v5792_v14, 0.0 }
 0x484   : > { %4382 = vmatmul.mubr.bf16.vlgmr.msra.gmra.mrb[80].mxu1 %v2328_v37  ;;  %v2329_v46 = vpack.c.bf16 %v2300_v18, %v2299_v5  ;;  %v2301_v50 = vadd.f32 %v6722_v54, %v2269_v38  ;;  %v2302_v9 = vadd.f32 %v6723_v17, %v2270_v29  ;;  %v2056_v24 = vand.u32 2147483647, %v4902_v23  ;;  %v6726_v38 = vld [vmem:[#allocation65_spill] sm:$0xff] }
 0x485   : > { %v2093_v39 = vadd.f32 %v2013_v34, %v6721_v22  ;;  %4913 = vlog2.f32 %v2050_v43  ;;  %v2054_v27 = vadd.f32 1.0, %v2053_v12  ;;  %v2271_v53 = vmul.f32 %v5991_v36, %v6724_v15 }
 0x486   : > { %4385 = vmatprep.mubr.bf16.mxu1 %v2329_v46  ;;  %v2330_v14 = vpack.c.bf16 %v2302_v9, %v2301_v50  ;;  %v2272_v5 = vmul.f32 %v6003_v13, %v6725_v4  ;;  %4915 = vpow2.f32 %v2247_v31  ;;  %vm6237_vm1 = vcmp.lt.f32.partialorder %v2056_v24, 0.0004427343  ;;  %v6747_v31 = vld [vmem:[#allocation41_spill] sm:$0xff] }
 0x487   : > { %v4908_v0 = vpop.eup %4907  ;;  %v2192_v51 = vmul.f32 0.5, %v2093_v39  ;;  %v3577_v37 = vsel %vm3551_vm2, %v2093_v39, 0.0  ;;  %v2303_v12 = vadd.f32 %v2271_v53, %v5553_v19  ;;  %v2055_v13 = vmul.f32 %v4902_v23, %v2054_v27  ;;  %v6730_v19 = vld [vmem:[#allocation79_spill] sm:$0xff]  ;;  %v6733_v27 = vld [vmem:[#allocation29_spill] sm:$0xff] }
 0x488   : > { %v3609_v18 = vsel %vm2102_vm0, %v6726_v38, %v3577_v37  ;;  %v2032_v21 = vadd.f32 1.0, %v4908_v0  ;;  %v2035_v29 = vmul.f32 -0.5, %v4908_v0  ;;  %v4910_v34 = vpop.eup %4909  ;;  %v2038_v36 = vand.u32 2147483647, %v4908_v0  ;;  %v6753_v23 = vld [vmem:[#allocation45_spill] sm:$0xff] }
 0x489   : > { %v2249_v43 = vmul.f32 1.442695, %v2192_v51  ;;  %3641 = vst [vmem:[%s5673_s20 + $0xc8] sm:$0xff] %v3609_v18  ;;  %v2304_v22 = vadd.f32 %v2272_v5, %v5564_v58  ;;  %v2059_v46 = vadd.f32 1.0, %v4910_v34  ;;  %v2062_v54 = vmul.f32 -0.5, %v4910_v34  ;;  %v6729_v51 = vld [vmem:[#allocation28_spill] sm:$0xff] }
 0x48a   : > { %4917 = vlog2.f32 %v2032_v21  ;;  %v2036_v39 = vadd.f32 1.0, %v2035_v29  ;;  %v2065_v15 = vand.u32 2147483647, %v4910_v34  ;;  %v2273_v53 = vmul.f32 %v6730_v19, %v6729_v51  ;;  %v6734_v5 = vld [vmem:[#allocation47_spill] sm:$0xff]  ;;  %v6735_v21 = vld [vmem:[#allocation30_spill] sm:$0xff] }
 0x48b   : > { %4919 = vpow2.f32 %v2253_v55  ;;  %v2331_v50 = vpack.c.bf16 %v2304_v22, %v2303_v12  ;;  %v4912_v17 = vpop.eup %4911  ;;  %v2063_v9 = vadd.f32 1.0, %v2062_v54  ;;  %vm6243_vm3 = vcmp.lt.f32.partialorder %v2038_v36, 0.0004427343  ;;  %v6741_v51 = vld [vmem:[#allocation34_spill] sm:$0xff] }
 0x48c   : > { %4921 = vlog2.f32 %v2059_v46  ;;  %4386 = vmatmul.mubr.bf16.gmra.mrb[84].mxu1 %v2330_v14  ;;  %v2037_v58 = vmul.f32 %v4908_v0, %v2036_v39  ;;  %v2041_v37 = vadd.f32 1.0, %v4912_v17  ;;  %v2044_v4 = vmul.f32 -0.5, %v4912_v17  ;;  %v6736_v0 = vld [vmem:[#allocation31_spill] sm:$0xff]  ;;  %v6739_v46 = vld [vmem:[#allocation32_spill] sm:$0xff] }
 0x48d   : > { %4923 = vpow2.f32 %v2249_v43  ;;  %4389 = vmatprep.mubr.bf16.mxu1 %v2331_v50  ;;  %v2047_v55 = vand.u32 2147483647, %v4912_v17  ;;  %v2274_v24 = vmul.f32 %v5999_v42, %v6733_v27  ;;  %v2305_v18 = vadd.f32 %v6734_v5, %v2273_v53  ;;  %v6740_v50 = vld [vmem:[#allocation33_spill] sm:$0xff]  ;;  %v6743_v27 = vld [vmem:[#allocation40_spill] sm:$0xff] }
 0x48e   : > { %v2275_v14 = vmul.f32 %v6020_v35, %v6735_v21  ;;  %v2064_v29 = vmul.f32 %v4910_v34, %v2063_v9  ;;  %4925 = vlog2.f32 %v2041_v37  ;;  %v2045_v43 = vadd.f32 1.0, %v2044_v4  ;;  %v6742_v37 = vld [vmem:[#allocation36_spill] sm:$0xff]  ;;  %v6749_v21 = vld [vmem:[#allocation43_spill] sm:$0xff] }
 0x48f   : > { %v2276_v12 = vmul.f32 %v6027_v20, %v6736_v0  ;;  %v4914_v22 = vpop.eup %4913  ;;  %vm6254_vm4 = vcmp.lt.f32.partialorder %v2065_v15, 0.0004427343  ;;  %v2306_v39 = vadd.f32 %v5558_v40, %v2274_v24  ;;  %v2277_v54 = vmul.f32 %v6017_v32, %v6739_v46 }
 0x490   : > { %v2307_v42 = vadd.f32 %v2275_v14, %v6656_v2  ;;  %v2278_v35 = vmul.f32 %v6023_v57, %v6740_v50  ;;  %v2052_v34 = vmul.f32 0.6931472, %v4914_v22  ;;  %v6264_v9 = vmul.f32 %v4912_v17, %v2045_v43  ;;  %v4916_v19 = vpop.eup %4915 }
 0x491   : > { %v2308_v20 = vadd.f32 %v2276_v12, %v6661_v28  ;;  %v2279_v15 = vmul.f32 %v6055_v45, %v6741_v51  ;;  %v2332_v53 = vpack.c.bf16 %v2306_v39, %v2305_v18  ;;  %v2309_v40 = vadd.f32 %v5575_v47, %v2277_v54  ;;  %v6750_v39 = vld [vmem:[#allocation67_spill] sm:$0xff]  ;;  %v6752_v51 = vld [vmem:[#allocation44_spill] sm:$0xff] }
 0x492   : > { %v2310_v2 = vadd.f32 %v6659_v63, %v2278_v35  ;;  %v2280_v32 = vmul.f32 %v6158_v11, %v6742_v37  ;;  %v2058_v57 = vsel %vm6237_vm1, %v2055_v13, %v2052_v34  ;;  %v2281_v28 = vmul.f32 %v6035_v33, %v6743_v27  ;;  %v6756_v37 = vld [vmem:[#allocation70_spill] sm:$0xff] }
 0x493   : > { %v2333_v4 = vpack.c.bf16 %v2308_v20, %v2307_v42  ;;  %v2311_v17 = vadd.f32 %v2279_v15, %v5635_v10  ;;  %v6744_v45 = vmax.f32 %v5812_v61, 0.0  ;;  %vm6280_vm5 = vcmp.lt.f32.partialorder %v2047_v55, 0.0004427343  ;;  %v6748_v61 = vld [vmem:[#allocation42_spill] sm:$0xff] }
 0x494   : > { %v4918_v24 = vpop.eup %4917  ;;  %4390 = vmatmul.mubr.bf16.gmra.mrb[88].mxu1 %v2332_v53  ;;  %v2334_v63 = vpack.c.bf16 %v2310_v2, %v2309_v40  ;;  %v2312_v11 = vadd.f32 %v2280_v32, %v6679_v25  ;;  %v2282_v13 = vmul.f32 %v6145_v8, %v6747_v31  ;;  %v6288_v33 = vadd.f32 %v6662_v7, %v2281_v28  ;;  %v6754_v15 = vld [vmem:[#allocation46_spill] sm:$0xff]  ;;  %v6758_v28 = vld [vmem:[#allocation48_spill] sm:$0xff]  ;;  %v6760_v31 = vld [vmem:[#allocation59_spill] sm:$0xff] }
 0x495   : > { %v2098_v5 = vadd.f32 %v2058_v57, %v6744_v45  ;;  %v4920_v18 = vpop.eup %4919  ;;  %v2034_v10 = vmul.f32 0.6931472, %v4918_v24  ;;  %4393 = vmatprep.mubr.bf16.mxu1 %v2333_v4  ;;  %v2283_v55 = vmul.f32 %v6185_v49, %v6748_v61  ;;  %v2284_v14 = vmul.f32 %v6215_v60, %v6749_v21  ;;  %v6759_v24 = vld [vmem:[#allocation62_spill] sm:$0xff]  ;;  %v6762_v61 = vld [vmem:[#allocation73_spill] sm:$0xff] }
 0x496   : > { %v4922_v43 = vpop.eup %4921  ;;  %v2335_v12 = vpack.c.bf16 %v2312_v11, %v2311_v17  ;;  %v2314_v8 = vadd.f32 %v6676_v3, %v2282_v13  ;;  %v6751_v54 = vmax.f32 %v5818_v16, 0.0  ;;  %v2287_v53 = vmul.f32 %v4916_v19, %v6754_v15 }
 0x497   : > { %v2197_v0 = vmul.f32 0.5, %v2098_v5  ;;  %v3582_v25 = vsel %vm3551_vm2, %v2098_v5, 0.0  ;;  %v4924_v22 = vpop.eup %4923  ;;  %v2040_v42 = vsel %vm6243_vm3, %v2037_v58, %v2034_v10  ;;  %v2061_v49 = vmul.f32 0.6931472, %v4922_v43  ;;  %v5013_v43 = vld [vmem:[%s5346_s11 + $0x70] sm:$0xff]  }
 0x498   : > { %v3614_v7 = vsel %vm2102_vm0, %v6750_v39, %v3582_v25  ;;  %v2315_v46 = vadd.f32 %v2283_v55, %v6686_v62  ;;  %v2096_v50 = vadd.f32 %v2040_v42, %v6751_v54  ;;  %v2336_v35 = vpack.c.bf16 %v2314_v8, %v6288_v33  ;;  %v4926_v34 = vpop.eup %4925  ;;  %v6763_v55 = vld [vmem:[#allocation60_spill] sm:$0xff] }
 0x499   : > { %v2259_v60 = vmul.f32 1.442695, %v2197_v0  ;;  %3646 = vst [vmem:[%s5673_s20 + $0xf0] sm:$0xff] %v3614_v7  ;;  %v2316_v3 = vadd.f32 %v2284_v14, %v6688_v26  ;;  %v2067_v20 = vsel %vm6254_vm4, %v2064_v29, %v2061_v49  ;;  %v2285_v58 = vmul.f32 %v6171_v56, %v6752_v51  ;;  %v6764_v14 = vld [vmem:[#allocation63_spill] sm:$0xff]  ;;  %v5014_v7 = vld [vmem:[%s5346_s11 + $0x78] sm:$0xff]  }
 0x49a   : > { %v2286_v62 = vmul.f32 %v6192_v59, %v6753_v23  ;;  %v2195_v16 = vmul.f32 0.5, %v2096_v50  ;;  %v3580_v40 = vsel %vm3551_vm2, %v2096_v50, 0.0  ;;  %v6755_v2 = vmax.f32 %v5828_v6, 0.0  ;;  %v6757_v6 = vld [vmem:[#allocation72_spill] sm:$0xff] }
 0x49b   : > { %4927 = vpow2.f32 %v2259_v60  ;;  %v3612_v29 = vsel %vm2102_vm0, %v6756_v37, %v3580_v40  ;;  %v2043_v36 = vmul.f32 0.6931472, %v4926_v34  ;;  %v2337_v56 = vpack.c.bf16 %v2316_v3, %v2315_v46  ;;  %v4710_v40 = vld [vmem:[#allocation5 + $0x1b8] sm:$0xff]  }
 0x49c   : > { %v2099_v26 = vadd.f32 %v2067_v20, %v6755_v2  ;;  %v2317_v32 = vadd.f32 %v6682_v48, %v2285_v58  ;;  %v2255_v59 = vmul.f32 1.442695, %v2195_v16  ;;  %3644 = vst [vmem:[%s5673_s20 + $0xe0] sm:$0xff] %v3612_v29  ;;  %4394 = vmatmul.mubr.bf16.gmra.mrb[92].mxu1 %v2334_v63  ;;  %v2318_v4 = vadd.f32 %v6687_v44, %v2286_v62  ;;  %v4711_v2 = vld [vmem:[#allocation5 + $0x1c0] sm:$0xff]  }
 0x49d   : > { %v2049_v27 = vsel %vm6280_vm5, %v6264_v9, %v2043_v36  ;;  %4397 = vmatprep.mubr.bf16.mxu1 %v2335_v12  ;;  %v2288_v48 = vmul.f32 %v4924_v22, %v6758_v28  ;;  %v2319_v45 = vadd.f32 %v2287_v53, %v6759_v24  ;;  %v2289_v47 = vmul.f32 %v6219_v30, %v6760_v31  ;;  %v6761_v9 = vld [vmem:[#allocation61_spill] sm:$0xff]  ;;  %v6765_v30 = vld [vmem:[#allocation64_spill] sm:$0xff]  ;;  %v4715_v29 = vld [vmem:[#allocation5 + $0x1e0] sm:$0xff]  }
 0x49e   : > { %v2198_v19 = vmul.f32 0.5, %v2099_v26  ;;  %v3583_v57 = vsel %vm3551_vm2, %v2099_v26, 0.0  ;;  %4929 = vpow2.f32 %v2255_v59  ;;  %v2097_v44 = vadd.f32 %v2049_v27, %v1649_v41  ;;  %4427 = vmatprep.subr.bf16.mxu0 %v4710_v40  ;;  %v4712_v26 = vld [vmem:[#allocation5 + $0x1c8] sm:$0xff]   ;;  %4461 = vmatprep.subr.bf16.mxu1 %v4711_v2 }
 0x49f   : > { %v3615_v17 = vsel %vm2102_vm0, %v6757_v6, %v3583_v57  ;;  %v2338_v63 = vpack.c.bf16 %v2318_v4, %v2317_v32  ;;  %v2320_v11 = vadd.f32 %v2288_v48, %v6726_v38  ;;  %v2290_v13 = vmul.f32 %v4920_v18, %v6761_v9  ;;  %4428 = vmatpush3.bf16.msra.mxu0 %v4710_v40  ;;  %v4716_v36 = vld [vmem:[#allocation5 + $0x1e8] sm:$0xff]  }
 0x4a0   : > { %v2261_v5 = vmul.f32 1.442695, %v2198_v19  ;;  %3647 = vst [vmem:[%s5673_s20 + $0xf8] sm:$0xff] %v3615_v17  ;;  %v2196_v10 = vmul.f32 0.5, %v2097_v44  ;;  %v3581_v33 = vsel %vm3551_vm2, %v2097_v44, 0.0  ;;  %v2321_v21 = vadd.f32 %v6763_v55, %v2289_v47  ;;  %4462 = vmatpush3.bf16.msra.mxu1 %v4711_v2 }
 0x4a1   : > { %v3613_v1 = vsel %vm2102_vm0, %v6762_v61, %v3581_v33  ;;  %v2339_v41 = vpack.c.bf16 %v2320_v11, %v2319_v45  ;;  %v2322_v38 = vadd.f32 %v6764_v14, %v2290_v13  ;;  %v2131_v0 = vunpack.c.l.bf16 %v5013_v43  ;;  %4463 = vmatprep.subr.bf16.mxu1 %v4712_v26 }
 0x4a2   : > { %4931 = vpow2.f32 %v2261_v5  ;;  %v6766_v25 = vunpack.c.l.bf16 %v6765_v30  ;;  %v2257_v12 = vmul.f32 1.442695, %v2196_v10  ;;  %3645 = vst [vmem:[%s5673_s20 + $0xe8] sm:$0xff] %v3613_v1  ;;  %v2134_v42 = vunpack.c.h.bf16 %v5014_v7 }
 0x4a3   : > { %v2340_v8 = vpack.c.bf16 %v2322_v38, %v2321_v21  ;;  %v2163_v46 = vsel %vm2102_vm0, %v2131_v0, 0.0  ;;  %v2132_v50 = vunpack.c.h.bf16 %v5013_v43 }
 0x4a4   : > { %v2165_v18 = vsel %vm2102_vm0, %v6766_v25, 0.0  ;;  %4933 = vpow2.f32 %v2257_v12  ;;  %4398 = vmatmul.mubr.bf16.gmra.mrb[96].mxu1 %v2336_v35  ;;  %v2166_v3 = vsel %vm2102_vm0, %v2134_v42, 0.0 }
 0x4a5   : > { %v4928_v22 = vpop.eup %4927  ;;  %4401 = vmatprep.mubr.bf16.mxu1 %v2337_v56  ;;  %v2164_v35 = vsel %vm2102_vm0, %v2132_v50, 0.0  ;;  %4464 = vmatpush3.bf16.msra.mxu1 %v4712_v26  ;;  %v4717_v56 = vld [vmem:[#allocation5 + $0x1f0] sm:$0xff]  }
 0x4a6   : > { %v2293_v49 = vmul.f32 %v4928_v22, %v2165_v18  ;;  %4465 = vmatprep.subr.bf16.mxu1 %v4713_v52 }
 0x4a8   : > { %v2325_v60 = vadd.f32 %v6750_v39, %v2293_v49  ;;  %v4930_v54 = vpop.eup %4929 }
 0x4a9   : > { %v2291_v34 = vmul.f32 %v4930_v54, %v2163_v46  ;;  %4466 = vmatpush3.bf16.msra.mxu1 %v4713_v52 }
 0x4ab   : > { %v2323_v51 = vadd.f32 %v2291_v34, %v6756_v37  ;;  %v4714_v37 = vld [vmem:[#allocation5 + $0x1d8] sm:$0xff]  }
 0x4ac   : > { %v4932_v20 = vpop.eup %4931  ;;  %4402 = vmatmul.mubr.bf16.gmra.mrb[100].mxu1 %v2338_v63  ;;  %4467 = vmatprep.subr.bf16.mxu1 %v4714_v37 }
 0x4ad   : > { %v2294_v58 = vmul.f32 %v4932_v20, %v2166_v3  ;;  %4405 = vmatprep.mubr.bf16.mxu1 %v2339_v41  ;;  %4468 = vmatpush3.bf16.msra.mxu1 %v4714_v37 }
 0x4ae   : > { %v4934_v62 = vpop.eup %4933  ;;  %4469 = vmatprep.subr.bf16.mxu1 %v4715_v29 }
 0x4af   : > { %v2326_v23 = vadd.f32 %v6757_v6, %v2294_v58  ;;  %v2292_v15 = vmul.f32 %v4934_v62, %v2164_v35 }
 0x4b1   : > { %v2342_v39 = vpack.c.bf16 %v2326_v23, %v2325_v60  ;;  %v2324_v53 = vadd.f32 %v2292_v15, %v6762_v61  ;;  %4470 = vmatpush3.bf16.msra.mxu1 %v4715_v29 }
 0x4b2   : > { %4471 = vmatprep.subr.bf16.mxu1 %v4716_v36 }
 0x4b3   : > { %v2341_v16 = vpack.c.bf16 %v2324_v53, %v2323_v51 }
 0x4b4   : > { %4406 = vmatmul.mubr.bf16.gmra.mrb[104].mxu1 %v2340_v8 }
 0x4b5   : > { %4409 = vmatprep.mubr.bf16.mxu1 %v2341_v16  ;;  %4472 = vmatpush3.bf16.msra.mxu1 %v4716_v36 }
 0x4b6   : > { %4473 = vmatprep.subr.bf16.mxu1 %v4717_v56 }
 0x4b9   : > { %4474 = vmatpush3.bf16.msra.mxu1 %v4717_v56 }
 0x4bc   : > { %4410 = vmatmul.mubr.bf16.gmra.mrb[108].mxu1 %v2342_v39 }
 0x557   : > { %v4383_v32 = vpop.f32.mrb[80].mxu1 }
 0x558   : > { %v2442_v59 = vpop.f32.mrb[81].mxu1  ;;  %v2571_v57 = vmax.f32 %v4383_v32, 0.0 }
 0x559   : > { %v4384_v19 = vpop.f32.mrb[82].mxu1  ;;  %v2569_v17 = vmax.f32 %v2442_v59, 0.0 }
 0x55a   : > { %v2572_v4 = vmax.f32 %v4384_v19, 0.0  ;;  %v2445_v6 = vpop.f32.mrb[83].mxu1 }
 0x55b   : > { %v2570_v27 = vmax.f32 %v2445_v6, 0.0 }
 0x55c   : > { %v2602_v28 = vpack.c.bf16 %v2572_v4, %v2571_v57 }
 0x55d   : > { %v2601_v48 = vpack.c.bf16 %v2570_v27, %v2569_v17 }
 0x55f   : > { %v4387_v24 = vpop.f32.mrb[84].mxu1  ;;  %4429 = vmatprep.mubr.bf16.mxu0 %v2601_v48 }
 0x560   : > { %v2458_v45 = vpop.f32.mrb[85].mxu1  ;;  %4430 = vmatmul.mubr.bf16.vlgmr.msra.gmra.mrb[80].mxu0 %v2602_v28  ;;  %v2575_v44 = vmax.f32 %v4387_v24, 0.0 }
 0x561   : > { %v4388_v5 = vpop.f32.mrb[86].mxu1  ;;  %v2573_v31 = vmax.f32 %v2458_v45, 0.0 }
 0x562   : > { %v2576_v63 = vmax.f32 %v4388_v5, 0.0  ;;  %v2461_v11 = vpop.f32.mrb[87].mxu1 }
 0x563   : > { %v2574_v47 = vmax.f32 %v2461_v11, 0.0 }
 0x564   : > { %v2604_v9 = vpack.c.bf16 %v2576_v63, %v2575_v44 }
 0x565   : > { %v2603_v13 = vpack.c.bf16 %v2574_v47, %v2573_v31  ;;  %v4718_v31 = vld [vmem:[#allocation5 + $0x1f8] sm:$0xff]   ;;  %v4719_v47 = vld [vmem:[#allocation5 + $0x200] sm:$0xff]  }
 0x566   : > { %4475 = vmatprep.subr.bf16.mxu1 %v4718_v31  ;;  %4509 = vmatprep.subr.bf16.mxu0 %v4719_v47 }
 0x567   : > { %v4391_v10 = vpop.f32.mrb[88].mxu1  ;;  %4433 = vmatprep.mubr.bf16.mxu0 %v2603_v13  ;;  %4476 = vmatpush3.bf16.msra.mxu1 %v4718_v31  ;;  %v4721_v13 = vld [vmem:[#allocation5 + $0x210] sm:$0xff]  }
 0x568   : > { %v2474_v33 = vpop.f32.mrb[89].mxu1  ;;  %4434 = vmatmul.mubr.bf16.gmra.mrb[84].mxu0 %v2604_v9  ;;  %v2579_v1 = vmax.f32 %v4391_v10, 0.0  ;;  %v4720_v9 = vld [vmem:[#allocation5 + $0x208] sm:$0xff]   ;;  %v4722_v10 = vld [vmem:[#allocation5 + $0x218] sm:$0xff]  }
 0x569   : > { %v4392_v61 = vpop.f32.mrb[90].mxu1  ;;  %v2577_v21 = vmax.f32 %v2474_v33, 0.0  ;;  %4510 = vmatpush3.bf16.msra.mxu0 %v4719_v47  ;;  %v4723_v33 = vld [vmem:[#allocation5 + $0x220] sm:$0xff]  }
 0x56a   : > { %v2580_v41 = vmax.f32 %v4392_v61, 0.0  ;;  %v2477_v55 = vpop.f32.mrb[91].mxu1  ;;  %4511 = vmatprep.subr.bf16.mxu0 %v4720_v9  ;;  %v4724_v61 = vld [vmem:[#allocation5 + $0x228] sm:$0xff]  }
 0x56b   : > { %v2578_v14 = vmax.f32 %v2477_v55, 0.0 }
 0x56c   : > { %v2606_v38 = vpack.c.bf16 %v2580_v41, %v2579_v1  ;;  %v4725_v1 = vld [vmem:[#allocation5 + $0x230] sm:$0xff]  }
 0x56d   : > { %v2605_v43 = vpack.c.bf16 %v2578_v14, %v2577_v21  ;;  %4512 = vmatpush3.bf16.msra.mxu0 %v4720_v9 }
 0x56e   : > { %4513 = vmatprep.subr.bf16.mxu0 %v4721_v13 }
 0x56f   : > { %v4395_v0 = vpop.f32.mrb[92].mxu1  ;;  %4437 = vmatprep.mubr.bf16.mxu0 %v2605_v43 }
 0x570   : > { %v2490_v30 = vpop.f32.mrb[93].mxu1  ;;  %4438 = vmatmul.mubr.bf16.gmra.mrb[88].mxu0 %v2606_v38  ;;  %v2583_v18 = vmax.f32 %v4395_v0, 0.0 }
 0x571   : > { %v4396_v25 = vpop.f32.mrb[94].mxu1  ;;  %v2581_v22 = vmax.f32 %v2490_v30, 0.0  ;;  %4514 = vmatpush3.bf16.msra.mxu0 %v4721_v13 }
 0x572   : > { %v2584_v12 = vmax.f32 %v4396_v25, 0.0  ;;  %v2493_v8 = vpop.f32.mrb[95].mxu1  ;;  %4515 = vmatprep.subr.bf16.mxu0 %v4722_v10 }
 0x573   : > { %v2582_v7 = vmax.f32 %v2493_v8, 0.0 }
 0x574   : > { %v2608_v42 = vpack.c.bf16 %v2584_v12, %v2583_v18 }
 0x575   : > { %v2607_v49 = vpack.c.bf16 %v2582_v7, %v2581_v22  ;;  %4516 = vmatpush3.bf16.msra.mxu0 %v4722_v10 }
 0x576   : > { %4517 = vmatprep.subr.bf16.mxu0 %v4723_v33 }
 0x577   : > { %v4399_v46 = vpop.f32.mrb[96].mxu1  ;;  %4441 = vmatprep.mubr.bf16.mxu0 %v2607_v49 }
 0x578   : > { %v2506_v60 = vpop.f32.mrb[97].mxu1  ;;  %4442 = vmatmul.mubr.bf16.gmra.mrb[92].mxu0 %v2608_v42  ;;  %v2587_v50 = vmax.f32 %v4399_v46, 0.0 }
 0x579   : > { %v4400_v54 = vpop.f32.mrb[98].mxu1  ;;  %v2585_v20 = vmax.f32 %v2506_v60, 0.0  ;;  %4518 = vmatpush3.bf16.msra.mxu0 %v4723_v33 }
 0x57a   : > { %v2588_v3 = vmax.f32 %v4400_v54, 0.0  ;;  %v2509_v34 = vpop.f32.mrb[99].mxu1  ;;  %4519 = vmatprep.subr.bf16.mxu0 %v4724_v61 }
 0x57b   : > { %v2586_v51 = vmax.f32 %v2509_v34, 0.0 }
 0x57c   : > { %v2610_v58 = vpack.c.bf16 %v2588_v3, %v2587_v50 }
 0x57d   : > { %v2609_v35 = vpack.c.bf16 %v2586_v51, %v2585_v20  ;;  %4520 = vmatpush3.bf16.msra.mxu0 %v4724_v61 }
 0x57e   : > { %4521 = vmatprep.subr.bf16.mxu0 %v4725_v1 }
 0x57f   : > { %v4403_v23 = vpop.f32.mrb[100].mxu1  ;;  %4445 = vmatprep.mubr.bf16.mxu0 %v2609_v35 }
 0x580   : > { %v2522_v62 = vpop.f32.mrb[101].mxu1  ;;  %4446 = vmatmul.mubr.bf16.gmra.mrb[96].mxu0 %v2610_v58  ;;  %v2591_v39 = vmax.f32 %v4403_v23, 0.0 }
 0x581   : > { %v4404_v15 = vpop.f32.mrb[102].mxu1  ;;  %v2589_v40 = vmax.f32 %v2522_v62, 0.0  ;;  %4522 = vmatpush3.bf16.msra.mxu0 %v4725_v1 }
 0x582   : > { %v2592_v53 = vmax.f32 %v4404_v15, 0.0  ;;  %v2525_v16 = vpop.f32.mrb[103].mxu1 }
 0x583   : > { %v2590_v2 = vmax.f32 %v2525_v16, 0.0 }
 0x584   : > { %v2612_v26 = vpack.c.bf16 %v2592_v53, %v2591_v39 }
 0x585   : > { %v2611_v52 = vpack.c.bf16 %v2590_v2, %v2589_v40 }
 0x587   : > { %v4407_v37 = vpop.f32.mrb[104].mxu1  ;;  %4449 = vmatprep.mubr.bf16.mxu0 %v2611_v52 }
 0x588   : > { %v2538_v29 = vpop.f32.mrb[105].mxu1  ;;  %4450 = vmatmul.mubr.bf16.gmra.mrb[100].mxu0 %v2612_v26  ;;  %v2595_v56 = vmax.f32 %v4407_v37, 0.0 }
 0x589   : > { %v4408_v36 = vpop.f32.mrb[106].mxu1  ;;  %v2593_v19 = vmax.f32 %v2538_v29, 0.0 }
 0x58a   : > { %v2596_v32 = vmax.f32 %v4408_v36, 0.0  ;;  %v2541_v59 = vpop.f32.mrb[107].mxu1 }
 0x58b   : > { %v2594_v57 = vmax.f32 %v2541_v59, 0.0 }
 0x58c   : > { %v2614_v4 = vpack.c.bf16 %v2596_v32, %v2595_v56 }
 0x58d   : > { %v2613_v6 = vpack.c.bf16 %v2594_v57, %v2593_v19 }
 0x58f   : > { %v4411_v17 = vpop.f32.mrb[108].mxu1  ;;  %4453 = vmatprep.mubr.bf16.mxu0 %v2613_v6 }
 0x590   : > { %v2554_v27 = vpop.f32.mrb[109].mxu1  ;;  %4454 = vmatmul.mubr.bf16.gmra.mrb[104].mxu0 %v2614_v4  ;;  %v2599_v48 = vmax.f32 %v4411_v17, 0.0 }
 0x591   : > { %v4412_v28 = vpop.f32.mrb[110].mxu1  ;;  %v2597_v5 = vmax.f32 %v2554_v27, 0.0 }
 0x592   : > { %v2600_v24 = vmax.f32 %v4412_v28, 0.0  ;;  %v2557_v45 = vpop.f32.mrb[111].mxu1 }
 0x593   : > { %v2598_v44 = vmax.f32 %v2557_v45, 0.0 }
 0x594   : > { %v2616_v63 = vpack.c.bf16 %v2600_v24, %v2599_v48 }
 0x595   : > { %v2615_v11 = vpack.c.bf16 %v2598_v44, %v2597_v5 }
 0x597   : > { %4457 = vmatprep.mubr.bf16.mxu0 %v2615_v11 }
 0x598   : > { %4458 = vmatmul.mubr.bf16.gmra.mrb[108].mxu0 %v2616_v63 }
 0x633   : > { %v4431_v41 = vpop.f32.mrb[80].mxu0 }
 0x634   : > { %v2716_v55 = vpop.f32.mrb[81].mxu0  ;;  %v2845_v14 = vmax.f32 %v4431_v41, 0.0 }
 0x635   : > { %v4432_v21 = vpop.f32.mrb[82].mxu0  ;;  %v2843_v0 = vmax.f32 %v2716_v55, 0.0 }
 0x636   : > { %v2846_v38 = vmax.f32 %v4432_v21, 0.0  ;;  %v2719_v43 = vpop.f32.mrb[83].mxu0 }
 0x637   : > { %v2844_v30 = vmax.f32 %v2719_v43, 0.0 }
 0x638   : > { %v2876_v25 = vpack.c.bf16 %v2846_v38, %v2845_v14 }
 0x639   : > { %v2875_v18 = vpack.c.bf16 %v2844_v30, %v2843_v0 }
 0x63b   : > { %v4435_v12 = vpop.f32.mrb[84].mxu0  ;;  %4477 = vmatprep.mubr.bf16.mxu1 %v2875_v18 }
 0x63c   : > { %v2732_v8 = vpop.f32.mrb[85].mxu0  ;;  %4478 = vmatmul.mubr.bf16.vlgmr.msra.gmra.mrb[112].mxu1 %v2876_v25  ;;  %v2849_v7 = vmax.f32 %v4435_v12, 0.0 }
 0x63d   : > { %v4436_v22 = vpop.f32.mrb[86].mxu0  ;;  %v2847_v46 = vmax.f32 %v2732_v8, 0.0 }
 0x63e   : > { %v2850_v42 = vmax.f32 %v4436_v22, 0.0  ;;  %v2735_v49 = vpop.f32.mrb[87].mxu0 }
 0x63f   : > { %v2848_v60 = vmax.f32 %v2735_v49, 0.0 }
 0x640   : > { %v2878_v54 = vpack.c.bf16 %v2850_v42, %v2849_v7 }
 0x641   : > { %v2877_v50 = vpack.c.bf16 %v2848_v60, %v2847_v46  ;;  %v4726_v46 = vld [vmem:[#allocation5 + $0x238] sm:$0xff]  }
 0x642   : > { %4523 = vmatprep.subr.bf16.mxu0 %v4726_v46 }
 0x643   : > { %v4439_v3 = vpop.f32.mrb[88].mxu0  ;;  %4481 = vmatprep.mubr.bf16.mxu1 %v2877_v50  ;;  %4524 = vmatpush3.bf16.msra.mxu0 %v4726_v46 }
 0x644   : > { %v2748_v34 = vpop.f32.mrb[89].mxu0  ;;  %4482 = vmatmul.mubr.bf16.gmra.mrb[116].mxu1 %v2878_v54  ;;  %v2853_v51 = vmax.f32 %v4439_v3, 0.0 }
 0x645   : > { %v4440_v20 = vpop.f32.mrb[90].mxu0  ;;  %v2851_v23 = vmax.f32 %v2748_v34, 0.0 }
 0x646   : > { %v2854_v58 = vmax.f32 %v4440_v20, 0.0  ;;  %v2751_v35 = vpop.f32.mrb[91].mxu0 }
 0x647   : > { %v2852_v62 = vmax.f32 %v2751_v35, 0.0 }
 0x648   : > { %v2880_v15 = vpack.c.bf16 %v2854_v58, %v2853_v51 }
 0x649   : > { %v2879_v39 = vpack.c.bf16 %v2852_v62, %v2851_v23 }
 0x64b   : > { %v4443_v53 = vpop.f32.mrb[92].mxu0  ;;  %4485 = vmatprep.mubr.bf16.mxu1 %v2879_v39 }
 0x64c   : > { %v2764_v16 = vpop.f32.mrb[93].mxu0  ;;  %4486 = vmatmul.mubr.bf16.gmra.mrb[120].mxu1 %v2880_v15  ;;  %v2857_v2 = vmax.f32 %v4443_v53, 0.0 }
 0x64d   : > { %v4444_v40 = vpop.f32.mrb[94].mxu0  ;;  %v2855_v37 = vmax.f32 %v2764_v16, 0.0 }
 0x64e   : > { %v2858_v26 = vmax.f32 %v4444_v40, 0.0  ;;  %v2767_v52 = vpop.f32.mrb[95].mxu0 }
 0x64f   : > { %v2856_v29 = vmax.f32 %v2767_v52, 0.0 }
 0x650   : > { %v2882_v36 = vpack.c.bf16 %v2858_v26, %v2857_v2 }
 0x651   : > { %v2881_v56 = vpack.c.bf16 %v2856_v29, %v2855_v37 }
 0x653   : > { %v4447_v32 = vpop.f32.mrb[96].mxu0  ;;  %4489 = vmatprep.mubr.bf16.mxu1 %v2881_v56 }
 0x654   : > { %v2780_v59 = vpop.f32.mrb[97].mxu0  ;;  %4490 = vmatmul.mubr.bf16.gmra.mrb[124].mxu1 %v2882_v36  ;;  %v2861_v57 = vmax.f32 %v4447_v32, 0.0 }
 0x655   : > { %v4448_v19 = vpop.f32.mrb[98].mxu0  ;;  %v2859_v17 = vmax.f32 %v2780_v59, 0.0 }
 0x656   : > { %v2862_v4 = vmax.f32 %v4448_v19, 0.0  ;;  %v2783_v6 = vpop.f32.mrb[99].mxu0 }
 0x657   : > { %v2860_v27 = vmax.f32 %v2783_v6, 0.0 }
 0x658   : > { %v2884_v28 = vpack.c.bf16 %v2862_v4, %v2861_v57 }
 0x659   : > { %v2883_v48 = vpack.c.bf16 %v2860_v27, %v2859_v17 }
 0x65b   : > { %v4451_v24 = vpop.f32.mrb[100].mxu0  ;;  %4493 = vmatprep.mubr.bf16.mxu1 %v2883_v48 }
 0x65c   : > { %v2796_v45 = vpop.f32.mrb[101].mxu0  ;;  %4494 = vmatmul.mubr.bf16.gmra.mrb[128].mxu1 %v2884_v28  ;;  %v2865_v44 = vmax.f32 %v4451_v24, 0.0 }
 0x65d   : > { %v4452_v5 = vpop.f32.mrb[102].mxu0  ;;  %v2863_v31 = vmax.f32 %v2796_v45, 0.0 }
 0x65e   : > { %v2866_v63 = vmax.f32 %v4452_v5, 0.0  ;;  %v2799_v11 = vpop.f32.mrb[103].mxu0 }
 0x65f   : > { %v2864_v47 = vmax.f32 %v2799_v11, 0.0 }
 0x660   : > { %v2886_v9 = vpack.c.bf16 %v2866_v63, %v2865_v44 }
 0x661   : > { %v2885_v13 = vpack.c.bf16 %v2864_v47, %v2863_v31 }
 0x663   : > { %v4455_v10 = vpop.f32.mrb[104].mxu0  ;;  %4497 = vmatprep.mubr.bf16.mxu1 %v2885_v13 }
 0x664   : > { %v2812_v33 = vpop.f32.mrb[105].mxu0  ;;  %4498 = vmatmul.mubr.bf16.gmra.mrb[132].mxu1 %v2886_v9  ;;  %v2869_v1 = vmax.f32 %v4455_v10, 0.0 }
 0x665   : > { %v4456_v61 = vpop.f32.mrb[106].mxu0  ;;  %v2867_v21 = vmax.f32 %v2812_v33, 0.0 }
 0x666   : > { %v2870_v41 = vmax.f32 %v4456_v61, 0.0  ;;  %v2815_v55 = vpop.f32.mrb[107].mxu0 }
 0x667   : > { %v2868_v14 = vmax.f32 %v2815_v55, 0.0 }
 0x668   : > { %v2888_v38 = vpack.c.bf16 %v2870_v41, %v2869_v1 }
 0x669   : > { %v2887_v43 = vpack.c.bf16 %v2868_v14, %v2867_v21 }
 0x66b   : > { %v4459_v0 = vpop.f32.mrb[108].mxu0  ;;  %4501 = vmatprep.mubr.bf16.mxu1 %v2887_v43 }
 0x66c   : > { %v2828_v30 = vpop.f32.mrb[109].mxu0  ;;  %4502 = vmatmul.mubr.bf16.gmra.mrb[136].mxu1 %v2888_v38  ;;  %v2873_v18 = vmax.f32 %v4459_v0, 0.0 }
 0x66d   : > { %v4460_v25 = vpop.f32.mrb[110].mxu0  ;;  %v2871_v22 = vmax.f32 %v2828_v30, 0.0 }
 0x66e   : > { %v2874_v12 = vmax.f32 %v4460_v25, 0.0  ;;  %v2831_v8 = vpop.f32.mrb[111].mxu0 }
 0x66f   : > { %v2872_v7 = vmax.f32 %v2831_v8, 0.0 }
 0x670   : > { %v2890_v42 = vpack.c.bf16 %v2874_v12, %v2873_v18 }
 0x671   : > { %v2889_v49 = vpack.c.bf16 %v2872_v7, %v2871_v22 }
 0x673   : > { %4505 = vmatprep.mubr.bf16.mxu1 %v2889_v49 }
 0x674   : > { %4506 = vmatmul.mubr.bf16.gmra.mrb[140].mxu1 %v2890_v42 }
 0x70f   : > { %v4479_v60 = vpop.f32.mrb[112].mxu1 }
 0x710   : > { %v2990_v54 = vpop.f32.mrb[113].mxu1  ;;  %v3119_v3 = vmax.f32 %v4479_v60, 0.0 }
 0x711   : > { %v4480_v50 = vpop.f32.mrb[114].mxu1  ;;  %v3117_v51 = vmax.f32 %v2990_v54, 0.0 }
 0x712   : > { %v3120_v34 = vmax.f32 %v4480_v50, 0.0  ;;  %v2993_v20 = vpop.f32.mrb[115].mxu1 }
 0x713   : > { %v3118_v58 = vmax.f32 %v2993_v20, 0.0 }
 0x714   : > { %v3150_v35 = vpack.c.bf16 %v3120_v34, %v3119_v3 }
 0x715   : > { %v3149_v23 = vpack.c.bf16 %v3118_v58, %v3117_v51 }
 0x717   : > { %v4483_v62 = vpop.f32.mrb[116].mxu1  ;;  %4525 = vmatprep.mubr.bf16.mxu0 %v3149_v23 }
 0x718   : > { %v3006_v15 = vpop.f32.mrb[117].mxu1  ;;  %4526 = vmatmul.mubr.bf16.vlgmr.msra.gmra.mrb[112].mxu0 %v3150_v35  ;;  %v3123_v53 = vmax.f32 %v4483_v62, 0.0 }
 0x719   : > { %v4484_v39 = vpop.f32.mrb[118].mxu1  ;;  %v3121_v2 = vmax.f32 %v3006_v15, 0.0 }
 0x71a   : > { %v3124_v16 = vmax.f32 %v4484_v39, 0.0  ;;  %v3009_v40 = vpop.f32.mrb[119].mxu1 }
 0x71b   : > { %v3122_v26 = vmax.f32 %v3009_v40, 0.0 }
 0x71c   : > { %v3152_v52 = vpack.c.bf16 %v3124_v16, %v3123_v53 }
 0x71d   : > { %v3151_v37 = vpack.c.bf16 %v3122_v26, %v3121_v2 }
 0x71f   : > { %v4487_v29 = vpop.f32.mrb[120].mxu1  ;;  %4529 = vmatprep.mubr.bf16.mxu0 %v3151_v37 }
 0x720   : > { %v3022_v36 = vpop.f32.mrb[121].mxu1  ;;  %4530 = vmatmul.mubr.bf16.gmra.mrb[116].mxu0 %v3152_v52  ;;  %v3127_v32 = vmax.f32 %v4487_v29, 0.0 }
 0x721   : > { %v4488_v56 = vpop.f32.mrb[122].mxu1  ;;  %v3125_v57 = vmax.f32 %v3022_v36, 0.0 }
 0x722   : > { %v3128_v59 = vmax.f32 %v4488_v56, 0.0  ;;  %v3025_v19 = vpop.f32.mrb[123].mxu1 }
 0x723   : > { %v3126_v4 = vmax.f32 %v3025_v19, 0.0 }
 0x724   : > { %v3154_v6 = vpack.c.bf16 %v3128_v59, %v3127_v32 }
 0x725   : > { %v3153_v17 = vpack.c.bf16 %v3126_v4, %v3125_v57 }
 0x727   : > { %v4491_v27 = vpop.f32.mrb[124].mxu1  ;;  %4533 = vmatprep.mubr.bf16.mxu0 %v3153_v17 }
 0x728   : > { %v3038_v28 = vpop.f32.mrb[125].mxu1  ;;  %4534 = vmatmul.mubr.bf16.gmra.mrb[120].mxu0 %v3154_v6  ;;  %v3131_v24 = vmax.f32 %v4491_v27, 0.0 }
 0x729   : > { %v4492_v48 = vpop.f32.mrb[126].mxu1  ;;  %v3129_v44 = vmax.f32 %v3038_v28, 0.0 }
 0x72a   : > { %v3132_v45 = vmax.f32 %v4492_v48, 0.0  ;;  %v3041_v5 = vpop.f32.mrb[127].mxu1 }
 0x72b   : > { %v3130_v63 = vmax.f32 %v3041_v5, 0.0 }
 0x72c   : > { %v3156_v11 = vpack.c.bf16 %v3132_v45, %v3131_v24 }
 0x72d   : > { %v3155_v31 = vpack.c.bf16 %v3130_v63, %v3129_v44 }
 0x72f   : > { %v4495_v47 = vpop.f32.mrb[128].mxu1  ;;  %4537 = vmatprep.mubr.bf16.mxu0 %v3155_v31 }
 0x730   : > { %v3054_v9 = vpop.f32.mrb[129].mxu1  ;;  %4538 = vmatmul.mubr.bf16.gmra.mrb[124].mxu0 %v3156_v11  ;;  %v3135_v10 = vmax.f32 %v4495_v47, 0.0 }
 0x731   : > { %v4496_v13 = vpop.f32.mrb[130].mxu1  ;;  %v3133_v1 = vmax.f32 %v3054_v9, 0.0 }
 0x732   : > { %v3136_v33 = vmax.f32 %v4496_v13, 0.0  ;;  %v3057_v61 = vpop.f32.mrb[131].mxu1 }
 0x733   : > { %v3134_v41 = vmax.f32 %v3057_v61, 0.0 }
 0x734   : > { %v3158_v55 = vpack.c.bf16 %v3136_v33, %v3135_v10 }
 0x735   : > { %v3157_v21 = vpack.c.bf16 %v3134_v41, %v3133_v1 }
 0x737   : > { %v4499_v14 = vpop.f32.mrb[132].mxu1  ;;  %4541 = vmatprep.mubr.bf16.mxu0 %v3157_v21 }
 0x738   : > { %v3070_v38 = vpop.f32.mrb[133].mxu1  ;;  %4542 = vmatmul.mubr.bf16.gmra.mrb[128].mxu0 %v3158_v55  ;;  %v3139_v0 = vmax.f32 %v4499_v14, 0.0 }
 0x739   : > { %v4500_v43 = vpop.f32.mrb[134].mxu1  ;;  %v3137_v18 = vmax.f32 %v3070_v38, 0.0 }
 0x73a   : > { %v3140_v30 = vmax.f32 %v4500_v43, 0.0  ;;  %v3073_v25 = vpop.f32.mrb[135].mxu1 }
 0x73b   : > { %v3138_v12 = vmax.f32 %v3073_v25, 0.0 }
 0x73c   : > { %v3160_v8 = vpack.c.bf16 %v3140_v30, %v3139_v0 }
 0x73d   : > { %v3159_v22 = vpack.c.bf16 %v3138_v12, %v3137_v18 }
 0x73f   : > { %v4503_v7 = vpop.f32.mrb[136].mxu1  ;;  %4545 = vmatprep.mubr.bf16.mxu0 %v3159_v22 }
 0x740   : > { %v3086_v42 = vpop.f32.mrb[137].mxu1  ;;  %4546 = vmatmul.mubr.bf16.gmra.mrb[132].mxu0 %v3160_v8  ;;  %v3143_v46 = vmax.f32 %v4503_v7, 0.0 }
 0x741   : > { %v4504_v49 = vpop.f32.mrb[138].mxu1  ;;  %v3141_v50 = vmax.f32 %v3086_v42, 0.0 }
 0x742   : > { %v3144_v60 = vmax.f32 %v4504_v49, 0.0  ;;  %v3089_v54 = vpop.f32.mrb[139].mxu1 }
 0x743   : > { %v3142_v3 = vmax.f32 %v3089_v54, 0.0 }
 0x744   : > { %v3162_v34 = vpack.c.bf16 %v3144_v60, %v3143_v46 }
 0x745   : > { %v3161_v20 = vpack.c.bf16 %v3142_v3, %v3141_v50 }
 0x747   : > { %v4507_v51 = vpop.f32.mrb[140].mxu1  ;;  %4549 = vmatprep.mubr.bf16.mxu0 %v3161_v20 }
 0x748   : > { %v3102_v58 = vpop.f32.mrb[141].mxu1  ;;  %4550 = vmatmul.mubr.bf16.gmra.mrb[136].mxu0 %v3162_v34  ;;  %v3147_v23 = vmax.f32 %v4507_v51, 0.0 }
 0x749   : > { %v4508_v35 = vpop.f32.mrb[142].mxu1  ;;  %v3145_v39 = vmax.f32 %v3102_v58, 0.0 }
 0x74a   : > { %v3148_v62 = vmax.f32 %v4508_v35, 0.0  ;;  %v3105_v15 = vpop.f32.mrb[143].mxu1 }
 0x74b   : > { %v3146_v53 = vmax.f32 %v3105_v15, 0.0 }
 0x74c   : > { %v3164_v16 = vpack.c.bf16 %v3148_v62, %v3147_v23 }
 0x74d   : > { %v3163_v40 = vpack.c.bf16 %v3146_v53, %v3145_v39 }
 0x74f   : > { %4553 = vmatprep.mubr.bf16.mxu0 %v3163_v40 }
 0x750   : > { %4554 = vmatmul.mubr.bf16.gmra.mrb[140].mxu0 %v3164_v16 }
 0x751   : > { %5086 = shalt.err (!%p5083_p7)
}
 0x752   : > { %s5087_s30 = scalar_lea.hbm %s6372_s25, 4096  ;;  %s5091_s10 = scalar_lea.hbm %s6497_s3, 16384 }
 0x753   : > { %p5088_p9 = scmp.ne.s32.totalorder %s6372_s25, %s5087_s30  ;;  %p5092_p5 = scmp.lt.u32.totalorder %s6372_s25, %s6497_s3 }
 0x754   : > { %p5093_p10 = scmp.lt.u32.totalorder %s5091_s10, %s5087_s30  ;;  %p5095_p4 = scmp.lt.u32.totalorder %s5087_s30, %s6372_s25 }
 0x755   : > { %p5089_p1 = pnand %p5088_p9, %p5291_p12 }
 0x756   : > { %p5094_p2 = por %p5093_p10, %p5092_p5 }
 0x757   : > { %p5090_p0 = pneg %p5089_p1 }
 0x758   : > { %p5096_p6 = por %p5095_p4, %p5094_p2 }
 0x75a   : > { %p5097_p8 = pnand %p5096_p6, %p5090_p0 }
 0x75c   : > { %5100 = shalt.err (!%p5097_p8)
}
 0x75d   : > { %s5182_s9 = smov 128   ;;  %s5183_s4 = smov 8  }
 0x75e   : > { %4580 = dma.vmem_to_hbm [thread:$0]  (%p5291_p12), %s6375_s26, 4096, %s6372_s25, %s3654_s5, %s5182_s9, %s5182_s9, %s5183_s4  }
 0x75f   : > { %s6406_s25 = scalar_lea.vmem [#allocation7], %s3808_s18  ;;  %s6444_s27 = scalar_lea.hbm %s6496_s2, %s3907_s8 }
 0x760   : > { %s3667_s18 = sshll.u32 %s6406_s25, 4  ;;  %s3649_s28 = scalar_lea.sflag [#allocation4], %s5342_s6  ;;  %s6446_s18 = int_to_ptr.vmem [resolvable:$true] %s3667_s18 }
 0x761   : > { %s5101_s23 = scalar_lea.vmem %s6446_s18, 4096  ;;  %s5184_s29 = smov [#allocation7]  }
 0x762   : > { %p5102_p11 = scmp.ne.s32.totalorder %s6446_s18, %s5101_s23  ;;  %s5105_s16 = sshll.u32 %s5184_s29, 4  ;;  %s5106_s16 = int_to_ptr.vmem [resolvable:$false] %s5105_s16 }
 0x763   : > { %s5107_s30 = scalar_lea.vmem %s5106_s16, 8192  ;;  %p5108_p7 = scmp.lt.s32.totalorder %s6446_s18, %s5106_s16 }
 0x764   : > { %p5103_p13 = pnand %p5102_p11, %p5291_p12  ;;  %p5109_p9 = scmp.lt.s32.totalorder %s5107_s30, %s5101_s23 }
 0x766   : > { %p5104_p3 = pneg %p5103_p13  ;;  %p5110_p1 = por %p5109_p9, %p5108_p7 }
 0x768   : > { %p5111_p0 = pnand %p5110_p1, %p5104_p3 }
 0x7eb   : > { %v4527_v2 = vpop.f32.mrb[112].mxu0 }
 0x7ec   : > { %v3393_v26 = vmul.f32 0.5, %v4527_v2  ;;  %v3264_v52 = vpop.f32.mrb[113].mxu0 }
 0x7ed   : > { %v3391_v37 = vmul.f32 0.5, %v3264_v52  ;;  %v4528_v29 = vpop.f32.mrb[114].mxu0 }
 0x7ee   : > { %4935 = vtanh.f32 %v3393_v26  ;;  %v3394_v36 = vmul.f32 0.5, %v4528_v29  ;;  %v3267_v56 = vpop.f32.mrb[115].mxu0 }
 0x7ef   : > { %4937 = vtanh.f32 %v3391_v37  ;;  %v3392_v32 = vmul.f32 0.5, %v3267_v56 }
 0x7f0   : > { %4939 = vtanh.f32 %v3394_v36 }
 0x7f1   : > { %4941 = vtanh.f32 %v3392_v32 }
 0x7f3   : > { %v4531_v59 = vpop.f32.mrb[116].mxu0 }
 0x7f4   : > { %v3397_v19 = vmul.f32 0.5, %v4531_v59  ;;  %v3280_v57 = vpop.f32.mrb[117].mxu0 }
 0x7f5   : > { %v3395_v4 = vmul.f32 0.5, %v3280_v57  ;;  %v4532_v6 = vpop.f32.mrb[118].mxu0 }
 0x7f6   : > { %4943 = vtanh.f32 %v3397_v19  ;;  %v3398_v17 = vmul.f32 0.5, %v4532_v6  ;;  %v3283_v27 = vpop.f32.mrb[119].mxu0 }
 0x7f7   : > { %4945 = vtanh.f32 %v3395_v4  ;;  %v3396_v28 = vmul.f32 0.5, %v3283_v27 }
 0x7f8   : > { %v4936_v48 = vpop.eup %4935  ;;  %4947 = vtanh.f32 %v3398_v17 }
 0x7f9   : > { %v4938_v24 = vpop.eup %4937  ;;  %v3457_v45 = vadd.f32 1.0, %v4936_v48  ;;  %4949 = vtanh.f32 %v3396_v28 }
 0x7fa   : > { %v4940_v5 = vpop.eup %4939  ;;  %v3455_v44 = vadd.f32 1.0, %v4938_v24 }
 0x7fb   : > { %v4942_v63 = vpop.eup %4941  ;;  %v3489_v11 = vmul.f32 0.5, %v3457_v45  ;;  %v3458_v31 = vadd.f32 1.0, %v4940_v5  ;;  %v4535_v47 = vpop.f32.mrb[120].mxu0 }
 0x7fc   : > { %v3487_v9 = vmul.f32 0.5, %v3455_v44  ;;  %v3456_v13 = vadd.f32 1.0, %v4942_v63  ;;  %v3401_v10 = vmul.f32 0.5, %v4535_v47  ;;  %v3296_v33 = vpop.f32.mrb[121].mxu0 }
 0x7fd   : > { %3521 = vst [vmem:[%s6406_s25 + $0x10] sm:$0xff] %v3489_v11  ;;  %v3490_v61 = vmul.f32 0.5, %v3458_v31  ;;  %v3399_v1 = vmul.f32 0.5, %v3296_v33  ;;  %v4536_v41 = vpop.f32.mrb[122].mxu0 }
 0x7fe   : > { %3519 = vst [vmem:[%s6406_s25] sm:$0xff] %v3487_v9  ;;  %v3488_v55 = vmul.f32 0.5, %v3456_v13  ;;  %4951 = vtanh.f32 %v3401_v10  ;;  %v3402_v21 = vmul.f32 0.5, %v4536_v41  ;;  %v3299_v14 = vpop.f32.mrb[123].mxu0 }
 0x7ff   : > { %3522 = vst [vmem:[%s6406_s25 + $0x18] sm:$0xff] %v3490_v61  ;;  %4953 = vtanh.f32 %v3399_v1  ;;  %v3400_v38 = vmul.f32 0.5, %v3299_v14 }
 0x800   : > { %v4944_v43 = vpop.eup %4943  ;;  %3520 = vst [vmem:[%s6406_s25 + $0x8] sm:$0xff] %v3488_v55  ;;  %4955 = vtanh.f32 %v3402_v21 }
 0x801   : > { %v4946_v0 = vpop.eup %4945  ;;  %v3461_v30 = vadd.f32 1.0, %v4944_v43  ;;  %4957 = vtanh.f32 %v3400_v38 }
 0x802   : > { %v4948_v25 = vpop.eup %4947  ;;  %v3459_v18 = vadd.f32 1.0, %v4946_v0 }
 0x803   : > { %v4950_v12 = vpop.eup %4949  ;;  %v3493_v8 = vmul.f32 0.5, %v3461_v30  ;;  %v3462_v22 = vadd.f32 1.0, %v4948_v25  ;;  %v4539_v7 = vpop.f32.mrb[124].mxu0 }
 0x804   : > { %v3491_v42 = vmul.f32 0.5, %v3459_v18  ;;  %v3460_v49 = vadd.f32 1.0, %v4950_v12  ;;  %v3405_v46 = vmul.f32 0.5, %v4539_v7  ;;  %v3312_v60 = vpop.f32.mrb[125].mxu0 }
 0x805   : > { %3525 = vst [vmem:[%s6406_s25 + $0x30] sm:$0xff] %v3493_v8  ;;  %v3494_v54 = vmul.f32 0.5, %v3462_v22  ;;  %v3403_v50 = vmul.f32 0.5, %v3312_v60  ;;  %v4540_v3 = vpop.f32.mrb[126].mxu0 }
 0x806   : > { %3523 = vst [vmem:[%s6406_s25 + $0x20] sm:$0xff] %v3491_v42  ;;  %v3492_v34 = vmul.f32 0.5, %v3460_v49  ;;  %4959 = vtanh.f32 %v3405_v46  ;;  %v3406_v20 = vmul.f32 0.5, %v4540_v3  ;;  %v3315_v51 = vpop.f32.mrb[127].mxu0 }
 0x807   : > { %3526 = vst [vmem:[%s6406_s25 + $0x38] sm:$0xff] %v3494_v54  ;;  %4961 = vtanh.f32 %v3403_v50  ;;  %v3404_v58 = vmul.f32 0.5, %v3315_v51 }
 0x808   : > { %v4952_v35 = vpop.eup %4951  ;;  %3524 = vst [vmem:[%s6406_s25 + $0x28] sm:$0xff] %v3492_v34  ;;  %4963 = vtanh.f32 %v3406_v20 }
 0x809   : > { %v4954_v23 = vpop.eup %4953  ;;  %v3465_v62 = vadd.f32 1.0, %v4952_v35  ;;  %4965 = vtanh.f32 %v3404_v58 }
 0x80a   : > { %v4956_v15 = vpop.eup %4955  ;;  %v3463_v39 = vadd.f32 1.0, %v4954_v23 }
 0x80b   : > { %v4958_v53 = vpop.eup %4957  ;;  %v3497_v16 = vmul.f32 0.5, %v3465_v62  ;;  %v3466_v40 = vadd.f32 1.0, %v4956_v15  ;;  %v4543_v2 = vpop.f32.mrb[128].mxu0 }
 0x80c   : > { %v3495_v26 = vmul.f32 0.5, %v3463_v39  ;;  %v3464_v52 = vadd.f32 1.0, %v4958_v53  ;;  %v3409_v37 = vmul.f32 0.5, %v4543_v2  ;;  %v3328_v29 = vpop.f32.mrb[129].mxu0 }
 0x80d   : > { %3529 = vst [vmem:[%s6406_s25 + $0x50] sm:$0xff] %v3497_v16  ;;  %v3498_v36 = vmul.f32 0.5, %v3466_v40  ;;  %v3407_v56 = vmul.f32 0.5, %v3328_v29  ;;  %v4544_v32 = vpop.f32.mrb[130].mxu0 }
 0x80e   : > { %3527 = vst [vmem:[%s6406_s25 + $0x40] sm:$0xff] %v3495_v26  ;;  %v3496_v59 = vmul.f32 0.5, %v3464_v52  ;;  %4967 = vtanh.f32 %v3409_v37  ;;  %v3410_v19 = vmul.f32 0.5, %v4544_v32  ;;  %v3331_v57 = vpop.f32.mrb[131].mxu0 }
 0x80f   : > { %3530 = vst [vmem:[%s6406_s25 + $0x58] sm:$0xff] %v3498_v36  ;;  %4969 = vtanh.f32 %v3407_v56  ;;  %v3408_v4 = vmul.f32 0.5, %v3331_v57 }
 0x810   : > { %v4960_v6 = vpop.eup %4959  ;;  %3528 = vst [vmem:[%s6406_s25 + $0x48] sm:$0xff] %v3496_v59  ;;  %4971 = vtanh.f32 %v3410_v19 }
 0x811   : > { %v4962_v17 = vpop.eup %4961  ;;  %v3469_v27 = vadd.f32 1.0, %v4960_v6  ;;  %4973 = vtanh.f32 %v3408_v4 }
 0x812   : > { %v4964_v28 = vpop.eup %4963  ;;  %v3467_v48 = vadd.f32 1.0, %v4962_v17 }
 0x813   : > { %v4966_v24 = vpop.eup %4965  ;;  %v3501_v45 = vmul.f32 0.5, %v3469_v27  ;;  %v3470_v5 = vadd.f32 1.0, %v4964_v28  ;;  %v4547_v44 = vpop.f32.mrb[132].mxu0 }
 0x814   : > { %v3499_v63 = vmul.f32 0.5, %v3467_v48  ;;  %v3468_v11 = vadd.f32 1.0, %v4966_v24  ;;  %v3413_v31 = vmul.f32 0.5, %v4547_v44  ;;  %v3344_v47 = vpop.f32.mrb[133].mxu0 }
 0x815   : > { %3533 = vst [vmem:[%s6406_s25 + $0x70] sm:$0xff] %v3501_v45  ;;  %v3502_v9 = vmul.f32 0.5, %v3470_v5  ;;  %v3411_v13 = vmul.f32 0.5, %v3344_v47  ;;  %v4548_v10 = vpop.f32.mrb[134].mxu0 }
 0x816   : > { %3531 = vst [vmem:[%s6406_s25 + $0x60] sm:$0xff] %v3499_v63  ;;  %v3500_v33 = vmul.f32 0.5, %v3468_v11  ;;  %4975 = vtanh.f32 %v3413_v31  ;;  %v3414_v61 = vmul.f32 0.5, %v4548_v10  ;;  %v3347_v1 = vpop.f32.mrb[135].mxu0 }
 0x817   : > { %3534 = vst [vmem:[%s6406_s25 + $0x78] sm:$0xff] %v3502_v9  ;;  %4977 = vtanh.f32 %v3411_v13  ;;  %v3412_v41 = vmul.f32 0.5, %v3347_v1 }
 0x818   : > { %v4968_v55 = vpop.eup %4967  ;;  %3532 = vst [vmem:[%s6406_s25 + $0x68] sm:$0xff] %v3500_v33  ;;  %4979 = vtanh.f32 %v3414_v61 }
 0x819   : > { %v4970_v21 = vpop.eup %4969  ;;  %v3473_v14 = vadd.f32 1.0, %v4968_v55  ;;  %4981 = vtanh.f32 %v3412_v41 }
 0x81a   : > { %v4972_v38 = vpop.eup %4971  ;;  %v3471_v43 = vadd.f32 1.0, %v4970_v21 }
 0x81b   : > { %v4974_v0 = vpop.eup %4973  ;;  %v3505_v30 = vmul.f32 0.5, %v3473_v14  ;;  %v3474_v25 = vadd.f32 1.0, %v4972_v38  ;;  %v4551_v18 = vpop.f32.mrb[136].mxu0 }
 0x81c   : > { %v3503_v12 = vmul.f32 0.5, %v3471_v43  ;;  %v3472_v8 = vadd.f32 1.0, %v4974_v0  ;;  %v3417_v22 = vmul.f32 0.5, %v4551_v18  ;;  %v3360_v7 = vpop.f32.mrb[137].mxu0 }
 0x81d   : > { %3537 = vst [vmem:[%s6406_s25 + $0x90] sm:$0xff] %v3505_v30  ;;  %v3506_v42 = vmul.f32 0.5, %v3474_v25  ;;  %v3415_v49 = vmul.f32 0.5, %v3360_v7  ;;  %v4552_v46 = vpop.f32.mrb[138].mxu0 }
 0x81e   : > { %3535 = vst [vmem:[%s6406_s25 + $0x80] sm:$0xff] %v3503_v12  ;;  %v3504_v60 = vmul.f32 0.5, %v3472_v8  ;;  %4983 = vtanh.f32 %v3417_v22  ;;  %v3418_v54 = vmul.f32 0.5, %v4552_v46  ;;  %v3363_v50 = vpop.f32.mrb[139].mxu0 }
 0x81f   : > { %3538 = vst [vmem:[%s6406_s25 + $0x98] sm:$0xff] %v3506_v42  ;;  %4985 = vtanh.f32 %v3415_v49  ;;  %v3416_v3 = vmul.f32 0.5, %v3363_v50 }
 0x820   : > { %v4976_v34 = vpop.eup %4975  ;;  %3536 = vst [vmem:[%s6406_s25 + $0x88] sm:$0xff] %v3504_v60  ;;  %4987 = vtanh.f32 %v3418_v54 }
 0x821   : > { %v4978_v20 = vpop.eup %4977  ;;  %v3477_v51 = vadd.f32 1.0, %v4976_v34  ;;  %4989 = vtanh.f32 %v3416_v3 }
 0x822   : > { %v4980_v58 = vpop.eup %4979  ;;  %v3475_v35 = vadd.f32 1.0, %v4978_v20 }
 0x823   : > { %v4982_v23 = vpop.eup %4981  ;;  %v3509_v62 = vmul.f32 0.5, %v3477_v51  ;;  %v3478_v15 = vadd.f32 1.0, %v4980_v58  ;;  %v4555_v39 = vpop.f32.mrb[140].mxu0 }
 0x824   : > { %v3507_v53 = vmul.f32 0.5, %v3475_v35  ;;  %v3476_v16 = vadd.f32 1.0, %v4982_v23  ;;  %v3421_v40 = vmul.f32 0.5, %v4555_v39  ;;  %v3376_v2 = vpop.f32.mrb[141].mxu0 }
 0x825   : > { %3541 = vst [vmem:[%s6406_s25 + $0xb0] sm:$0xff] %v3509_v62  ;;  %v3510_v26 = vmul.f32 0.5, %v3478_v15  ;;  %v3419_v52 = vmul.f32 0.5, %v3376_v2  ;;  %v4556_v37 = vpop.f32.mrb[142].mxu0 }
 0x826   : > { %3539 = vst [vmem:[%s6406_s25 + $0xa0] sm:$0xff] %v3507_v53  ;;  %v3508_v29 = vmul.f32 0.5, %v3476_v16  ;;  %4991 = vtanh.f32 %v3421_v40  ;;  %v3422_v36 = vmul.f32 0.5, %v4556_v37  ;;  %v3379_v56 = vpop.f32.mrb[143].mxu0 }
 0x827   : > { %3542 = vst [vmem:[%s6406_s25 + $0xb8] sm:$0xff] %v3510_v26  ;;  %4993 = vtanh.f32 %v3419_v52  ;;  %v3420_v32 = vmul.f32 0.5, %v3379_v56 }
 0x828   : > { %v4984_v59 = vpop.eup %4983  ;;  %3540 = vst [vmem:[%s6406_s25 + $0xa8] sm:$0xff] %v3508_v29  ;;  %4995 = vtanh.f32 %v3422_v36 }
 0x829   : > { %v4986_v19 = vpop.eup %4985  ;;  %v3481_v57 = vadd.f32 1.0, %v4984_v59  ;;  %4997 = vtanh.f32 %v3420_v32 }
 0x82a   : > { %v4988_v4 = vpop.eup %4987  ;;  %v3479_v6 = vadd.f32 1.0, %v4986_v19 }
 0x82b   : > { %v4990_v17 = vpop.eup %4989  ;;  %v3513_v27 = vmul.f32 0.5, %v3481_v57  ;;  %v3482_v28 = vadd.f32 1.0, %v4988_v4 }
 0x82c   : > { %v3511_v48 = vmul.f32 0.5, %v3479_v6  ;;  %v3480_v24 = vadd.f32 1.0, %v4990_v17 }
 0x82d   : > { %3545 = vst [vmem:[%s6406_s25 + $0xd0] sm:$0xff] %v3513_v27  ;;  %v3514_v45 = vmul.f32 0.5, %v3482_v28 }
 0x82e   : > { %3543 = vst [vmem:[%s6406_s25 + $0xc0] sm:$0xff] %v3511_v48  ;;  %v3512_v5 = vmul.f32 0.5, %v3480_v24 }
 0x82f   : > { %3546 = vst [vmem:[%s6406_s25 + $0xd8] sm:$0xff] %v3514_v45 }
 0x830   : > { %v4992_v44 = vpop.eup %4991  ;;  %3544 = vst [vmem:[%s6406_s25 + $0xc8] sm:$0xff] %v3512_v5 }
 0x831   : > { %v4994_v63 = vpop.eup %4993  ;;  %v3485_v11 = vadd.f32 1.0, %v4992_v44 }
 0x832   : > { %v4996_v31 = vpop.eup %4995  ;;  %v3483_v47 = vadd.f32 1.0, %v4994_v63 }
 0x833   : > { %v4998_v9 = vpop.eup %4997  ;;  %v3517_v13 = vmul.f32 0.5, %v3485_v11  ;;  %v3486_v10 = vadd.f32 1.0, %v4996_v31 }
 0x834   : > { %v3515_v33 = vmul.f32 0.5, %v3483_v47  ;;  %v3484_v61 = vadd.f32 1.0, %v4998_v9 }
 0x835   : > { %3549 = vst [vmem:[%s6406_s25 + $0xf0] sm:$0xff] %v3517_v13  ;;  %v3518_v1 = vmul.f32 0.5, %v3486_v10 }
 0x836   : > { %3547 = vst [vmem:[%s6406_s25 + $0xe0] sm:$0xff] %v3515_v33  ;;  %v3516_v41 = vmul.f32 0.5, %v3484_v61 }
 0x837   : > { %3550 = vst [vmem:[%s6406_s25 + $0xf8] sm:$0xff] %v3518_v1 }
 0x838   : > { %3548 = vst [vmem:[%s6406_s25 + $0xe8] sm:$0xff] %v3516_v41 }
 0x839   : > { %5114 = shalt.err (!%p5111_p0)
}
 0x83a   : > { %s5115_s8 = scalar_lea.hbm %s6444_s27, 4096  ;;  %s5119_s10 = scalar_lea.hbm %s6496_s2, 16384 }
 0x83b   : > { %p5116_p5 = scmp.ne.s32.totalorder %s6444_s27, %s5115_s8  ;;  %p5120_p4 = scmp.lt.u32.totalorder %s6444_s27, %s6496_s2 }
 0x83c   : > { %p5121_p6 = scmp.lt.u32.totalorder %s5119_s10, %s5115_s8  ;;  %p5123_p11 = scmp.lt.u32.totalorder %s5115_s8, %s6444_s27 }
 0x83d   : > { %p5117_p10 = pnand %p5116_p5, %p5291_p12 }
 0x83e   : > { %p5122_p8 = por %p5121_p6, %p5120_p4 }
 0x83f   : > { %p5118_p2 = pneg %p5117_p10 }
 0x840   : > { %p5124_p13 = por %p5123_p11, %p5122_p8 }
 0x842   : > { %p5125_p3 = pnand %p5124_p13, %p5118_p2 }
 0x844   : > { %5128 = shalt.err (!%p5125_p3)
}
 0x845   : > { %4579 = dma.vmem_to_hbm [thread:$0]  (%p5291_p12), %s6446_s18, 4096, %s6444_s27, %s3649_s28, %s5182_s9, %s5182_s9, %s5183_s4  }
 0x846 PF: > { %p4601_p7 = scmp.ge.s32.totalorder %s5175_s15, 2  ;;  %s3698_s25 = sand.u32 1, %s5163_s12  }
 0x847   : > { %p6767_p9 = scmp.ne.s32.totalorder %s6531_s19, 0  ;;  %s3699_s26 = scalar_lea.sflag [#allocation4], %s3698_s25 }
 0x849   : > { %p4592_p1 = pnand %p4601_p7, %p6767_p9 }
 0x84b   : > { %5154 = dma.done.wait (!%p4592_p1), %s3699_s26, 4096  }
 0x84c   : > { %5156 = vsyncadd (!%p4592_p1), %s3699_s26, 4294963200  ;;  %s3708_s21 = scalar_lea.sflag [#allocation9], %s3698_s25 }
 0x84d   : > { %5158 = dma.done.wait (!%p4592_p1), %s3708_s21, 4096  }
 0x84e   : > { %5160 = vsyncadd (!%p4592_p1), %s3708_s21, 4294963200  ;;  %p21_p12 = scmp.ge.s32.totalorder %s5258_s24, 6   ;;  %s6768_s12 = smov %s5167_s13 }
 0x84f   : > { %s6769_s13 = smov %s5171_s14  ;;  %s6770_s14 = smov %s5287_s17 }
 0x850   : > { %s6771_s15 = smov %s5258_s24  ;;  %23 = sbr.rel (!%p21_p12) target bundleno = 8 (0x8), region = 102 }
 0x857   :  { %3713 = vsyncpa [#allocation3], 1 }
 0x858   :  { %3715 = vsyncpa [#allocation3 + $0x1], 1 }
 0x859   :  { %3716 = vsyncpa [#allocation6], 1 }
 0x85a   :  { %3717 = vsyncpa [#allocation4], 1 }
 0x85b   :  { %3719 = vsyncpa [#allocation4 + $0x1], 1 }
 0x85c   :  { %3720 = vsyncpa [#allocation9], 1 }
 0x85d   :  { %3722 = vsyncpa [#allocation9 + $0x1], 1 }

</bundles_post_ra>
